<compile_context>
chip_gen: v6e
topology: v6e:2x2x1
jax: 0.10.0
libtpu: 0.0.40
codegen_flags: <defaults>
</compile_context>

<pallas_src>
import jax
import jax.numpy as jnp
from jax.experimental import pallas as pl
from jax.experimental.pallas import tpu as pltpu


def _make_fused_kernel(flows, shift, feats_base, chans, B, K):
    """Build the fused kernel for a fixed static flow configuration."""
    n_params = 6 * flows

    def kernel(*refs):
        x_ref, hist_ref = refs[0], refs[1]
        p_refs = refs[2:2 + n_params]
        y_ref = refs[2 + n_params]          # (C0, B*K) VMEM output == state buffer
        logdet_ref = refs[3 + n_params]     # (B,) SMEM output

        # Conditioning history, shared by every flow step (loaded/hoisted once).
        hist = hist_ref[...]                # (Fh, B*K) f32

        # y_ref doubles as the VMEM-resident flow state: rows frozen at split
        # points are never touched again, so at the end it holds Z directly.
        y_ref[...] = x_ref[...]

        # Per-batch log-det accumulators (scalars on the scalar path).
        ld = [jnp.float32(0.0)] * B

        off = 0
        for k in range(flows):              # static unroll over flow steps
            if k % shift == 0 and k > 0:
                off += feats_base           # freeze rows [off - feats_base, off)
            C = chans[k]
            half = C // 2
            loc, scale, w1, b1, w2, b2 = (r[...] for r in p_refs[6 * k:6 * k + 6])

            xk = y_ref[off:off + C, :]      # (C, B*K) current active slab

            # --- ActNorm:  y = scale * (x + loc) ---
            x_an = scale * (xk + loc)
            in_a = x_an[:half, :]
            in_b = x_an[half:, :]

            # --- coupling net: o = W2 @ relu(W1 @ [in_a ; hist] + b1) + b2 ---
            # Single layer-1 matmul over the whole batch; bf16 operands, f32 acc.
            net_in = jnp.concatenate([in_a, hist], axis=0).astype(jnp.bfloat16)
            h = jnp.dot(w1.astype(jnp.bfloat16), net_in,
                        preferred_element_type=jnp.float32) + b1
            h = jnp.maximum(h, 0.0)
            o = jnp.dot(w2.astype(jnp.bfloat16), h.astype(jnp.bfloat16),
                        preferred_element_type=jnp.float32) + b2

            log_s = o[:half, :]
            t = o[half:, :]
            z = log_s + 2.0
            s = jax.nn.sigmoid(z)
            out_b = (in_b + t) * s

            # Store the two halves directly (no concat, no extra VMEM temp).
            y_ref[off:off + half, :] = in_a.astype(y_ref.dtype)
            y_ref[off + half:off + C, :] = out_b.astype(y_ref.dtype)

            # --- log-det ---
            # stable log(sigmoid(z)) = min(z, 0) - log(1 + exp(-|z|))
            log_sig = jnp.minimum(z, 0.0) - jnp.log(1.0 + jnp.exp(-jnp.abs(z)))
            # ActNorm contributes K*sum(log|scale|); the module divides by K,
            # so add sum(log|scale|) directly (no *K / /K round trip).
            ld_n = jnp.sum(jnp.log(jnp.abs(scale)))
            for b in range(B):
                ld[b] = ld[b] + ld_n + jnp.sum(log_sig[:, b * K:(b + 1) * K])

        for b in range(B):
            logdet_ref[b] = ld[b]

    return kernel


def flow_aff_act_forward(future_enc, history_enc, params,
                         feats_hidden, blocks, flows):
    """JAX wrapper reproducing Flow_aff_act.forward with one fused Pallas call."""
    B, C0, K = future_enc.shape
    Fh = history_enc.shape[1]
    feats_base = feats_hidden // blocks
    shift = flows // blocks

    # Static per-step channel counts (mirrors the module's split schedule).
    chans = []
    fb = feats_hidden
    for k in range(flows):
        if k % shift == 0 and k > 0:
            fb -= feats_base
        chans.append(fb)

    BK = B * K
    # Layout plumbing in the wrapper (not in-kernel): (B,C,K) -> (C, B*K).
    x2 = jnp.transpose(future_enc, (1, 0, 2)).reshape(C0, BK)
    h2 = jnp.transpose(history_enc, (1, 0, 2)).reshape(Fh, BK)

    flat_params = [arr for tup in params for arr in tup]
    n_in = 2 + len(flat_params)

    kernel = _make_fused_kernel(flows, shift, feats_base, chans, B, K)

    y2, log_det = pl.pallas_call(
        kernel,
        out_shape=(jax.ShapeDtypeStruct((C0, BK), future_enc.dtype),
                   jax.ShapeDtypeStruct((B,), jnp.float32)),
        in_specs=[pl.BlockSpec(memory_space=pltpu.MemorySpace.VMEM)] * n_in,
        out_specs=(pl.BlockSpec(memory_space=pltpu.MemorySpace.VMEM),
                   pl.BlockSpec(memory_space=pltpu.MemorySpace.SMEM)),
    )(x2, h2, *flat_params)

    Z = jnp.transpose(y2.reshape(C0, B, K), (1, 0, 2))   # back to (B, C, K)
    return Z, log_det


def init_params(key, feats_hidden, blocks, flows):
    """Deterministic synthetic parameters matching the module's shapes.

    The first coupling-net layer weight is stored pre-merged:
    W1 = [W1_a | W1_hist] with shape (H, half + feats_hidden)."""
    feats_base = feats_hidden // blocks
    shift = flows // blocks
    params = []
    feats_block = feats_hidden
    H = feats_hidden
    for i in range(flows):
        if i % shift == 0 and i > 0:
            feats_block = feats_block - feats_base
        half = feats_block // 2
        key, k0, k1, k2, k3 = jax.random.split(key, 5)
        loc = 0.1 * jax.random.normal(k0, (feats_block, 1), jnp.float32)
        scale = 0.75 + 0.5 * jax.random.uniform(k1, (feats_block, 1), jnp.float32)
        w1 = 0.1 * jax.random.normal(k2, (H, half + feats_hidden), jnp.float32)
        b1 = jnp.zeros((H, 1), jnp.float32)
        w2 = 0.05 * jax.random.normal(k3, (feats_block, H), jnp.float32)
        b2 = jnp.zeros((feats_block, 1), jnp.float32)
        params.append((loc, scale, w1, b1, w2, b2))
    return params


if __name__ == "__main__":
    # args: feats_hidden=32, blocks=4, flows=8 -> feats_base=8, shift=2; K=8
    feats_hidden, blocks, flows, K = 32, 4, 8, 8
    B = 2

    key = jax.random.PRNGKey(0)
    k_f, k_h, k_p = jax.random.split(key, 3)
    future_enc = jax.random.normal(k_f, (B, feats_hidden, K), jnp.float32)
    history_enc = jax.random.normal(k_h, (B, feats_hidden, K), jnp.float32)
    params = init_params(k_p, feats_hidden, blocks, flows)

    fwd = jax.jit(flow_aff_act_forward, static_argnums=(3, 4, 5))
    Z, log_det = fwd(future_enc, history_enc, params,
                     feats_hidden, blocks, flows)
    Z, log_det = jax.block_until_ready((Z, log_det))

    assert Z.shape == (B, feats_hidden, K), Z.shape
    assert log_det.shape == (B,), log_det.shape
    assert bool(jnp.all(jnp.isfinite(Z))) and bool(jnp.all(jnp.isfinite(log_det)))
    print("KERNEL_OK")
</pallas_src>

<mosaic_0001>
module attributes {stable_mosaic.version = 11 : i64} {
  func.func @kernel(%arg0: memref<32x16xf32, #tpu.memory_space<vmem>>, %arg1: memref<32x16xf32, #tpu.memory_space<vmem>>, %arg2: memref<32x1xf32, #tpu.memory_space<vmem>>, %arg3: memref<32x1xf32, #tpu.memory_space<vmem>>, %arg4: memref<32x48xf32, #tpu.memory_space<vmem>>, %arg5: memref<32x1xf32, #tpu.memory_space<vmem>>, %arg6: memref<32x32xf32, #tpu.memory_space<vmem>>, %arg7: memref<32x1xf32, #tpu.memory_space<vmem>>, %arg8: memref<32x1xf32, #tpu.memory_space<vmem>>, %arg9: memref<32x1xf32, #tpu.memory_space<vmem>>, %arg10: memref<32x48xf32, #tpu.memory_space<vmem>>, %arg11: memref<32x1xf32, #tpu.memory_space<vmem>>, %arg12: memref<32x32xf32, #tpu.memory_space<vmem>>, %arg13: memref<32x1xf32, #tpu.memory_space<vmem>>, %arg14: memref<24x1xf32, #tpu.memory_space<vmem>>, %arg15: memref<24x1xf32, #tpu.memory_space<vmem>>, %arg16: memref<32x44xf32, #tpu.memory_space<vmem>>, %arg17: memref<32x1xf32, #tpu.memory_space<vmem>>, %arg18: memref<24x32xf32, #tpu.memory_space<vmem>>, %arg19: memref<24x1xf32, #tpu.memory_space<vmem>>, %arg20: memref<24x1xf32, #tpu.memory_space<vmem>>, %arg21: memref<24x1xf32, #tpu.memory_space<vmem>>, %arg22: memref<32x44xf32, #tpu.memory_space<vmem>>, %arg23: memref<32x1xf32, #tpu.memory_space<vmem>>, %arg24: memref<24x32xf32, #tpu.memory_space<vmem>>, %arg25: memref<24x1xf32, #tpu.memory_space<vmem>>, %arg26: memref<16x1xf32, #tpu.memory_space<vmem>>, %arg27: memref<16x1xf32, #tpu.memory_space<vmem>>, %arg28: memref<32x40xf32, #tpu.memory_space<vmem>>, %arg29: memref<32x1xf32, #tpu.memory_space<vmem>>, %arg30: memref<16x32xf32, #tpu.memory_space<vmem>>, %arg31: memref<16x1xf32, #tpu.memory_space<vmem>>, %arg32: memref<16x1xf32, #tpu.memory_space<vmem>>, %arg33: memref<16x1xf32, #tpu.memory_space<vmem>>, %arg34: memref<32x40xf32, #tpu.memory_space<vmem>>, %arg35: memref<32x1xf32, #tpu.memory_space<vmem>>, %arg36: memref<16x32xf32, #tpu.memory_space<vmem>>, %arg37: memref<16x1xf32, #tpu.memory_space<vmem>>, %arg38: memref<8x1xf32, #tpu.memory_space<vmem>>, %arg39: memref<8x1xf32, #tpu.memory_space<vmem>>, %arg40: memref<32x36xf32, #tpu.memory_space<vmem>>, %arg41: memref<32x1xf32, #tpu.memory_space<vmem>>, %arg42: memref<8x32xf32, #tpu.memory_space<vmem>>, %arg43: memref<8x1xf32, #tpu.memory_space<vmem>>, %arg44: memref<8x1xf32, #tpu.memory_space<vmem>>, %arg45: memref<8x1xf32, #tpu.memory_space<vmem>>, %arg46: memref<32x36xf32, #tpu.memory_space<vmem>>, %arg47: memref<32x1xf32, #tpu.memory_space<vmem>>, %arg48: memref<8x32xf32, #tpu.memory_space<vmem>>, %arg49: memref<8x1xf32, #tpu.memory_space<vmem>>, %arg50: memref<32x16xf32, #tpu.memory_space<vmem>>, %arg51: memref<2xf32, #tpu.memory_space<smem>>) attributes {dimension_semantics = [], scalar_prefetch = 0 : i64, scratch_operands = 0 : i64, tpu.core_type = #tpu.core_type<tc>} {
    %c0 = arith.constant 0 : index
    %c0_0 = arith.constant 0 : index
    %0 = vector.load %arg1[%c0, %c0_0] : memref<32x16xf32, #tpu.memory_space<vmem>>, vector<32x16xf32>
    %c0_1 = arith.constant 0 : index
    %c0_2 = arith.constant 0 : index
    %1 = vector.load %arg0[%c0_1, %c0_2] : memref<32x16xf32, #tpu.memory_space<vmem>>, vector<32x16xf32>
    %c0_3 = arith.constant 0 : index
    %c0_4 = arith.constant 0 : index
    %2 = vector.load %arg50[%c0_3, %c0_4] : memref<32x16xf32, #tpu.memory_space<vmem>>, vector<32x16xf32>
    tpu.vector_store %arg50[%c0_3, %c0_4], %1 {strides = array<i32>} : memref<32x16xf32, #tpu.memory_space<vmem>>, vector<32x16xf32>,
    %c0_5 = arith.constant 0 : index
    %c0_6 = arith.constant 0 : index
    %3 = vector.load %arg2[%c0_5, %c0_6] : memref<32x1xf32, #tpu.memory_space<vmem>>, vector<32x1xf32>
    %c0_7 = arith.constant 0 : index
    %c0_8 = arith.constant 0 : index
    %4 = vector.load %arg3[%c0_7, %c0_8] : memref<32x1xf32, #tpu.memory_space<vmem>>, vector<32x1xf32>
    %c0_9 = arith.constant 0 : index
    %c0_10 = arith.constant 0 : index
    %5 = vector.load %arg4[%c0_9, %c0_10] : memref<32x48xf32, #tpu.memory_space<vmem>>, vector<32x48xf32>
    %c0_11 = arith.constant 0 : index
    %c0_12 = arith.constant 0 : index
    %6 = vector.load %arg5[%c0_11, %c0_12] : memref<32x1xf32, #tpu.memory_space<vmem>>, vector<32x1xf32>
    %c0_13 = arith.constant 0 : index
    %c0_14 = arith.constant 0 : index
    %7 = vector.load %arg6[%c0_13, %c0_14] : memref<32x32xf32, #tpu.memory_space<vmem>>, vector<32x32xf32>
    %c0_15 = arith.constant 0 : index
    %c0_16 = arith.constant 0 : index
    %8 = vector.load %arg7[%c0_15, %c0_16] : memref<32x1xf32, #tpu.memory_space<vmem>>, vector<32x1xf32>
    %c0_17 = arith.constant 0 : index
    %c0_18 = arith.constant 0 : index
    %9 = vector.load %arg50[%c0_17, %c0_18] : memref<32x16xf32, #tpu.memory_space<vmem>>, vector<32x16xf32>
    %10 = vector.broadcast %3 : vector<32x1xf32> to vector<32x16xf32>
    %11 = arith.addf %9, %10 : vector<32x16xf32>
    %12 = vector.broadcast %4 : vector<32x1xf32> to vector<32x16xf32>
    %13 = arith.mulf %12, %11 : vector<32x16xf32>
    %14 = vector.extract_strided_slice %13 {offsets = [0, 0], sizes = [16, 16], strides = [1, 1]} : vector<32x16xf32> to vector<16x16xf32>
    %15 = vector.extract_strided_slice %13 {offsets = [16, 0], sizes = [16, 16], strides = [1, 1]} : vector<32x16xf32> to vector<16x16xf32>
    %16 = tpu.concatenate %14, %0 in 0 : vector<16x16xf32>, vector<32x16xf32> -> vector<48x16xf32>
    %17 = arith.truncf %16 : vector<48x16xf32> to vector<48x16xbf16>
    %18 = arith.truncf %5 : vector<32x48xf32> to vector<32x48xbf16>
    %cst = arith.constant dense<0.000000e+00> : vector<32x16xf32>
    %19 = tpu.matmul %18, %17, %cst {dimension_numbers = #tpu.dot_dimension_numbers<[1], [0], [0], [1], [0, 0, 1, 1], [], []>} : vector<32x48xbf16>, vector<48x16xbf16>, vector<32x16xf32> -> vector<32x16xf32>
    %20 = vector.broadcast %6 : vector<32x1xf32> to vector<32x16xf32>
    %21 = arith.addf %19, %20 : vector<32x16xf32>
    %cst_19 = arith.constant 0.000000e+00 : f32
    %22 = vector.broadcast %cst_19 : f32 to vector<32x16xf32>
    %23 = arith.maximumf %21, %22 : vector<32x16xf32>
    %24 = arith.truncf %7 : vector<32x32xf32> to vector<32x32xbf16>
    %25 = arith.truncf %23 : vector<32x16xf32> to vector<32x16xbf16>
    %cst_20 = arith.constant dense<0.000000e+00> : vector<32x16xf32>
    %26 = tpu.matmul %24, %25, %cst_20 {dimension_numbers = #tpu.dot_dimension_numbers<[1], [0], [0], [1], [0, 0, 1, 1], [], []>} : vector<32x32xbf16>, vector<32x16xbf16>, vector<32x16xf32> -> vector<32x16xf32>
    %27 = vector.broadcast %8 : vector<32x1xf32> to vector<32x16xf32>
    %28 = arith.addf %26, %27 : vector<32x16xf32>
    %29 = vector.extract_strided_slice %28 {offsets = [0, 0], sizes = [16, 16], strides = [1, 1]} : vector<32x16xf32> to vector<16x16xf32>
    %30 = vector.extract_strided_slice %28 {offsets = [16, 0], sizes = [16, 16], strides = [1, 1]} : vector<32x16xf32> to vector<16x16xf32>
    %cst_21 = arith.constant 2.000000e+00 : f32
    %31 = vector.broadcast %cst_21 : f32 to vector<16x16xf32>
    %32 = arith.addf %29, %31 : vector<16x16xf32>
    %33 = arith.negf %32 : vector<16x16xf32>
    %34 = math.exp %33 : vector<16x16xf32>
    %cst_22 = arith.constant 1.000000e+00 : f32
    %35 = vector.broadcast %cst_22 : f32 to vector<16x16xf32>
    %36 = arith.addf %35, %34 : vector<16x16xf32>
    %37 = arith.divf %35, %36 : vector<16x16xf32>
    %38 = arith.addf %15, %30 : vector<16x16xf32>
    %39 = arith.mulf %38, %37 : vector<16x16xf32>
    %c0_23 = arith.constant 0 : index
    %c0_24 = arith.constant 0 : index
    %40 = vector.load %arg50[%c0_23, %c0_24] : memref<32x16xf32, #tpu.memory_space<vmem>>, vector<16x16xf32>
    tpu.vector_store %arg50[%c0_23, %c0_24], %14 {strides = array<i32>} : memref<32x16xf32, #tpu.memory_space<vmem>>, vector<16x16xf32>,
    %c16 = arith.constant 16 : index
    %c0_25 = arith.constant 0 : index
    %41 = vector.load %arg50[%c16, %c0_25] : memref<32x16xf32, #tpu.memory_space<vmem>>, vector<16x16xf32>
    tpu.vector_store %arg50[%c16, %c0_25], %39 {strides = array<i32>} : memref<32x16xf32, #tpu.memory_space<vmem>>, vector<16x16xf32>,
    %cst_26 = arith.constant 0.000000e+00 : f32
    %42 = vector.broadcast %cst_26 : f32 to vector<16x16xf32>
    %43 = arith.minimumf %32, %42 : vector<16x16xf32>
    %44 = math.absf %32 : vector<16x16xf32>
    %cst_27 = arith.constant 0.000000e+00 : f32
    %45 = vector.broadcast %cst_27 : f32 to vector<16x16xf32>
    %46 = arith.subf %45, %44 : vector<16x16xf32>
    %47 = math.exp %46 : vector<16x16xf32>
    %cst_28 = arith.constant 1.000000e+00 : f32
    %48 = vector.broadcast %cst_28 : f32 to vector<16x16xf32>
    %49 = arith.addf %48, %47 : vector<16x16xf32>
    %50 = math.log %49 : vector<16x16xf32>
    %51 = arith.subf %43, %50 : vector<16x16xf32>
    %52 = math.absf %4 : vector<32x1xf32>
    %53 = math.log %52 : vector<32x1xf32>
    %54 = vector.shape_cast %53 : vector<32x1xf32> to vector<1x32x1xf32>
    %cst_29 = arith.constant dense<0.000000e+00> : vector<1xf32>
    %55 = vector.multi_reduction <add>, %54, %cst_29 [1, 2] : vector<1x32x1xf32> to vector<1xf32>
    %56 = vector.shape_cast %55 : vector<1xf32> to vector<1x1x1xf32>
    %57 = vector.extract %56[0, 0, 0] : f32 from vector<1x1x1xf32>
    %cst_30 = arith.constant 0.000000e+00 : f32
    %58 = arith.addf %cst_30, %57 : f32
    %59 = vector.extract_strided_slice %51 {offsets = [0, 0], sizes = [16, 8], strides = [1, 1]} : vector<16x16xf32> to vector<16x8xf32>
    %60 = vector.shape_cast %59 : vector<16x8xf32> to vector<1x16x8xf32>
    %cst_31 = arith.constant dense<0.000000e+00> : vector<1xf32>
    %61 = vector.multi_reduction <add>, %60, %cst_31 [1, 2] : vector<1x16x8xf32> to vector<1xf32>
    %62 = vector.shape_cast %61 : vector<1xf32> to vector<1x1x1xf32>
    %63 = vector.extract %62[0, 0, 0] : f32 from vector<1x1x1xf32>
    %64 = arith.addf %58, %63 : f32
    %cst_32 = arith.constant 0.000000e+00 : f32
    %65 = arith.addf %cst_32, %57 : f32
    %66 = vector.extract_strided_slice %51 {offsets = [0, 8], sizes = [16, 8], strides = [1, 1]} : vector<16x16xf32> to vector<16x8xf32>
    %67 = vector.shape_cast %66 : vector<16x8xf32> to vector<1x16x8xf32>
    %cst_33 = arith.constant dense<0.000000e+00> : vector<1xf32>
    %68 = vector.multi_reduction <add>, %67, %cst_33 [1, 2] : vector<1x16x8xf32> to vector<1xf32>
    %69 = vector.shape_cast %68 : vector<1xf32> to vector<1x1x1xf32>
    %70 = vector.extract %69[0, 0, 0] : f32 from vector<1x1x1xf32>
    %71 = arith.addf %65, %70 : f32
    %c0_34 = arith.constant 0 : index
    %c0_35 = arith.constant 0 : index
    %72 = vector.load %arg8[%c0_34, %c0_35] : memref<32x1xf32, #tpu.memory_space<vmem>>, vector<32x1xf32>
    %c0_36 = arith.constant 0 : index
    %c0_37 = arith.constant 0 : index
    %73 = vector.load %arg9[%c0_36, %c0_37] : memref<32x1xf32, #tpu.memory_space<vmem>>, vector<32x1xf32>
    %c0_38 = arith.constant 0 : index
    %c0_39 = arith.constant 0 : index
    %74 = vector.load %arg10[%c0_38, %c0_39] : memref<32x48xf32, #tpu.memory_space<vmem>>, vector<32x48xf32>
    %c0_40 = arith.constant 0 : index
    %c0_41 = arith.constant 0 : index
    %75 = vector.load %arg11[%c0_40, %c0_41] : memref<32x1xf32, #tpu.memory_space<vmem>>, vector<32x1xf32>
    %c0_42 = arith.constant 0 : index
    %c0_43 = arith.constant 0 : index
    %76 = vector.load %arg12[%c0_42, %c0_43] : memref<32x32xf32, #tpu.memory_space<vmem>>, vector<32x32xf32>
    %c0_44 = arith.constant 0 : index
    %c0_45 = arith.constant 0 : index
    %77 = vector.load %arg13[%c0_44, %c0_45] : memref<32x1xf32, #tpu.memory_space<vmem>>, vector<32x1xf32>
    %c0_46 = arith.constant 0 : index
    %c0_47 = arith.constant 0 : index
    %78 = vector.load %arg50[%c0_46, %c0_47] : memref<32x16xf32, #tpu.memory_space<vmem>>, vector<32x16xf32>
    %79 = vector.broadcast %72 : vector<32x1xf32> to vector<32x16xf32>
    %80 = arith.addf %78, %79 : vector<32x16xf32>
    %81 = vector.broadcast %73 : vector<32x1xf32> to vector<32x16xf32>
    %82 = arith.mulf %81, %80 : vector<32x16xf32>
    %83 = vector.extract_strided_slice %82 {offsets = [0, 0], sizes = [16, 16], strides = [1, 1]} : vector<32x16xf32> to vector<16x16xf32>
    %84 = vector.extract_strided_slice %82 {offsets = [16, 0], sizes = [16, 16], strides = [1, 1]} : vector<32x16xf32> to vector<16x16xf32>
    %85 = tpu.concatenate %83, %0 in 0 : vector<16x16xf32>, vector<32x16xf32> -> vector<48x16xf32>
    %86 = arith.truncf %85 : vector<48x16xf32> to vector<48x16xbf16>
    %87 = arith.truncf %74 : vector<32x48xf32> to vector<32x48xbf16>
    %cst_48 = arith.constant dense<0.000000e+00> : vector<32x16xf32>
    %88 = tpu.matmul %87, %86, %cst_48 {dimension_numbers = #tpu.dot_dimension_numbers<[1], [0], [0], [1], [0, 0, 1, 1], [], []>} : vector<32x48xbf16>, vector<48x16xbf16>, vector<32x16xf32> -> vector<32x16xf32>
    %89 = vector.broadcast %75 : vector<32x1xf32> to vector<32x16xf32>
    %90 = arith.addf %88, %89 : vector<32x16xf32>
    %cst_49 = arith.constant 0.000000e+00 : f32
    %91 = vector.broadcast %cst_49 : f32 to vector<32x16xf32>
    %92 = arith.maximumf %90, %91 : vector<32x16xf32>
    %93 = arith.truncf %76 : vector<32x32xf32> to vector<32x32xbf16>
    %94 = arith.truncf %92 : vector<32x16xf32> to vector<32x16xbf16>
    %cst_50 = arith.constant dense<0.000000e+00> : vector<32x16xf32>
    %95 = tpu.matmul %93, %94, %cst_50 {dimension_numbers = #tpu.dot_dimension_numbers<[1], [0], [0], [1], [0, 0, 1, 1], [], []>} : vector<32x32xbf16>, vector<32x16xbf16>, vector<32x16xf32> -> vector<32x16xf32>
    %96 = vector.broadcast %77 : vector<32x1xf32> to vector<32x16xf32>
    %97 = arith.addf %95, %96 : vector<32x16xf32>
    %98 = vector.extract_strided_slice %97 {offsets = [0, 0], sizes = [16, 16], strides = [1, 1]} : vector<32x16xf32> to vector<16x16xf32>
    %99 = vector.extract_strided_slice %97 {offsets = [16, 0], sizes = [16, 16], strides = [1, 1]} : vector<32x16xf32> to vector<16x16xf32>
    %cst_51 = arith.constant 2.000000e+00 : f32
    %100 = vector.broadcast %cst_51 : f32 to vector<16x16xf32>
    %101 = arith.addf %98, %100 : vector<16x16xf32>
    %102 = arith.negf %101 : vector<16x16xf32>
    %103 = math.exp %102 : vector<16x16xf32>
    %cst_52 = arith.constant 1.000000e+00 : f32
    %104 = vector.broadcast %cst_52 : f32 to vector<16x16xf32>
    %105 = arith.addf %104, %103 : vector<16x16xf32>
    %106 = arith.divf %104, %105 : vector<16x16xf32>
    %107 = arith.addf %84, %99 : vector<16x16xf32>
    %108 = arith.mulf %107, %106 : vector<16x16xf32>
    %c0_53 = arith.constant 0 : index
    %c0_54 = arith.constant 0 : index
    %109 = vector.load %arg50[%c0_53, %c0_54] : memref<32x16xf32, #tpu.memory_space<vmem>>, vector<16x16xf32>
    tpu.vector_store %arg50[%c0_53, %c0_54], %83 {strides = array<i32>} : memref<32x16xf32, #tpu.memory_space<vmem>>, vector<16x16xf32>,
    %c16_55 = arith.constant 16 : index
    %c0_56 = arith.constant 0 : index
    %110 = vector.load %arg50[%c16_55, %c0_56] : memref<32x16xf32, #tpu.memory_space<vmem>>, vector<16x16xf32>
    tpu.vector_store %arg50[%c16_55, %c0_56], %108 {strides = array<i32>} : memref<32x16xf32, #tpu.memory_space<vmem>>, vector<16x16xf32>,
    %cst_57 = arith.constant 0.000000e+00 : f32
    %111 = vector.broadcast %cst_57 : f32 to vector<16x16xf32>
    %112 = arith.minimumf %101, %111 : vector<16x16xf32>
    %113 = math.absf %101 : vector<16x16xf32>
    %cst_58 = arith.constant 0.000000e+00 : f32
    %114 = vector.broadcast %cst_58 : f32 to vector<16x16xf32>
    %115 = arith.subf %114, %113 : vector<16x16xf32>
    %116 = math.exp %115 : vector<16x16xf32>
    %cst_59 = arith.constant 1.000000e+00 : f32
    %117 = vector.broadcast %cst_59 : f32 to vector<16x16xf32>
    %118 = arith.addf %117, %116 : vector<16x16xf32>
    %119 = math.log %118 : vector<16x16xf32>
    %120 = arith.subf %112, %119 : vector<16x16xf32>
    %121 = math.absf %73 : vector<32x1xf32>
    %122 = math.log %121 : vector<32x1xf32>
    %123 = vector.shape_cast %122 : vector<32x1xf32> to vector<1x32x1xf32>
    %cst_60 = arith.constant dense<0.000000e+00> : vector<1xf32>
    %124 = vector.multi_reduction <add>, %123, %cst_60 [1, 2] : vector<1x32x1xf32> to vector<1xf32>
    %125 = vector.shape_cast %124 : vector<1xf32> to vector<1x1x1xf32>
    %126 = vector.extract %125[0, 0, 0] : f32 from vector<1x1x1xf32>
    %127 = arith.addf %64, %126 : f32
    %128 = vector.extract_strided_slice %120 {offsets = [0, 0], sizes = [16, 8], strides = [1, 1]} : vector<16x16xf32> to vector<16x8xf32>
    %129 = vector.shape_cast %128 : vector<16x8xf32> to vector<1x16x8xf32>
    %cst_61 = arith.constant dense<0.000000e+00> : vector<1xf32>
    %130 = vector.multi_reduction <add>, %129, %cst_61 [1, 2] : vector<1x16x8xf32> to vector<1xf32>
    %131 = vector.shape_cast %130 : vector<1xf32> to vector<1x1x1xf32>
    %132 = vector.extract %131[0, 0, 0] : f32 from vector<1x1x1xf32>
    %133 = arith.addf %127, %132 : f32
    %134 = arith.addf %71, %126 : f32
    %135 = vector.extract_strided_slice %120 {offsets = [0, 8], sizes = [16, 8], strides = [1, 1]} : vector<16x16xf32> to vector<16x8xf32>
    %136 = vector.shape_cast %135 : vector<16x8xf32> to vector<1x16x8xf32>
    %cst_62 = arith.constant dense<0.000000e+00> : vector<1xf32>
    %137 = vector.multi_reduction <add>, %136, %cst_62 [1, 2] : vector<1x16x8xf32> to vector<1xf32>
    %138 = vector.shape_cast %137 : vector<1xf32> to vector<1x1x1xf32>
    %139 = vector.extract %138[0, 0, 0] : f32 from vector<1x1x1xf32>
    %140 = arith.addf %134, %139 : f32
    %c0_63 = arith.constant 0 : index
    %c0_64 = arith.constant 0 : index
    %141 = vector.load %arg14[%c0_63, %c0_64] : memref<24x1xf32, #tpu.memory_space<vmem>>, vector<24x1xf32>
    %c0_65 = arith.constant 0 : index
    %c0_66 = arith.constant 0 : index
    %142 = vector.load %arg15[%c0_65, %c0_66] : memref<24x1xf32, #tpu.memory_space<vmem>>, vector<24x1xf32>
    %c0_67 = arith.constant 0 : index
    %c0_68 = arith.constant 0 : index
    %143 = vector.load %arg16[%c0_67, %c0_68] : memref<32x44xf32, #tpu.memory_space<vmem>>, vector<32x44xf32>
    %c0_69 = arith.constant 0 : index
    %c0_70 = arith.constant 0 : index
    %144 = vector.load %arg17[%c0_69, %c0_70] : memref<32x1xf32, #tpu.memory_space<vmem>>, vector<32x1xf32>
    %c0_71 = arith.constant 0 : index
    %c0_72 = arith.constant 0 : index
    %145 = vector.load %arg18[%c0_71, %c0_72] : memref<24x32xf32, #tpu.memory_space<vmem>>, vector<24x32xf32>
    %c0_73 = arith.constant 0 : index
    %c0_74 = arith.constant 0 : index
    %146 = vector.load %arg19[%c0_73, %c0_74] : memref<24x1xf32, #tpu.memory_space<vmem>>, vector<24x1xf32>
    %c8 = arith.constant 8 : index
    %c0_75 = arith.constant 0 : index
    %147 = vector.load %arg50[%c8, %c0_75] : memref<32x16xf32, #tpu.memory_space<vmem>>, vector<24x16xf32>
    %148 = vector.broadcast %141 : vector<24x1xf32> to vector<24x16xf32>
    %149 = arith.addf %147, %148 : vector<24x16xf32>
    %150 = vector.broadcast %142 : vector<24x1xf32> to vector<24x16xf32>
    %151 = arith.mulf %150, %149 : vector<24x16xf32>
    %152 = vector.extract_strided_slice %151 {offsets = [0, 0], sizes = [12, 16], strides = [1, 1]} : vector<24x16xf32> to vector<12x16xf32>
    %153 = vector.extract_strided_slice %151 {offsets = [12, 0], sizes = [12, 16], strides = [1, 1]} : vector<24x16xf32> to vector<12x16xf32>
    %154 = tpu.concatenate %152, %0 in 0 : vector<12x16xf32>, vector<32x16xf32> -> vector<44x16xf32>
    %155 = arith.truncf %154 : vector<44x16xf32> to vector<44x16xbf16>
    %156 = arith.truncf %143 : vector<32x44xf32> to vector<32x44xbf16>
    %cst_76 = arith.constant dense<0.000000e+00> : vector<32x16xf32>
    %157 = tpu.matmul %156, %155, %cst_76 {dimension_numbers = #tpu.dot_dimension_numbers<[1], [0], [0], [1], [0, 0, 1, 1], [], []>} : vector<32x44xbf16>, vector<44x16xbf16>, vector<32x16xf32> -> vector<32x16xf32>
    %158 = vector.broadcast %144 : vector<32x1xf32> to vector<32x16xf32>
    %159 = arith.addf %157, %158 : vector<32x16xf32>
    %cst_77 = arith.constant 0.000000e+00 : f32
    %160 = vector.broadcast %cst_77 : f32 to vector<32x16xf32>
    %161 = arith.maximumf %159, %160 : vector<32x16xf32>
    %162 = arith.truncf %145 : vector<24x32xf32> to vector<24x32xbf16>
    %163 = arith.truncf %161 : vector<32x16xf32> to vector<32x16xbf16>
    %cst_78 = arith.constant dense<0.000000e+00> : vector<24x16xf32>
    %164 = tpu.matmul %162, %163, %cst_78 {dimension_numbers = #tpu.dot_dimension_numbers<[1], [0], [0], [1], [0, 0, 1, 1], [], []>} : vector<24x32xbf16>, vector<32x16xbf16>, vector<24x16xf32> -> vector<24x16xf32>
    %165 = vector.broadcast %146 : vector<24x1xf32> to vector<24x16xf32>
    %166 = arith.addf %164, %165 : vector<24x16xf32>
    %167 = vector.extract_strided_slice %166 {offsets = [0, 0], sizes = [12, 16], strides = [1, 1]} : vector<24x16xf32> to vector<12x16xf32>
    %168 = vector.extract_strided_slice %166 {offsets = [12, 0], sizes = [12, 16], strides = [1, 1]} : vector<24x16xf32> to vector<12x16xf32>
    %cst_79 = arith.constant 2.000000e+00 : f32
    %169 = vector.broadcast %cst_79 : f32 to vector<12x16xf32>
    %170 = arith.addf %167, %169 : vector<12x16xf32>
    %171 = arith.negf %170 : vector<12x16xf32>
    %172 = math.exp %171 : vector<12x16xf32>
    %cst_80 = arith.constant 1.000000e+00 : f32
    %173 = vector.broadcast %cst_80 : f32 to vector<12x16xf32>
    %174 = arith.addf %173, %172 : vector<12x16xf32>
    %175 = arith.divf %173, %174 : vector<12x16xf32>
    %176 = arith.addf %153, %168 : vector<12x16xf32>
    %177 = arith.mulf %176, %175 : vector<12x16xf32>
    %c8_81 = arith.constant 8 : index
    %c0_82 = arith.constant 0 : index
    %178 = vector.load %arg50[%c8_81, %c0_82] : memref<32x16xf32, #tpu.memory_space<vmem>>, vector<12x16xf32>
    tpu.vector_store %arg50[%c8_81, %c0_82], %152 {strides = array<i32>} : memref<32x16xf32, #tpu.memory_space<vmem>>, vector<12x16xf32>,
    %c20 = arith.constant 20 : index
    %c0_83 = arith.constant 0 : index
    %179 = vector.load %arg50[%c20, %c0_83] : memref<32x16xf32, #tpu.memory_space<vmem>>, vector<12x16xf32>
    tpu.vector_store %arg50[%c20, %c0_83], %177 {strides = array<i32>} : memref<32x16xf32, #tpu.memory_space<vmem>>, vector<12x16xf32>,
    %cst_84 = arith.constant 0.000000e+00 : f32
    %180 = vector.broadcast %cst_84 : f32 to vector<12x16xf32>
    %181 = arith.minimumf %170, %180 : vector<12x16xf32>
    %182 = math.absf %170 : vector<12x16xf32>
    %cst_85 = arith.constant 0.000000e+00 : f32
    %183 = vector.broadcast %cst_85 : f32 to vector<12x16xf32>
    %184 = arith.subf %183, %182 : vector<12x16xf32>
    %185 = math.exp %184 : vector<12x16xf32>
    %cst_86 = arith.constant 1.000000e+00 : f32
    %186 = vector.broadcast %cst_86 : f32 to vector<12x16xf32>
    %187 = arith.addf %186, %185 : vector<12x16xf32>
    %188 = math.log %187 : vector<12x16xf32>
    %189 = arith.subf %181, %188 : vector<12x16xf32>
    %190 = math.absf %142 : vector<24x1xf32>
    %191 = math.log %190 : vector<24x1xf32>
    %192 = vector.shape_cast %191 : vector<24x1xf32> to vector<1x24x1xf32>
    %cst_87 = arith.constant dense<0.000000e+00> : vector<1xf32>
    %193 = vector.multi_reduction <add>, %192, %cst_87 [1, 2] : vector<1x24x1xf32> to vector<1xf32>
    %194 = vector.shape_cast %193 : vector<1xf32> to vector<1x1x1xf32>
    %195 = vector.extract %194[0, 0, 0] : f32 from vector<1x1x1xf32>
    %196 = arith.addf %133, %195 : f32
    %197 = vector.extract_strided_slice %189 {offsets = [0, 0], sizes = [12, 8], strides = [1, 1]} : vector<12x16xf32> to vector<12x8xf32>
    %198 = vector.shape_cast %197 : vector<12x8xf32> to vector<1x12x8xf32>
    %cst_88 = arith.constant dense<0.000000e+00> : vector<1xf32>
    %199 = vector.multi_reduction <add>, %198, %cst_88 [1, 2] : vector<1x12x8xf32> to vector<1xf32>
    %200 = vector.shape_cast %199 : vector<1xf32> to vector<1x1x1xf32>
    %201 = vector.extract %200[0, 0, 0] : f32 from vector<1x1x1xf32>
    %202 = arith.addf %196, %201 : f32
    %203 = arith.addf %140, %195 : f32
    %204 = vector.extract_strided_slice %189 {offsets = [0, 8], sizes = [12, 8], strides = [1, 1]} : vector<12x16xf32> to vector<12x8xf32>
    %205 = vector.shape_cast %204 : vector<12x8xf32> to vector<1x12x8xf32>
    %cst_89 = arith.constant dense<0.000000e+00> : vector<1xf32>
    %206 = vector.multi_reduction <add>, %205, %cst_89 [1, 2] : vector<1x12x8xf32> to vector<1xf32>
    %207 = vector.shape_cast %206 : vector<1xf32> to vector<1x1x1xf32>
    %208 = vector.extract %207[0, 0, 0] : f32 from vector<1x1x1xf32>
    %209 = arith.addf %203, %208 : f32
    %c0_90 = arith.constant 0 : index
    %c0_91 = arith.constant 0 : index
    %210 = vector.load %arg20[%c0_90, %c0_91] : memref<24x1xf32, #tpu.memory_space<vmem>>, vector<24x1xf32>
    %c0_92 = arith.constant 0 : index
    %c0_93 = arith.constant 0 : index
    %211 = vector.load %arg21[%c0_92, %c0_93] : memref<24x1xf32, #tpu.memory_space<vmem>>, vector<24x1xf32>
    %c0_94 = arith.constant 0 : index
    %c0_95 = arith.constant 0 : index
    %212 = vector.load %arg22[%c0_94, %c0_95] : memref<32x44xf32, #tpu.memory_space<vmem>>, vector<32x44xf32>
    %c0_96 = arith.constant 0 : index
    %c0_97 = arith.constant 0 : index
    %213 = vector.load %arg23[%c0_96, %c0_97] : memref<32x1xf32, #tpu.memory_space<vmem>>, vector<32x1xf32>
    %c0_98 = arith.constant 0 : index
    %c0_99 = arith.constant 0 : index
    %214 = vector.load %arg24[%c0_98, %c0_99] : memref<24x32xf32, #tpu.memory_space<vmem>>, vector<24x32xf32>
    %c0_100 = arith.constant 0 : index
    %c0_101 = arith.constant 0 : index
    %215 = vector.load %arg25[%c0_100, %c0_101] : memref<24x1xf32, #tpu.memory_space<vmem>>, vector<24x1xf32>
    %c8_102 = arith.constant 8 : index
    %c0_103 = arith.constant 0 : index
    %216 = vector.load %arg50[%c8_102, %c0_103] : memref<32x16xf32, #tpu.memory_space<vmem>>, vector<24x16xf32>
    %217 = vector.broadcast %210 : vector<24x1xf32> to vector<24x16xf32>
    %218 = arith.addf %216, %217 : vector<24x16xf32>
    %219 = vector.broadcast %211 : vector<24x1xf32> to vector<24x16xf32>
    %220 = arith.mulf %219, %218 : vector<24x16xf32>
    %221 = vector.extract_strided_slice %220 {offsets = [0, 0], sizes = [12, 16], strides = [1, 1]} : vector<24x16xf32> to vector<12x16xf32>
    %222 = vector.extract_strided_slice %220 {offsets = [12, 0], sizes = [12, 16], strides = [1, 1]} : vector<24x16xf32> to vector<12x16xf32>
    %223 = tpu.concatenate %221, %0 in 0 : vector<12x16xf32>, vector<32x16xf32> -> vector<44x16xf32>
    %224 = arith.truncf %223 : vector<44x16xf32> to vector<44x16xbf16>
    %225 = arith.truncf %212 : vector<32x44xf32> to vector<32x44xbf16>
    %cst_104 = arith.constant dense<0.000000e+00> : vector<32x16xf32>
    %226 = tpu.matmul %225, %224, %cst_104 {dimension_numbers = #tpu.dot_dimension_numbers<[1], [0], [0], [1], [0, 0, 1, 1], [], []>} : vector<32x44xbf16>, vector<44x16xbf16>, vector<32x16xf32> -> vector<32x16xf32>
    %227 = vector.broadcast %213 : vector<32x1xf32> to vector<32x16xf32>
    %228 = arith.addf %226, %227 : vector<32x16xf32>
    %cst_105 = arith.constant 0.000000e+00 : f32
    %229 = vector.broadcast %cst_105 : f32 to vector<32x16xf32>
    %230 = arith.maximumf %228, %229 : vector<32x16xf32>
    %231 = arith.truncf %214 : vector<24x32xf32> to vector<24x32xbf16>
    %232 = arith.truncf %230 : vector<32x16xf32> to vector<32x16xbf16>
    %cst_106 = arith.constant dense<0.000000e+00> : vector<24x16xf32>
    %233 = tpu.matmul %231, %232, %cst_106 {dimension_numbers = #tpu.dot_dimension_numbers<[1], [0], [0], [1], [0, 0, 1, 1], [], []>} : vector<24x32xbf16>, vector<32x16xbf16>, vector<24x16xf32> -> vector<24x16xf32>
    %234 = vector.broadcast %215 : vector<24x1xf32> to vector<24x16xf32>
    %235 = arith.addf %233, %234 : vector<24x16xf32>
    %236 = vector.extract_strided_slice %235 {offsets = [0, 0], sizes = [12, 16], strides = [1, 1]} : vector<24x16xf32> to vector<12x16xf32>
    %237 = vector.extract_strided_slice %235 {offsets = [12, 0], sizes = [12, 16], strides = [1, 1]} : vector<24x16xf32> to vector<12x16xf32>
    %cst_107 = arith.constant 2.000000e+00 : f32
    %238 = vector.broadcast %cst_107 : f32 to vector<12x16xf32>
    %239 = arith.addf %236, %238 : vector<12x16xf32>
    %240 = arith.negf %239 : vector<12x16xf32>
    %241 = math.exp %240 : vector<12x16xf32>
    %cst_108 = arith.constant 1.000000e+00 : f32
    %242 = vector.broadcast %cst_108 : f32 to vector<12x16xf32>
    %243 = arith.addf %242, %241 : vector<12x16xf32>
    %244 = arith.divf %242, %243 : vector<12x16xf32>
    %245 = arith.addf %222, %237 : vector<12x16xf32>
    %246 = arith.mulf %245, %244 : vector<12x16xf32>
    %c8_109 = arith.constant 8 : index
    %c0_110 = arith.constant 0 : index
    %247 = vector.load %arg50[%c8_109, %c0_110] : memref<32x16xf32, #tpu.memory_space<vmem>>, vector<12x16xf32>
    tpu.vector_store %arg50[%c8_109, %c0_110], %221 {strides = array<i32>} : memref<32x16xf32, #tpu.memory_space<vmem>>, vector<12x16xf32>,
    %c20_111 = arith.constant 20 : index
    %c0_112 = arith.constant 0 : index
    %248 = vector.load %arg50[%c20_111, %c0_112] : memref<32x16xf32, #tpu.memory_space<vmem>>, vector<12x16xf32>
    tpu.vector_store %arg50[%c20_111, %c0_112], %246 {strides = array<i32>} : memref<32x16xf32, #tpu.memory_space<vmem>>, vector<12x16xf32>,
    %cst_113 = arith.constant 0.000000e+00 : f32
    %249 = vector.broadcast %cst_113 : f32 to vector<12x16xf32>
    %250 = arith.minimumf %239, %249 : vector<12x16xf32>
    %251 = math.absf %239 : vector<12x16xf32>
    %cst_114 = arith.constant 0.000000e+00 : f32
    %252 = vector.broadcast %cst_114 : f32 to vector<12x16xf32>
    %253 = arith.subf %252, %251 : vector<12x16xf32>
    %254 = math.exp %253 : vector<12x16xf32>
    %cst_115 = arith.constant 1.000000e+00 : f32
    %255 = vector.broadcast %cst_115 : f32 to vector<12x16xf32>
    %256 = arith.addf %255, %254 : vector<12x16xf32>
    %257 = math.log %256 : vector<12x16xf32>
    %258 = arith.subf %250, %257 : vector<12x16xf32>
    %259 = math.absf %211 : vector<24x1xf32>
    %260 = math.log %259 : vector<24x1xf32>
    %261 = vector.shape_cast %260 : vector<24x1xf32> to vector<1x24x1xf32>
    %cst_116 = arith.constant dense<0.000000e+00> : vector<1xf32>
    %262 = vector.multi_reduction <add>, %261, %cst_116 [1, 2] : vector<1x24x1xf32> to vector<1xf32>
    %263 = vector.shape_cast %262 : vector<1xf32> to vector<1x1x1xf32>
    %264 = vector.extract %263[0, 0, 0] : f32 from vector<1x1x1xf32>
    %265 = arith.addf %202, %264 : f32
    %266 = vector.extract_strided_slice %258 {offsets = [0, 0], sizes = [12, 8], strides = [1, 1]} : vector<12x16xf32> to vector<12x8xf32>
    %267 = vector.shape_cast %266 : vector<12x8xf32> to vector<1x12x8xf32>
    %cst_117 = arith.constant dense<0.000000e+00> : vector<1xf32>
    %268 = vector.multi_reduction <add>, %267, %cst_117 [1, 2] : vector<1x12x8xf32> to vector<1xf32>
    %269 = vector.shape_cast %268 : vector<1xf32> to vector<1x1x1xf32>
    %270 = vector.extract %269[0, 0, 0] : f32 from vector<1x1x1xf32>
    %271 = arith.addf %265, %270 : f32
    %272 = arith.addf %209, %264 : f32
    %273 = vector.extract_strided_slice %258 {offsets = [0, 8], sizes = [12, 8], strides = [1, 1]} : vector<12x16xf32> to vector<12x8xf32>
    %274 = vector.shape_cast %273 : vector<12x8xf32> to vector<1x12x8xf32>
    %cst_118 = arith.constant dense<0.000000e+00> : vector<1xf32>
    %275 = vector.multi_reduction <add>, %274, %cst_118 [1, 2] : vector<1x12x8xf32> to vector<1xf32>
    %276 = vector.shape_cast %275 : vector<1xf32> to vector<1x1x1xf32>
    %277 = vector.extract %276[0, 0, 0] : f32 from vector<1x1x1xf32>
    %278 = arith.addf %272, %277 : f32
    %c0_119 = arith.constant 0 : index
    %c0_120 = arith.constant 0 : index
    %279 = vector.load %arg26[%c0_119, %c0_120] : memref<16x1xf32, #tpu.memory_space<vmem>>, vector<16x1xf32>
    %c0_121 = arith.constant 0 : index
    %c0_122 = arith.constant 0 : index
    %280 = vector.load %arg27[%c0_121, %c0_122] : memref<16x1xf32, #tpu.memory_space<vmem>>, vector<16x1xf32>
    %c0_123 = arith.constant 0 : index
    %c0_124 = arith.constant 0 : index
    %281 = vector.load %arg28[%c0_123, %c0_124] : memref<32x40xf32, #tpu.memory_space<vmem>>, vector<32x40xf32>
    %c0_125 = arith.constant 0 : index
    %c0_126 = arith.constant 0 : index
    %282 = vector.load %arg29[%c0_125, %c0_126] : memref<32x1xf32, #tpu.memory_space<vmem>>, vector<32x1xf32>
    %c0_127 = arith.constant 0 : index
    %c0_128 = arith.constant 0 : index
    %283 = vector.load %arg30[%c0_127, %c0_128] : memref<16x32xf32, #tpu.memory_space<vmem>>, vector<16x32xf32>
    %c0_129 = arith.constant 0 : index
    %c0_130 = arith.constant 0 : index
    %284 = vector.load %arg31[%c0_129, %c0_130] : memref<16x1xf32, #tpu.memory_space<vmem>>, vector<16x1xf32>
    %c16_131 = arith.constant 16 : index
    %c0_132 = arith.constant 0 : index
    %285 = vector.load %arg50[%c16_131, %c0_132] : memref<32x16xf32, #tpu.memory_space<vmem>>, vector<16x16xf32>
    %286 = vector.broadcast %279 : vector<16x1xf32> to vector<16x16xf32>
    %287 = arith.addf %285, %286 : vector<16x16xf32>
    %288 = vector.broadcast %280 : vector<16x1xf32> to vector<16x16xf32>
    %289 = arith.mulf %288, %287 : vector<16x16xf32>
    %290 = vector.extract_strided_slice %289 {offsets = [0, 0], sizes = [8, 16], strides = [1, 1]} : vector<16x16xf32> to vector<8x16xf32>
    %291 = vector.extract_strided_slice %289 {offsets = [8, 0], sizes = [8, 16], strides = [1, 1]} : vector<16x16xf32> to vector<8x16xf32>
    %292 = tpu.concatenate %290, %0 in 0 : vector<8x16xf32>, vector<32x16xf32> -> vector<40x16xf32>
    %293 = arith.truncf %292 : vector<40x16xf32> to vector<40x16xbf16>
    %294 = arith.truncf %281 : vector<32x40xf32> to vector<32x40xbf16>
    %cst_133 = arith.constant dense<0.000000e+00> : vector<32x16xf32>
    %295 = tpu.matmul %294, %293, %cst_133 {dimension_numbers = #tpu.dot_dimension_numbers<[1], [0], [0], [1], [0, 0, 1, 1], [], []>} : vector<32x40xbf16>, vector<40x16xbf16>, vector<32x16xf32> -> vector<32x16xf32>
    %296 = vector.broadcast %282 : vector<32x1xf32> to vector<32x16xf32>
    %297 = arith.addf %295, %296 : vector<32x16xf32>
    %cst_134 = arith.constant 0.000000e+00 : f32
    %298 = vector.broadcast %cst_134 : f32 to vector<32x16xf32>
    %299 = arith.maximumf %297, %298 : vector<32x16xf32>
    %300 = arith.truncf %283 : vector<16x32xf32> to vector<16x32xbf16>
    %301 = arith.truncf %299 : vector<32x16xf32> to vector<32x16xbf16>
    %cst_135 = arith.constant dense<0.000000e+00> : vector<16x16xf32>
    %302 = tpu.matmul %300, %301, %cst_135 {dimension_numbers = #tpu.dot_dimension_numbers<[1], [0], [0], [1], [0, 0, 1, 1], [], []>} : vector<16x32xbf16>, vector<32x16xbf16>, vector<16x16xf32> -> vector<16x16xf32>
    %303 = vector.broadcast %284 : vector<16x1xf32> to vector<16x16xf32>
    %304 = arith.addf %302, %303 : vector<16x16xf32>
    %305 = vector.extract_strided_slice %304 {offsets = [0, 0], sizes = [8, 16], strides = [1, 1]} : vector<16x16xf32> to vector<8x16xf32>
    %306 = vector.extract_strided_slice %304 {offsets = [8, 0], sizes = [8, 16], strides = [1, 1]} : vector<16x16xf32> to vector<8x16xf32>
    %cst_136 = arith.constant 2.000000e+00 : f32
    %307 = vector.broadcast %cst_136 : f32 to vector<8x16xf32>
    %308 = arith.addf %305, %307 : vector<8x16xf32>
    %309 = arith.negf %308 : vector<8x16xf32>
    %310 = math.exp %309 : vector<8x16xf32>
    %cst_137 = arith.constant 1.000000e+00 : f32
    %311 = vector.broadcast %cst_137 : f32 to vector<8x16xf32>
    %312 = arith.addf %311, %310 : vector<8x16xf32>
    %313 = arith.divf %311, %312 : vector<8x16xf32>
    %314 = arith.addf %291, %306 : vector<8x16xf32>
    %315 = arith.mulf %314, %313 : vector<8x16xf32>
    %c16_138 = arith.constant 16 : index
    %c0_139 = arith.constant 0 : index
    %316 = vector.load %arg50[%c16_138, %c0_139] : memref<32x16xf32, #tpu.memory_space<vmem>>, vector<8x16xf32>
    tpu.vector_store %arg50[%c16_138, %c0_139], %290 {strides = array<i32>} : memref<32x16xf32, #tpu.memory_space<vmem>>, vector<8x16xf32>,
    %c24 = arith.constant 24 : index
    %c0_140 = arith.constant 0 : index
    %317 = vector.load %arg50[%c24, %c0_140] : memref<32x16xf32, #tpu.memory_space<vmem>>, vector<8x16xf32>
    tpu.vector_store %arg50[%c24, %c0_140], %315 {strides = array<i32>} : memref<32x16xf32, #tpu.memory_space<vmem>>, vector<8x16xf32>,
    %cst_141 = arith.constant 0.000000e+00 : f32
    %318 = vector.broadcast %cst_141 : f32 to vector<8x16xf32>
    %319 = arith.minimumf %308, %318 : vector<8x16xf32>
    %320 = math.absf %308 : vector<8x16xf32>
    %cst_142 = arith.constant 0.000000e+00 : f32
    %321 = vector.broadcast %cst_142 : f32 to vector<8x16xf32>
    %322 = arith.subf %321, %320 : vector<8x16xf32>
    %323 = math.exp %322 : vector<8x16xf32>
    %cst_143 = arith.constant 1.000000e+00 : f32
    %324 = vector.broadcast %cst_143 : f32 to vector<8x16xf32>
    %325 = arith.addf %324, %323 : vector<8x16xf32>
    %326 = math.log %325 : vector<8x16xf32>
    %327 = arith.subf %319, %326 : vector<8x16xf32>
    %328 = math.absf %280 : vector<16x1xf32>
    %329 = math.log %328 : vector<16x1xf32>
    %330 = vector.shape_cast %329 : vector<16x1xf32> to vector<1x16x1xf32>
    %cst_144 = arith.constant dense<0.000000e+00> : vector<1xf32>
    %331 = vector.multi_reduction <add>, %330, %cst_144 [1, 2] : vector<1x16x1xf32> to vector<1xf32>
    %332 = vector.shape_cast %331 : vector<1xf32> to vector<1x1x1xf32>
    %333 = vector.extract %332[0, 0, 0] : f32 from vector<1x1x1xf32>
    %334 = arith.addf %271, %333 : f32
    %335 = vector.extract_strided_slice %327 {offsets = [0, 0], sizes = [8, 8], strides = [1, 1]} : vector<8x16xf32> to vector<8x8xf32>
    %336 = vector.shape_cast %335 : vector<8x8xf32> to vector<1x8x8xf32>
    %cst_145 = arith.constant dense<0.000000e+00> : vector<1xf32>
    %337 = vector.multi_reduction <add>, %336, %cst_145 [1, 2] : vector<1x8x8xf32> to vector<1xf32>
    %338 = vector.shape_cast %337 : vector<1xf32> to vector<1x1x1xf32>
    %339 = vector.extract %338[0, 0, 0] : f32 from vector<1x1x1xf32>
    %340 = arith.addf %334, %339 : f32
    %341 = arith.addf %278, %333 : f32
    %342 = vector.extract_strided_slice %327 {offsets = [0, 8], sizes = [8, 8], strides = [1, 1]} : vector<8x16xf32> to vector<8x8xf32>
    %343 = vector.shape_cast %342 : vector<8x8xf32> to vector<1x8x8xf32>
    %cst_146 = arith.constant dense<0.000000e+00> : vector<1xf32>
    %344 = vector.multi_reduction <add>, %343, %cst_146 [1, 2] : vector<1x8x8xf32> to vector<1xf32>
    %345 = vector.shape_cast %344 : vector<1xf32> to vector<1x1x1xf32>
    %346 = vector.extract %345[0, 0, 0] : f32 from vector<1x1x1xf32>
    %347 = arith.addf %341, %346 : f32
    %c0_147 = arith.constant 0 : index
    %c0_148 = arith.constant 0 : index
    %348 = vector.load %arg32[%c0_147, %c0_148] : memref<16x1xf32, #tpu.memory_space<vmem>>, vector<16x1xf32>
    %c0_149 = arith.constant 0 : index
    %c0_150 = arith.constant 0 : index
    %349 = vector.load %arg33[%c0_149, %c0_150] : memref<16x1xf32, #tpu.memory_space<vmem>>, vector<16x1xf32>
    %c0_151 = arith.constant 0 : index
    %c0_152 = arith.constant 0 : index
    %350 = vector.load %arg34[%c0_151, %c0_152] : memref<32x40xf32, #tpu.memory_space<vmem>>, vector<32x40xf32>
    %c0_153 = arith.constant 0 : index
    %c0_154 = arith.constant 0 : index
    %351 = vector.load %arg35[%c0_153, %c0_154] : memref<32x1xf32, #tpu.memory_space<vmem>>, vector<32x1xf32>
    %c0_155 = arith.constant 0 : index
    %c0_156 = arith.constant 0 : index
    %352 = vector.load %arg36[%c0_155, %c0_156] : memref<16x32xf32, #tpu.memory_space<vmem>>, vector<16x32xf32>
    %c0_157 = arith.constant 0 : index
    %c0_158 = arith.constant 0 : index
    %353 = vector.load %arg37[%c0_157, %c0_158] : memref<16x1xf32, #tpu.memory_space<vmem>>, vector<16x1xf32>
    %c16_159 = arith.constant 16 : index
    %c0_160 = arith.constant 0 : index
    %354 = vector.load %arg50[%c16_159, %c0_160] : memref<32x16xf32, #tpu.memory_space<vmem>>, vector<16x16xf32>
    %355 = vector.broadcast %348 : vector<16x1xf32> to vector<16x16xf32>
    %356 = arith.addf %354, %355 : vector<16x16xf32>
    %357 = vector.broadcast %349 : vector<16x1xf32> to vector<16x16xf32>
    %358 = arith.mulf %357, %356 : vector<16x16xf32>
    %359 = vector.extract_strided_slice %358 {offsets = [0, 0], sizes = [8, 16], strides = [1, 1]} : vector<16x16xf32> to vector<8x16xf32>
    %360 = vector.extract_strided_slice %358 {offsets = [8, 0], sizes = [8, 16], strides = [1, 1]} : vector<16x16xf32> to vector<8x16xf32>
    %361 = tpu.concatenate %359, %0 in 0 : vector<8x16xf32>, vector<32x16xf32> -> vector<40x16xf32>
    %362 = arith.truncf %361 : vector<40x16xf32> to vector<40x16xbf16>
    %363 = arith.truncf %350 : vector<32x40xf32> to vector<32x40xbf16>
    %cst_161 = arith.constant dense<0.000000e+00> : vector<32x16xf32>
    %364 = tpu.matmul %363, %362, %cst_161 {dimension_numbers = #tpu.dot_dimension_numbers<[1], [0], [0], [1], [0, 0, 1, 1], [], []>} : vector<32x40xbf16>, vector<40x16xbf16>, vector<32x16xf32> -> vector<32x16xf32>
    %365 = vector.broadcast %351 : vector<32x1xf32> to vector<32x16xf32>
    %366 = arith.addf %364, %365 : vector<32x16xf32>
    %cst_162 = arith.constant 0.000000e+00 : f32
    %367 = vector.broadcast %cst_162 : f32 to vector<32x16xf32>
    %368 = arith.maximumf %366, %367 : vector<32x16xf32>
    %369 = arith.truncf %352 : vector<16x32xf32> to vector<16x32xbf16>
    %370 = arith.truncf %368 : vector<32x16xf32> to vector<32x16xbf16>
    %cst_163 = arith.constant dense<0.000000e+00> : vector<16x16xf32>
    %371 = tpu.matmul %369, %370, %cst_163 {dimension_numbers = #tpu.dot_dimension_numbers<[1], [0], [0], [1], [0, 0, 1, 1], [], []>} : vector<16x32xbf16>, vector<32x16xbf16>, vector<16x16xf32> -> vector<16x16xf32>
    %372 = vector.broadcast %353 : vector<16x1xf32> to vector<16x16xf32>
    %373 = arith.addf %371, %372 : vector<16x16xf32>
    %374 = vector.extract_strided_slice %373 {offsets = [0, 0], sizes = [8, 16], strides = [1, 1]} : vector<16x16xf32> to vector<8x16xf32>
    %375 = vector.extract_strided_slice %373 {offsets = [8, 0], sizes = [8, 16], strides = [1, 1]} : vector<16x16xf32> to vector<8x16xf32>
    %cst_164 = arith.constant 2.000000e+00 : f32
    %376 = vector.broadcast %cst_164 : f32 to vector<8x16xf32>
    %377 = arith.addf %374, %376 : vector<8x16xf32>
    %378 = arith.negf %377 : vector<8x16xf32>
    %379 = math.exp %378 : vector<8x16xf32>
    %cst_165 = arith.constant 1.000000e+00 : f32
    %380 = vector.broadcast %cst_165 : f32 to vector<8x16xf32>
    %381 = arith.addf %380, %379 : vector<8x16xf32>
    %382 = arith.divf %380, %381 : vector<8x16xf32>
    %383 = arith.addf %360, %375 : vector<8x16xf32>
    %384 = arith.mulf %383, %382 : vector<8x16xf32>
    %c16_166 = arith.constant 16 : index
    %c0_167 = arith.constant 0 : index
    %385 = vector.load %arg50[%c16_166, %c0_167] : memref<32x16xf32, #tpu.memory_space<vmem>>, vector<8x16xf32>
    tpu.vector_store %arg50[%c16_166, %c0_167], %359 {strides = array<i32>} : memref<32x16xf32, #tpu.memory_space<vmem>>, vector<8x16xf32>,
    %c24_168 = arith.constant 24 : index
    %c0_169 = arith.constant 0 : index
    %386 = vector.load %arg50[%c24_168, %c0_169] : memref<32x16xf32, #tpu.memory_space<vmem>>, vector<8x16xf32>
    tpu.vector_store %arg50[%c24_168, %c0_169], %384 {strides = array<i32>} : memref<32x16xf32, #tpu.memory_space<vmem>>, vector<8x16xf32>,
    %cst_170 = arith.constant 0.000000e+00 : f32
    %387 = vector.broadcast %cst_170 : f32 to vector<8x16xf32>
    %388 = arith.minimumf %377, %387 : vector<8x16xf32>
    %389 = math.absf %377 : vector<8x16xf32>
    %cst_171 = arith.constant 0.000000e+00 : f32
    %390 = vector.broadcast %cst_171 : f32 to vector<8x16xf32>
    %391 = arith.subf %390, %389 : vector<8x16xf32>
    %392 = math.exp %391 : vector<8x16xf32>
    %cst_172 = arith.constant 1.000000e+00 : f32
    %393 = vector.broadcast %cst_172 : f32 to vector<8x16xf32>
    %394 = arith.addf %393, %392 : vector<8x16xf32>
    %395 = math.log %394 : vector<8x16xf32>
    %396 = arith.subf %388, %395 : vector<8x16xf32>
    %397 = math.absf %349 : vector<16x1xf32>
    %398 = math.log %397 : vector<16x1xf32>
    %399 = vector.shape_cast %398 : vector<16x1xf32> to vector<1x16x1xf32>
    %cst_173 = arith.constant dense<0.000000e+00> : vector<1xf32>
    %400 = vector.multi_reduction <add>, %399, %cst_173 [1, 2] : vector<1x16x1xf32> to vector<1xf32>
    %401 = vector.shape_cast %400 : vector<1xf32> to vector<1x1x1xf32>
    %402 = vector.extract %401[0, 0, 0] : f32 from vector<1x1x1xf32>
    %403 = arith.addf %340, %402 : f32
    %404 = vector.extract_strided_slice %396 {offsets = [0, 0], sizes = [8, 8], strides = [1, 1]} : vector<8x16xf32> to vector<8x8xf32>
    %405 = vector.shape_cast %404 : vector<8x8xf32> to vector<1x8x8xf32>
    %cst_174 = arith.constant dense<0.000000e+00> : vector<1xf32>
    %406 = vector.multi_reduction <add>, %405, %cst_174 [1, 2] : vector<1x8x8xf32> to vector<1xf32>
    %407 = vector.shape_cast %406 : vector<1xf32> to vector<1x1x1xf32>
    %408 = vector.extract %407[0, 0, 0] : f32 from vector<1x1x1xf32>
    %409 = arith.addf %403, %408 : f32
    %410 = arith.addf %347, %402 : f32
    %411 = vector.extract_strided_slice %396 {offsets = [0, 8], sizes = [8, 8], strides = [1, 1]} : vector<8x16xf32> to vector<8x8xf32>
    %412 = vector.shape_cast %411 : vector<8x8xf32> to vector<1x8x8xf32>
    %cst_175 = arith.constant dense<0.000000e+00> : vector<1xf32>
    %413 = vector.multi_reduction <add>, %412, %cst_175 [1, 2] : vector<1x8x8xf32> to vector<1xf32>
    %414 = vector.shape_cast %413 : vector<1xf32> to vector<1x1x1xf32>
    %415 = vector.extract %414[0, 0, 0] : f32 from vector<1x1x1xf32>
    %416 = arith.addf %410, %415 : f32
    %c0_176 = arith.constant 0 : index
    %c0_177 = arith.constant 0 : index
    %417 = vector.load %arg38[%c0_176, %c0_177] : memref<8x1xf32, #tpu.memory_space<vmem>>, vector<8x1xf32>
    %c0_178 = arith.constant 0 : index
    %c0_179 = arith.constant 0 : index
    %418 = vector.load %arg39[%c0_178, %c0_179] : memref<8x1xf32, #tpu.memory_space<vmem>>, vector<8x1xf32>
    %c0_180 = arith.constant 0 : index
    %c0_181 = arith.constant 0 : index
    %419 = vector.load %arg40[%c0_180, %c0_181] : memref<32x36xf32, #tpu.memory_space<vmem>>, vector<32x36xf32>
    %c0_182 = arith.constant 0 : index
    %c0_183 = arith.constant 0 : index
    %420 = vector.load %arg41[%c0_182, %c0_183] : memref<32x1xf32, #tpu.memory_space<vmem>>, vector<32x1xf32>
    %c0_184 = arith.constant 0 : index
    %c0_185 = arith.constant 0 : index
    %421 = vector.load %arg42[%c0_184, %c0_185] : memref<8x32xf32, #tpu.memory_space<vmem>>, vector<8x32xf32>
    %c0_186 = arith.constant 0 : index
    %c0_187 = arith.constant 0 : index
    %422 = vector.load %arg43[%c0_186, %c0_187] : memref<8x1xf32, #tpu.memory_space<vmem>>, vector<8x1xf32>
    %c24_188 = arith.constant 24 : index
    %c0_189 = arith.constant 0 : index
    %423 = vector.load %arg50[%c24_188, %c0_189] : memref<32x16xf32, #tpu.memory_space<vmem>>, vector<8x16xf32>
    %424 = vector.broadcast %417 : vector<8x1xf32> to vector<8x16xf32>
    %425 = arith.addf %423, %424 : vector<8x16xf32>
    %426 = vector.broadcast %418 : vector<8x1xf32> to vector<8x16xf32>
    %427 = arith.mulf %426, %425 : vector<8x16xf32>
    %428 = vector.extract_strided_slice %427 {offsets = [0, 0], sizes = [4, 16], strides = [1, 1]} : vector<8x16xf32> to vector<4x16xf32>
    %429 = vector.extract_strided_slice %427 {offsets = [4, 0], sizes = [4, 16], strides = [1, 1]} : vector<8x16xf32> to vector<4x16xf32>
    %430 = tpu.concatenate %428, %0 in 0 : vector<4x16xf32>, vector<32x16xf32> -> vector<36x16xf32>
    %431 = arith.truncf %430 : vector<36x16xf32> to vector<36x16xbf16>
    %432 = arith.truncf %419 : vector<32x36xf32> to vector<32x36xbf16>
    %cst_190 = arith.constant dense<0.000000e+00> : vector<32x16xf32>
    %433 = tpu.matmul %432, %431, %cst_190 {dimension_numbers = #tpu.dot_dimension_numbers<[1], [0], [0], [1], [0, 0, 1, 1], [], []>} : vector<32x36xbf16>, vector<36x16xbf16>, vector<32x16xf32> -> vector<32x16xf32>
    %434 = vector.broadcast %420 : vector<32x1xf32> to vector<32x16xf32>
    %435 = arith.addf %433, %434 : vector<32x16xf32>
    %cst_191 = arith.constant 0.000000e+00 : f32
    %436 = vector.broadcast %cst_191 : f32 to vector<32x16xf32>
    %437 = arith.maximumf %435, %436 : vector<32x16xf32>
    %438 = arith.truncf %421 : vector<8x32xf32> to vector<8x32xbf16>
    %439 = arith.truncf %437 : vector<32x16xf32> to vector<32x16xbf16>
    %cst_192 = arith.constant dense<0.000000e+00> : vector<8x16xf32>
    %440 = tpu.matmul %438, %439, %cst_192 {dimension_numbers = #tpu.dot_dimension_numbers<[1], [0], [0], [1], [0, 0, 1, 1], [], []>} : vector<8x32xbf16>, vector<32x16xbf16>, vector<8x16xf32> -> vector<8x16xf32>
    %441 = vector.broadcast %422 : vector<8x1xf32> to vector<8x16xf32>
    %442 = arith.addf %440, %441 : vector<8x16xf32>
    %443 = vector.extract_strided_slice %442 {offsets = [0, 0], sizes = [4, 16], strides = [1, 1]} : vector<8x16xf32> to vector<4x16xf32>
    %444 = vector.extract_strided_slice %442 {offsets = [4, 0], sizes = [4, 16], strides = [1, 1]} : vector<8x16xf32> to vector<4x16xf32>
    %cst_193 = arith.constant 2.000000e+00 : f32
    %445 = vector.broadcast %cst_193 : f32 to vector<4x16xf32>
    %446 = arith.addf %443, %445 : vector<4x16xf32>
    %447 = arith.negf %446 : vector<4x16xf32>
    %448 = math.exp %447 : vector<4x16xf32>
    %cst_194 = arith.constant 1.000000e+00 : f32
    %449 = vector.broadcast %cst_194 : f32 to vector<4x16xf32>
    %450 = arith.addf %449, %448 : vector<4x16xf32>
    %451 = arith.divf %449, %450 : vector<4x16xf32>
    %452 = arith.addf %429, %444 : vector<4x16xf32>
    %453 = arith.mulf %452, %451 : vector<4x16xf32>
    %c24_195 = arith.constant 24 : index
    %c0_196 = arith.constant 0 : index
    %454 = vector.load %arg50[%c24_195, %c0_196] : memref<32x16xf32, #tpu.memory_space<vmem>>, vector<4x16xf32>
    tpu.vector_store %arg50[%c24_195, %c0_196], %428 {strides = array<i32>} : memref<32x16xf32, #tpu.memory_space<vmem>>, vector<4x16xf32>,
    %c28 = arith.constant 28 : index
    %c0_197 = arith.constant 0 : index
    %455 = vector.load %arg50[%c28, %c0_197] : memref<32x16xf32, #tpu.memory_space<vmem>>, vector<4x16xf32>
    tpu.vector_store %arg50[%c28, %c0_197], %453 {strides = array<i32>} : memref<32x16xf32, #tpu.memory_space<vmem>>, vector<4x16xf32>,
    %cst_198 = arith.constant 0.000000e+00 : f32
    %456 = vector.broadcast %cst_198 : f32 to vector<4x16xf32>
    %457 = arith.minimumf %446, %456 : vector<4x16xf32>
    %458 = math.absf %446 : vector<4x16xf32>
    %cst_199 = arith.constant 0.000000e+00 : f32
    %459 = vector.broadcast %cst_199 : f32 to vector<4x16xf32>
    %460 = arith.subf %459, %458 : vector<4x16xf32>
    %461 = math.exp %460 : vector<4x16xf32>
    %cst_200 = arith.constant 1.000000e+00 : f32
    %462 = vector.broadcast %cst_200 : f32 to vector<4x16xf32>
    %463 = arith.addf %462, %461 : vector<4x16xf32>
    %464 = math.log %463 : vector<4x16xf32>
    %465 = arith.subf %457, %464 : vector<4x16xf32>
    %466 = math.absf %418 : vector<8x1xf32>
    %467 = math.log %466 : vector<8x1xf32>
    %468 = vector.shape_cast %467 : vector<8x1xf32> to vector<1x8x1xf32>
    %cst_201 = arith.constant dense<0.000000e+00> : vector<1xf32>
    %469 = vector.multi_reduction <add>, %468, %cst_201 [1, 2] : vector<1x8x1xf32> to vector<1xf32>
    %470 = vector.shape_cast %469 : vector<1xf32> to vector<1x1x1xf32>
    %471 = vector.extract %470[0, 0, 0] : f32 from vector<1x1x1xf32>
    %472 = arith.addf %409, %471 : f32
    %473 = vector.extract_strided_slice %465 {offsets = [0, 0], sizes = [4, 8], strides = [1, 1]} : vector<4x16xf32> to vector<4x8xf32>
    %474 = vector.shape_cast %473 : vector<4x8xf32> to vector<1x4x8xf32>
    %cst_202 = arith.constant dense<0.000000e+00> : vector<1xf32>
    %475 = vector.multi_reduction <add>, %474, %cst_202 [1, 2] : vector<1x4x8xf32> to vector<1xf32>
    %476 = vector.shape_cast %475 : vector<1xf32> to vector<1x1x1xf32>
    %477 = vector.extract %476[0, 0, 0] : f32 from vector<1x1x1xf32>
    %478 = arith.addf %472, %477 : f32
    %479 = arith.addf %416, %471 : f32
    %480 = vector.extract_strided_slice %465 {offsets = [0, 8], sizes = [4, 8], strides = [1, 1]} : vector<4x16xf32> to vector<4x8xf32>
    %481 = vector.shape_cast %480 : vector<4x8xf32> to vector<1x4x8xf32>
    %cst_203 = arith.constant dense<0.000000e+00> : vector<1xf32>
    %482 = vector.multi_reduction <add>, %481, %cst_203 [1, 2] : vector<1x4x8xf32> to vector<1xf32>
    %483 = vector.shape_cast %482 : vector<1xf32> to vector<1x1x1xf32>
    %484 = vector.extract %483[0, 0, 0] : f32 from vector<1x1x1xf32>
    %485 = arith.addf %479, %484 : f32
    %c0_204 = arith.constant 0 : index
    %c0_205 = arith.constant 0 : index
    %486 = vector.load %arg44[%c0_204, %c0_205] : memref<8x1xf32, #tpu.memory_space<vmem>>, vector<8x1xf32>
    %c0_206 = arith.constant 0 : index
    %c0_207 = arith.constant 0 : index
    %487 = vector.load %arg45[%c0_206, %c0_207] : memref<8x1xf32, #tpu.memory_space<vmem>>, vector<8x1xf32>
    %c0_208 = arith.constant 0 : index
    %c0_209 = arith.constant 0 : index
    %488 = vector.load %arg46[%c0_208, %c0_209] : memref<32x36xf32, #tpu.memory_space<vmem>>, vector<32x36xf32>
    %c0_210 = arith.constant 0 : index
    %c0_211 = arith.constant 0 : index
    %489 = vector.load %arg47[%c0_210, %c0_211] : memref<32x1xf32, #tpu.memory_space<vmem>>, vector<32x1xf32>
    %c0_212 = arith.constant 0 : index
    %c0_213 = arith.constant 0 : index
    %490 = vector.load %arg48[%c0_212, %c0_213] : memref<8x32xf32, #tpu.memory_space<vmem>>, vector<8x32xf32>
    %c0_214 = arith.constant 0 : index
    %c0_215 = arith.constant 0 : index
    %491 = vector.load %arg49[%c0_214, %c0_215] : memref<8x1xf32, #tpu.memory_space<vmem>>, vector<8x1xf32>
    %c24_216 = arith.constant 24 : index
    %c0_217 = arith.constant 0 : index
    %492 = vector.load %arg50[%c24_216, %c0_217] : memref<32x16xf32, #tpu.memory_space<vmem>>, vector<8x16xf32>
    %493 = vector.broadcast %486 : vector<8x1xf32> to vector<8x16xf32>
    %494 = arith.addf %492, %493 : vector<8x16xf32>
    %495 = vector.broadcast %487 : vector<8x1xf32> to vector<8x16xf32>
    %496 = arith.mulf %495, %494 : vector<8x16xf32>
    %497 = vector.extract_strided_slice %496 {offsets = [0, 0], sizes = [4, 16], strides = [1, 1]} : vector<8x16xf32> to vector<4x16xf32>
    %498 = vector.extract_strided_slice %496 {offsets = [4, 0], sizes = [4, 16], strides = [1, 1]} : vector<8x16xf32> to vector<4x16xf32>
    %499 = tpu.concatenate %497, %0 in 0 : vector<4x16xf32>, vector<32x16xf32> -> vector<36x16xf32>
    %500 = arith.truncf %499 : vector<36x16xf32> to vector<36x16xbf16>
    %501 = arith.truncf %488 : vector<32x36xf32> to vector<32x36xbf16>
    %cst_218 = arith.constant dense<0.000000e+00> : vector<32x16xf32>
    %502 = tpu.matmul %501, %500, %cst_218 {dimension_numbers = #tpu.dot_dimension_numbers<[1], [0], [0], [1], [0, 0, 1, 1], [], []>} : vector<32x36xbf16>, vector<36x16xbf16>, vector<32x16xf32> -> vector<32x16xf32>
    %503 = vector.broadcast %489 : vector<32x1xf32> to vector<32x16xf32>
    %504 = arith.addf %502, %503 : vector<32x16xf32>
    %cst_219 = arith.constant 0.000000e+00 : f32
    %505 = vector.broadcast %cst_219 : f32 to vector<32x16xf32>
    %506 = arith.maximumf %504, %505 : vector<32x16xf32>
    %507 = arith.truncf %490 : vector<8x32xf32> to vector<8x32xbf16>
    %508 = arith.truncf %506 : vector<32x16xf32> to vector<32x16xbf16>
    %cst_220 = arith.constant dense<0.000000e+00> : vector<8x16xf32>
    %509 = tpu.matmul %507, %508, %cst_220 {dimension_numbers = #tpu.dot_dimension_numbers<[1], [0], [0], [1], [0, 0, 1, 1], [], []>} : vector<8x32xbf16>, vector<32x16xbf16>, vector<8x16xf32> -> vector<8x16xf32>
    %510 = vector.broadcast %491 : vector<8x1xf32> to vector<8x16xf32>
    %511 = arith.addf %509, %510 : vector<8x16xf32>
    %512 = vector.extract_strided_slice %511 {offsets = [0, 0], sizes = [4, 16], strides = [1, 1]} : vector<8x16xf32> to vector<4x16xf32>
    %513 = vector.extract_strided_slice %511 {offsets = [4, 0], sizes = [4, 16], strides = [1, 1]} : vector<8x16xf32> to vector<4x16xf32>
    %cst_221 = arith.constant 2.000000e+00 : f32
    %514 = vector.broadcast %cst_221 : f32 to vector<4x16xf32>
    %515 = arith.addf %512, %514 : vector<4x16xf32>
    %516 = arith.negf %515 : vector<4x16xf32>
    %517 = math.exp %516 : vector<4x16xf32>
    %cst_222 = arith.constant 1.000000e+00 : f32
    %518 = vector.broadcast %cst_222 : f32 to vector<4x16xf32>
    %519 = arith.addf %518, %517 : vector<4x16xf32>
    %520 = arith.divf %518, %519 : vector<4x16xf32>
    %521 = arith.addf %498, %513 : vector<4x16xf32>
    %522 = arith.mulf %521, %520 : vector<4x16xf32>
    %c24_223 = arith.constant 24 : index
    %c0_224 = arith.constant 0 : index
    %523 = vector.load %arg50[%c24_223, %c0_224] : memref<32x16xf32, #tpu.memory_space<vmem>>, vector<4x16xf32>
    tpu.vector_store %arg50[%c24_223, %c0_224], %497 {strides = array<i32>} : memref<32x16xf32, #tpu.memory_space<vmem>>, vector<4x16xf32>,
    %c28_225 = arith.constant 28 : index
    %c0_226 = arith.constant 0 : index
    %524 = vector.load %arg50[%c28_225, %c0_226] : memref<32x16xf32, #tpu.memory_space<vmem>>, vector<4x16xf32>
    tpu.vector_store %arg50[%c28_225, %c0_226], %522 {strides = array<i32>} : memref<32x16xf32, #tpu.memory_space<vmem>>, vector<4x16xf32>,
    %cst_227 = arith.constant 0.000000e+00 : f32
    %525 = vector.broadcast %cst_227 : f32 to vector<4x16xf32>
    %526 = arith.minimumf %515, %525 : vector<4x16xf32>
    %527 = math.absf %515 : vector<4x16xf32>
    %cst_228 = arith.constant 0.000000e+00 : f32
    %528 = vector.broadcast %cst_228 : f32 to vector<4x16xf32>
    %529 = arith.subf %528, %527 : vector<4x16xf32>
    %530 = math.exp %529 : vector<4x16xf32>
    %cst_229 = arith.constant 1.000000e+00 : f32
    %531 = vector.broadcast %cst_229 : f32 to vector<4x16xf32>
    %532 = arith.addf %531, %530 : vector<4x16xf32>
    %533 = math.log %532 : vector<4x16xf32>
    %534 = arith.subf %526, %533 : vector<4x16xf32>
    %535 = math.absf %487 : vector<8x1xf32>
    %536 = math.log %535 : vector<8x1xf32>
    %537 = vector.shape_cast %536 : vector<8x1xf32> to vector<1x8x1xf32>
    %cst_230 = arith.constant dense<0.000000e+00> : vector<1xf32>
    %538 = vector.multi_reduction <add>, %537, %cst_230 [1, 2] : vector<1x8x1xf32> to vector<1xf32>
    %539 = vector.shape_cast %538 : vector<1xf32> to vector<1x1x1xf32>
    %540 = vector.extract %539[0, 0, 0] : f32 from vector<1x1x1xf32>
    %541 = arith.addf %478, %540 : f32
    %542 = vector.extract_strided_slice %534 {offsets = [0, 0], sizes = [4, 8], strides = [1, 1]} : vector<4x16xf32> to vector<4x8xf32>
    %543 = vector.shape_cast %542 : vector<4x8xf32> to vector<1x4x8xf32>
    %cst_231 = arith.constant dense<0.000000e+00> : vector<1xf32>
    %544 = vector.multi_reduction <add>, %543, %cst_231 [1, 2] : vector<1x4x8xf32> to vector<1xf32>
    %545 = vector.shape_cast %544 : vector<1xf32> to vector<1x1x1xf32>
    %546 = vector.extract %545[0, 0, 0] : f32 from vector<1x1x1xf32>
    %547 = arith.addf %541, %546 : f32
    %548 = arith.addf %485, %540 : f32
    %549 = vector.extract_strided_slice %534 {offsets = [0, 8], sizes = [4, 8], strides = [1, 1]} : vector<4x16xf32> to vector<4x8xf32>
    %550 = vector.shape_cast %549 : vector<4x8xf32> to vector<1x4x8xf32>
    %cst_232 = arith.constant dense<0.000000e+00> : vector<1xf32>
    %551 = vector.multi_reduction <add>, %550, %cst_232 [1, 2] : vector<1x4x8xf32> to vector<1xf32>
    %552 = vector.shape_cast %551 : vector<1xf32> to vector<1x1x1xf32>
    %553 = vector.extract %552[0, 0, 0] : f32 from vector<1x1x1xf32>
    %554 = arith.addf %548, %553 : f32
    %c0_233 = arith.constant 0 : index
    %555 = memref.load %arg51[%c0_233] : memref<2xf32, #tpu.memory_space<smem>>
    memref.store %547, %arg51[%c0_233] : memref<2xf32, #tpu.memory_space<smem>>
    %c1 = arith.constant 1 : index
    %556 = memref.load %arg51[%c1] : memref<2xf32, #tpu.memory_space<smem>>
    memref.store %554, %arg51[%c1] : memref<2xf32, #tpu.memory_space<smem>>
    return
  }
}

</mosaic_0001>

<bundles_post_ra>
// kernel: flow_aff_act_forward.1
= control target key start
LH: loop header
LB: loop body
LE: loop exit
PB: predicated region body
PF: predicated region fallthrough
CT: control target
= control target key end

     0   :  { %s3123_s6 = smov 1   ;;  %s3124_s10 = smov 2   ;;  %s4346_s0 = inlined_call_operand.smem [shape: u32[52], index: -1, kind: input, shape index: {}] }
   0x1   :  { %s3187_s5 = sld [smem:[%s4346_s0]]   ;;  %s3125_s14 = smov 3  }
   0x2   :  { %s3192_s9 = sld [smem:[%s4346_s0 + %s3123_s6]]   ;;  %s3126_s18 = smov 4  }
   0x3   :  { %s3197_s13 = sld [smem:[%s4346_s0 + %s3124_s10]]   ;;  %s3127_s22 = smov 5  }
   0x4   :  { %s3202_s17 = sld [smem:[%s4346_s0 + %s3125_s14]]   ;;  %s3128_s26 = smov 6  }
   0x5   :  { %s3207_s21 = sld [smem:[%s4346_s0 + %s3126_s18]]   ;;  %s3129_s30 = smov 7  }
   0x6   :  { %s3212_s25 = sld [smem:[%s4346_s0 + %s3127_s22]]   ;;  %s3130_s4 = smov 8  }
   0x7   :  { %s3217_s29 = sld [smem:[%s4346_s0 + %s3128_s26]]   ;;  %s3131_s10 = smov 9  }
   0x8   :  { %s3222_s3 = sld [smem:[%s4346_s0 + %s3129_s30]]   ;;  %s3132_s15 = smov 10  }
   0x9   :  { %s3227_s8 = sld [smem:[%s4346_s0 + %s3130_s4]]   ;;  %s3133_s20 = smov 11  }
   0xa   :  { %s3232_s14 = sld [smem:[%s4346_s0 + %s3131_s10]]   ;;  %s3134_s26 = smov 12  }
   0xb   :  { %s3237_s19 = sld [smem:[%s4346_s0 + %s3132_s15]]   ;;  %s3135_s1 = smov 13  }
   0xc   :  { %s3242_s24 = sld [smem:[%s4346_s0 + %s3133_s20]]   ;;  %s3136_s7 = smov 14  }
   0xd   :  { %4383 = sst [smem:[#allocation5_spill]] %s3217_s29  ;;  %s3137_s15 = smov 15  }
   0xe   :  { %s3247_s30 = sld [smem:[%s4346_s0 + %s3134_s26]]   ;;  %s3138_s22 = smov 16  }
   0xf   :  { %s3252_s6 = sld [smem:[%s4346_s0 + %s3135_s1]]   ;;  %s3139_s28 = smov 17  }
  0x10   :  { %s3257_s12 = sld [smem:[%s4346_s0 + %s3136_s7]]   ;;  %s3140_s7 = smov 18  }
  0x11   :  { %4384 = sst [smem:[#allocation6_spill]] %s3237_s19 }
  0x12   :  { %s3262_s20 = sld [smem:[%s4346_s0 + %s3137_s15]]   ;;  %s3141_s15 = smov 19  }
  0x13   :  { %s3267_s27 = sld [smem:[%s4346_s0 + %s3138_s22]]   ;;  %s3142_s22 = smov 20  }
  0x14   :  { %4385 = sst [smem:[#allocation7_spill]] %s3247_s30 }
  0x15   :  { %s3272_s4 = sld [smem:[%s4346_s0 + %s3139_s28]]   ;;  %s3143_s28 = smov 21  }
  0x16   :  { %s3277_s30 = sld [smem:[%s4346_s0 + %s3140_s7]]   ;;  %s3144_s7 = smov 22  }
  0x17   :  { %s3282_s19 = sld [smem:[%s4346_s0 + %s3141_s15]]   ;;  %s3145_s15 = smov 23  }
  0x18   :  { %s3292_s29 = sld [smem:[%s4346_s0 + %s3143_s28]]   ;;  %s3147_s28 = smov 25  }
  0x19   :  { %4386 = sst [smem:[#allocation8_spill]] %s3267_s27 }
  0x1a   :  { %s3287_s27 = sld [smem:[%s4346_s0 + %s3142_s22]]   ;;  %s3146_s22 = smov 24  }
  0x1c   :  { %4387 = sst [smem:[#allocation9_spill]] %s3277_s30 }
  0x1d   :  { %4388 = sst [smem:[#allocation10_spill]] %s3282_s19 }
  0x1e   :  { %4390 = sst [smem:[#allocation12_spill]] %s3292_s29 }
  0x1f   :  { %s3297_s30 = sld [smem:[%s4346_s0 + %s3144_s7]]   ;;  %s3148_s7 = smov 26  }
  0x20   :  { %4389 = sst [smem:[#allocation11_spill]] %s3287_s27 }
  0x21   :  { %s3302_s19 = sld [smem:[%s4346_s0 + %s3145_s15]]   ;;  %s3149_s15 = smov 27  }
  0x22   :  { %s3307_s27 = sld [smem:[%s4346_s0 + %s3146_s22]]   ;;  %s3150_s22 = smov 28  }
  0x23   :  { %s3312_s29 = sld [smem:[%s4346_s0 + %s3147_s28]]   ;;  %s3151_s28 = smov 29  }
  0x25   :  { %4391 = sst [smem:[#allocation13_spill]] %s3297_s30 }
  0x26   :  { %s3317_s30 = sld [smem:[%s4346_s0 + %s3148_s7]]   ;;  %s3152_s7 = smov 30  }
  0x27   :  { %4392 = sst [smem:[#allocation14_spill]] %s3302_s19 }
  0x28   :  { %4393 = sst [smem:[#allocation15_spill]] %s3307_s27 }
  0x29   :  { %4394 = sst [smem:[#allocation16_spill]] %s3312_s29 }
  0x2a   :  { %s3322_s19 = sld [smem:[%s4346_s0 + %s3149_s15]]   ;;  %s3153_s15 = smov 31  }
  0x2b   :  { %s3327_s27 = sld [smem:[%s4346_s0 + %s3150_s22]]   ;;  %s3154_s22 = smov 32  }
  0x2c   :  { %4395 = sst [smem:[#allocation17_spill]] %s3317_s30 }
  0x2d   :  { %s3332_s29 = sld [smem:[%s4346_s0 + %s3151_s28]]   ;;  %s3155_s28 = smov 33  }
  0x2e   :  { %s3337_s30 = sld [smem:[%s4346_s0 + %s3152_s7]]   ;;  %s3156_s7 = smov 34  }
  0x30   :  { %4396 = sst [smem:[#allocation18_spill]] %s3322_s19 }
  0x31   :  { %4397 = sst [smem:[#allocation19_spill]] %s3327_s27 }
  0x32   :  { %s3342_s19 = sld [smem:[%s4346_s0 + %s3153_s15]]   ;;  %s3157_s15 = smov 35  }
  0x33   :  { %4398 = sst [smem:[#allocation20_spill]] %s3332_s29 }
  0x34   :  { %4399 = sst [smem:[#allocation21_spill]] %s3337_s30 }
  0x35   :  { %s3347_s27 = sld [smem:[%s4346_s0 + %s3154_s22]]   ;;  %s3158_s22 = smov 36  }
  0x36   :  { %s3352_s29 = sld [smem:[%s4346_s0 + %s3155_s28]]   ;;  %s3159_s28 = smov 37  }
  0x37   :  { %s3357_s30 = sld [smem:[%s4346_s0 + %s3156_s7]]   ;;  %s3160_s7 = smov 38  }
  0x38   :  { %4400 = sst [smem:[#allocation22_spill]] %s3342_s19 }
  0x39   :  { %s3362_s19 = sld [smem:[%s4346_s0 + %s3157_s15]]   ;;  %s3161_s15 = smov 39  }
  0x3b   :  { %4401 = sst [smem:[#allocation23_spill]] %s3347_s27 }
  0x3c   :  { %4402 = sst [smem:[#allocation24_spill]] %s3352_s29 }
  0x3d   :  { %4403 = sst [smem:[#allocation25_spill]] %s3357_s30 }
  0x3e   :  { %s3367_s27 = sld [smem:[%s4346_s0 + %s3158_s22]]   ;;  %s3162_s22 = smov 40  }
  0x3f   :  { %4404 = sst [smem:[#allocation26_spill]] %s3362_s19 }
  0x40   :  { %s3372_s29 = sld [smem:[%s4346_s0 + %s3159_s28]]   ;;  %s3163_s28 = smov 41  }
  0x41   :  { %s3377_s30 = sld [smem:[%s4346_s0 + %s3160_s7]]   ;;  %s3164_s7 = smov 42  }
  0x42   :  { %s3382_s19 = sld [smem:[%s4346_s0 + %s3161_s15]]   ;;  %s3165_s15 = smov 43  }
  0x44   :  { %4405 = sst [smem:[#allocation27_spill]] %s3367_s27 }
  0x45   :  { %s3387_s27 = sld [smem:[%s4346_s0 + %s3162_s22]]   ;;  %s3166_s22 = smov 44  }
  0x46   :  { %4406 = sst [smem:[#allocation28_spill]] %s3372_s29 }
  0x47   :  { %4407 = sst [smem:[#allocation29_spill]] %s3377_s30 }
  0x48   :  { %4408 = sst [smem:[#allocation30_spill]] %s3382_s19 }
  0x49   :  { %s3392_s29 = sld [smem:[%s4346_s0 + %s3163_s28]]   ;;  %s3167_s28 = smov 45  }
  0x4a   :  { %s3397_s30 = sld [smem:[%s4346_s0 + %s3164_s7]]   ;;  %s3168_s7 = smov 46  }
  0x4b   :  { %4409 = sst [smem:[#allocation31_spill]] %s3387_s27 }
  0x4c   :  { %s3402_s19 = sld [smem:[%s4346_s0 + %s3165_s15]]   ;;  %s3169_s15 = smov 47  }
  0x4d   :  { %s3407_s27 = sld [smem:[%s4346_s0 + %s3166_s22]]   ;;  %s3170_s22 = smov 48  }
  0x4f   :  { %4410 = sst [smem:[#allocation32_spill]] %s3392_s29 }
  0x50   :  { %4411 = sst [smem:[#allocation33_spill]] %s3397_s30 }
  0x51   :  { %s3412_s29 = sld [smem:[%s4346_s0 + %s3167_s28]]   ;;  %s3171_s28 = smov 49  }
  0x52   :  { %4412 = sst [smem:[#allocation34_spill]] %s3402_s19 }
  0x53   :  { %4413 = sst [smem:[#allocation35_spill]] %s3407_s27 }
  0x54   :  { %s3417_s30 = sld [smem:[%s4346_s0 + %s3168_s7]]   ;;  %s3172_s7 = smov 50  }
  0x55   :  { %s3422_s19 = sld [smem:[%s4346_s0 + %s3169_s15]]   ;;  %s3173_s15 = smov 51  }
  0x56   :  { %s3427_s27 = sld [smem:[%s4346_s0 + %s3170_s22]]  }
  0x57   :  { %4414 = sst [smem:[#allocation36_spill]] %s3412_s29 }
  0x58   :  { %s3432_s29 = sld [smem:[%s4346_s0 + %s3171_s28]]  }
  0x5a   :  { %4415 = sst [smem:[#allocation37_spill]] %s3417_s30 }
  0x5b   :  { %4416 = sst [smem:[#allocation38_spill]] %s3422_s19 }
  0x5c   :  { %s3437_s30 = sld [smem:[%s4346_s0 + %s3172_s7]]  }
  0x5d   :  { %s3442_s19 = sld [smem:[%s4346_s0 + %s3173_s15]]  }
  0x63   :  { %4417 = sst [smem:[#allocation39_spill]] %s3442_s19 }
  0x64   :  { %v3445_v0 = vld [vmem:[%s3202_s17] sm:$0xff]  ;;  %v3174_v2 = vmov 0   ;;  %v3450_v3 = vld [vmem:[%s3202_s17 + $0x8] sm:$0xff]  ;;  %v239_v5 = vld [vmem:[%s3212_s25 + $0x18] sm:$0xff]  ;;  %vm219_vm0 = vcmask 130048   ;;  %vm325_vm1 = vcmask 392192  }
  0x65   :  { %v224_v1 = vld [vmem:[%s3197_s13] sm:$0xff]  ;;  %2968 = vset.pattern.permute.xlu1 %v3174_v2  ;;  %2967 = vset.pattern.permute.xlu0 %v3174_v2  ;;  %v225_v4 = vld [vmem:[%s3197_s13 + $0x8] sm:$0xff]  ;;  %v238_v6 = vld [vmem:[%s3212_s25 + $0x10] sm:$0xff] }
  0x66   :  { %278 = vperm.xlu1 %2968, %v3445_v0   ;;  %254 = vperm.xlu0 %2967, %v224_v1   ;;  %v237_v7 = vld [vmem:[%s3212_s25 + $0x8] sm:$0xff]  ;;  %v236_v8 = vld [vmem:[%s3212_s25] sm:$0xff]  ;;  %v585_v13 = vld [vmem:[%s3242_s24 + $0x18] sm:$0xff] }
  0x67   :  { %v571_v9 = vld [vmem:[%s3227_s8 + $0x8] sm:$0xff]  ;;  %v570_v10 = vld [vmem:[%s3227_s8] sm:$0xff]  ;;  %v584_v14 = vld [vmem:[%s3242_s24 + $0x10] sm:$0xff] }
  0x68   :  { %v3461_v11 = vld [vmem:[%s3232_s14 + $0x8] sm:$0xff]  ;;  %v3464_v12 = vld [vmem:[%s3232_s14] sm:$0xff]  ;;  %v213_v16 = vld [vmem:[%s3192_s9 + $0x10] sm:$0xff] }
  0x69   :  { %v215_v15 = vld [vmem:[%s3187_s5] sm:$0xff]  ;;  %v214_v17 = vld [vmem:[%s3192_s9 + $0x18] sm:$0xff]  ;;  %v216_v18 = vld [vmem:[%s3187_s5 + $0x8] sm:$0xff] }
  0x6a   :  { %283 = vperm.xlu1 %2968, %v3450_v3   ;;  %259 = vperm.xlu0 %2967, %v225_v4   ;;  %220 = vst.msk [vmem:[%s3437_s30] sm:$0xff] %vm219_vm0, %v215_v15  ;;  %v3476_v19 = vpack.c.bf16 %v214_v17, %v213_v16  ;;  %221 = vst.msk [vmem:[%s3437_s30 + $0x8] sm:$0xff] %vm219_vm0, %v216_v18  ;;  %v211_v20 = vld [vmem:[%s3192_s9] sm:$0xff]  ;;  %v212_v21 = vld [vmem:[%s3192_s9 + $0x8] sm:$0xff] }
  0x6b   :  { %v3482_v22 = vpack.c.bf16 %v212_v21, %v211_v20  ;;  %v232_v23 = vld [vmem:[%s3207_s21] sm:$0xff]  ;;  %v583_v24 = vld [vmem:[%s3242_s24 + $0x8] sm:$0xff]  ;;  %v217_v30 = vld [vmem:[%s3187_s5 + $0x10] sm:$0xff] }
  0x6c   :  { %v582_v25 = vld [vmem:[%s3242_s24] sm:$0xff]  ;;  %2713 = vmatprep.subr.bf16.mxu0 %v3476_v19  ;;  %v233_v26 = vld [vmem:[%s3207_s21 + $0x8] sm:$0xff]  ;;  %222 = vst.msk [vmem:[%s3437_s30 + $0x10] sm:$0xff] %vm219_vm0, %v217_v30 }
  0x6d   :  { %2714 = vmatpush3.bf16.msra.mxu0 %v3476_v19  ;;  %v303_v27 = vpack.c.bf16 %v233_v26, %v232_v23  ;;  %v590_v28 = vld [vmem:[%s3252_s6] sm:$0xff] }
  0x6e   :  { %322 = vperm.xlu1 %2968, %v239_v5   ;;  %317 = vperm.xlu0 %2967, %v238_v6   ;;  %v244_v29 = vld [vmem:[%s3222_s3] sm:$0xff] }
  0x6f   :  { %2715 = vmatprep.subr.bf16.mxu0 %v3482_v22  ;;  %2719 = vmatprep.mubr.msk.bf16.mxu0 %vm325_vm1, %v303_v27 }
  0x71   :  { %2716 = vmatpush3.bf16.msra.mxu0 %v3482_v22 }
  0x72   :  { %312 = vperm.xlu1 %2968, %v237_v7   ;;  %307 = vperm.xlu0 %2967, %v236_v8  }
  0x76   :  { %605 = vperm.xlu1 %2968, %v571_v9   ;;  %600 = vperm.xlu0 %2967, %v570_v10  }
  0x7a   :  { %629 = vperm.xlu1 %2968, %v3461_v11   ;;  %624 = vperm.xlu0 %2967, %v3464_v12  }
  0x7e   :  { %666 = vperm.xlu1 %2968, %v585_v13   ;;  %661 = vperm.xlu0 %2967, %v584_v14  }
  0x82   :  { %656 = vperm.xlu1 %2968, %v583_v24   ;;  %651 = vperm.xlu0 %2967, %v582_v25  }
  0x86   :  { %734 = vperm.xlu1 %2968, %v590_v28   ;;  %391 = vperm.xlu0 %2967, %v244_v29  }
  0x87   :  { %109 = vsyncpa [#allocation3], 0  ;;  %v230_v31 = vld [vmem:[%s3202_s17 + $0x10] sm:$0xff]  ;;  %v505_v37 = vand.u32 2147483647, %v3445_v0  ;;  %v911_v39 = vld [vmem:[%s3257_s12] sm:$0xff] }
  0x88   :  { %v226_v32 = vld [vmem:[%s3197_s13 + $0x10] sm:$0xff]  ;;  %v506_v38 = vand.u32 2147483647, %v3450_v3  ;;  %v912_v40 = vld [vmem:[%s3257_s12 + $0x8] sm:$0xff]  ;;  %s4418_s0 = sld [smem:[#allocation10_spill]]  ;;  %v3512_v42 = vld [vmem:[%s3262_s20] sm:$0xff] }
  0x89   :  { %v572_v33 = vld [vmem:[%s3227_s8 + $0x10] sm:$0xff]  ;;  %2969 = vlog2.f32 %v505_v37  ;;  %v507_v41 = vand.u32 2147483647, %v230_v31  ;;  %v3515_v43 = vld [vmem:[%s3262_s20 + $0x8] sm:$0xff]  ;;  %v924_v44 = vld [vmem:[%s3272_s4 + $0x18] sm:$0xff]  ;;  %s4419_s25 = sld [smem:[#allocation11_spill]] }
  0x8a   :  { %288 = vperm.xlu1 %2968, %v230_v31   ;;  %264 = vperm.xlu0 %2967, %v226_v32   ;;  %v246_v34 = vld [vmem:[%s3222_s3 + $0x10] sm:$0xff]  ;;  %2971 = vlog2.f32 %v506_v38  ;;  %v922_v46 = vld [vmem:[%s3272_s4 + $0x8] sm:$0xff]  ;;  %v921_v47 = vld [vmem:[%s3272_s4] sm:$0xff]  ;;  %s4420_s24 = sld [smem:[#allocation12_spill]]  ;;  %vm517_vm2 = vcmask 7168   ;;  %vm409_vm3 = vcmask 261120  }
  0x8b   :  { %v592_v35 = vld [vmem:[%s3252_s6 + $0x10] sm:$0xff]  ;;  %2973 = vlog2.f32 %v507_v41  ;;  %s4421_s22 = sld [smem:[#allocation14_spill]]  ;;  %v218_v20 = vld [vmem:[%s3187_s5 + $0x18] sm:$0xff]  ;;  %v591_v24 = vld [vmem:[%s3252_s6 + $0x8] sm:$0xff]  ;;  %s3175_s11 = smov 120   ;;  %vm535_vm4 = vcmask 64512  }
  0x8c   :  { %v3504_v36 = vld [vmem:[%s3232_s14 + $0x10] sm:$0xff]  ;;  %s4423_s23 = sld [smem:[#allocation18_spill]]  ;;  %223 = vst.msk [vmem:[%s3437_s30 + $0x18] sm:$0xff] %vm219_vm0, %v218_v20  ;;  %v245_v25 = vld [vmem:[%s3222_s3 + $0x8] sm:$0xff]  ;;  %v3567_v26 = vld [vmem:[%s3202_s17 + $0x18] sm:$0xff]  ;;  %vm974_vm5 = vcmask 1043456  }
  0x8d   :  { %v923_v45 = vld [vmem:[%s3272_s4 + $0x10] sm:$0xff]  ;;  %s4422_s4 = sld [smem:[#allocation16_spill]]  ;;  %v227_v27 = vld [vmem:[%s3197_s13 + $0x18] sm:$0xff]  ;;  %v248_v30 = vld [vmem:[%s3437_s30] sm:$0xff]  ;;  %vm1020_vm6 = vcmask 1045504   ;;  %vm1013_vm7 = vcmask 359424  }
  0x8e   :  { %610 = vperm.xlu1 %2968, %v572_v33   ;;  %401 = vperm.xlu0 %2967, %v246_v34   ;;  %v929_v49 = vld [vmem:[%s4418_s0 + $0x8] sm:$0xff]  ;;  %v928_v50 = vld [vmem:[%s4418_s0] sm:$0xff]  ;;  %s4424_s26 = sld [smem:[#allocation17_spill]]  ;;  %v573_v28 = vld [vmem:[%s3227_s8 + $0x18] sm:$0xff]  ;;  %vm1176_vm8 = vcmask 125952   ;;  %vm1178_vm9 = vcmask 130052  }
  0x8f   :  { %v1259_v54 = vld [vmem:[%s4419_s25] sm:$0xff]  ;;  %v1260_v55 = vld [vmem:[%s4419_s25 + $0x8] sm:$0xff]  ;;  %s4425_s28 = sld [smem:[#allocation20_spill]]  ;;  %v247_v29 = vld [vmem:[%s3222_s3 + $0x18] sm:$0xff]  ;;  %vm1224_vm10 = vcmask 60416   ;;  %vm1647_vm11 = vcmask 326656  }
  0x90   :  { %v3528_v57 = vld [vmem:[%s4420_s24] sm:$0xff]  ;;  %v3531_v58 = vld [vmem:[%s4420_s24 + $0x8] sm:$0xff]  ;;  %s4426_s1 = sld [smem:[#allocation24_spill]]  ;;  %v593_v31 = vld [vmem:[%s3252_s6 + $0x18] sm:$0xff]  ;;  %vm3177_vm12 = vmmov 0   ;;  %vm2138_vm13 = vcmask 1041408  }
  0x91   :  { %v1272_v1 = vld [vmem:[%s4421_s22 + $0x18] sm:$0xff]  ;;  %v1271_v2 = vld [vmem:[%s4421_s22 + $0x10] sm:$0xff]  ;;  %v1270_v3 = vld [vmem:[%s4421_s22 + $0x8] sm:$0xff]  ;;  %s4427_s2 = sld [smem:[#allocation23_spill]]  ;;  %vm2131_vm14 = vcmask 293888  }
  0x92   :  { %744 = vperm.xlu1 %2968, %v592_v35   ;;  %634 = vperm.xlu0 %2967, %v3504_v36   ;;  %v1269_v4 = vld [vmem:[%s4421_s22] sm:$0xff]  ;;  %s4428_s7 = sld [smem:[#allocation26_spill]]  ;;  %v3576_v32 = vld [vmem:[%s3232_s14 + $0x18] sm:$0xff]  ;;  %v249_v37 = vld [vmem:[%s3437_s30 + $0x8] sm:$0xff] }
  0x93   :  { %v1277_v5 = vld [vmem:[%s4422_s4 + $0x8] sm:$0xff]  ;;  %v1276_v6 = vld [vmem:[%s4422_s4] sm:$0xff]  ;;  %s4429_s5 = sld [smem:[#allocation22_spill]]  ;;  %v3581_v38 = vld [vmem:[%s3262_s20 + $0x10] sm:$0xff] }
  0x94   :  { %v3547_v7 = vld [vmem:[%s4423_s23] sm:$0xff]  ;;  %s4430_s13 = sld [smem:[#allocation28_spill]] }
  0x95   :  { %v1580_v8 = vld [vmem:[%s4424_s26] sm:$0xff]  ;;  %v1591_v9 = vld [vmem:[%s4425_s28 + $0x18] sm:$0xff]  ;;  %v1590_v10 = vld [vmem:[%s4425_s28 + $0x10] sm:$0xff]  ;;  %s4431_s17 = sld [smem:[#allocation30_spill]] }
  0x96   :  { %936 = vperm.xlu1 %2968, %v911_v39   ;;  %941 = vperm.xlu0 %2967, %v912_v40   ;;  %v2970_v48 = vpop.eup %2969  ;;  %v1589_v13 = vld [vmem:[%s4425_s28 + $0x8] sm:$0xff]  ;;  %v1588_v14 = vld [vmem:[%s4425_s28] sm:$0xff]  ;;  %v913_v39 = vld [vmem:[%s3257_s12 + $0x10] sm:$0xff]  ;;  %s4433_s3 = sld [smem:[#allocation32_spill]] }
  0x97   :  { %v2972_v51 = vpop.eup %2971  ;;  %v510_v52 = vmul.f32 0.6931472, %v2970_v48  ;;  %v1835_v15 = vld [vmem:[%s4426_s1] sm:$0xff]  ;;  %s4434_s8 = sld [smem:[#allocation35_spill]] }
  0x98   :  { %v512_v53 = vmul.f32 0.6931472, %v2972_v51  ;;  %v2974_v56 = vpop.eup %2973  ;;  %v1833_v16 = vld [vmem:[%s4427_s2] sm:$0xff]  ;;  %v1844_v17 = vld [vmem:[%s4428_s7 + $0x18] sm:$0xff]  ;;  %v1843_v18 = vld [vmem:[%s4428_s7 + $0x10] sm:$0xff]  ;;  %s4435_s14 = sld [smem:[#allocation34_spill]] }
  0x99   :  { %v514_v59 = vmul.f32 0.6931472, %v2974_v56  ;;  %v518_v60 = vsel %vm517_vm2, %v510_v52, 0.0  ;;  %v1842_v21 = vld [vmem:[%s4428_s7 + $0x8] sm:$0xff]  ;;  %v1841_v23 = vld [vmem:[%s4428_s7] sm:$0xff]  ;;  %v234_v51 = vld [vmem:[%s3207_s21 + $0x10] sm:$0xff] }
  0x9a   :  { %954 = vperm.xlu1 %2968, %v3512_v42   ;;  %959 = vperm.xlu0 %2967, %v3515_v43   ;;  %v519_v61 = vsel %vm517_vm2, %v512_v53, 0.0  ;;  %v235_v52 = vld [vmem:[%s3207_s21 + $0x18] sm:$0xff]  ;;  %s4432_s21 = sld [smem:[#allocation29_spill]]  ;;  %v1848_v20 = vld [vmem:[%s4430_s13 + $0x8] sm:$0xff] }
  0x9b   :  { %v520_v62 = vadd.f32 %v519_v61, %v518_v60  ;;  %v521_v63 = vsel %vm517_vm2, %v514_v59, 0.0  ;;  %v304_v56 = vpack.c.bf16 %v235_v52, %v234_v51  ;;  %v1847_v61 = vld [vmem:[%s4430_s13] sm:$0xff]  ;;  %s4436_s6 = sld [smem:[#allocation36_spill]] }
  0x9c   :  { %s4437_s12 = sld [smem:[#allocation38_spill]] }
  0x9d   :  { %v3538_v0 = vadd.f32 %v521_v63, %v520_v62  ;;  %v1278_v62 = vld [vmem:[%s4422_s4 + $0x10] sm:$0xff]  ;;  %s4438_s20 = sld [smem:[#allocation5_spill]] }
  0x9e   :  { %1010 = vperm.xlu1 %2968, %v924_v44   ;;  %1005 = vperm.xlu0 %2967, %v923_v45   ;;  %s4439_s10 = sld [smem:[#allocation6_spill]] }
  0x9f   :  { %s4473_s15 = sld [smem:[#allocation8_spill]] }
  0xa0   :  { %s4480_s16 = sld [smem:[#allocation13_spill]] }
  0xa1   :  { %s4482_s7 = sld [smem:[#allocation19_spill]] }
  0xa2   :  { %1000 = vperm.xlu1 %2968, %v922_v46   ;;  %995 = vperm.xlu0 %2967, %v921_v47   ;;  %v1594_v46 = vld [vmem:[%s4429_s5] sm:$0xff]  ;;  %v930_v47 = vld [vmem:[%s4418_s0 + $0x10] sm:$0xff]  ;;  %v2319_v52 = vld [vmem:[%s4437_s12 + $0x18] sm:$0xff] }
  0xa6   :  { %1088 = vperm.xlu1 %2968, %v929_v49   ;;  %1083 = vperm.xlu0 %2967, %v928_v50  }
  0xaa   :  { %1284 = vperm.xlu1 %2968, %v1259_v54   ;;  %1289 = vperm.xlu0 %2967, %v1260_v55   ;;  %v3598_v54 = vld [vmem:[%s4420_s24 + $0x10] sm:$0xff] }
  0xab   :  { %v1261_v55 = vld [vmem:[%s4419_s25 + $0x10] sm:$0xff] }
  0xae   :  { %1302 = vperm.xlu1 %2968, %v3528_v57   ;;  %1307 = vperm.xlu0 %2967, %v3531_v58  }
  0xb2   :  { %1339 = vperm.xlu1 %2968, %v1272_v1   ;;  %1334 = vperm.xlu0 %2967, %v1271_v2  }
  0xb6   :  { %1329 = vperm.xlu1 %2968, %v1270_v3   ;;  %1324 = vperm.xlu0 %2967, %v1269_v4   ;;  %v3612_v4 = vld [vmem:[%s4423_s23 + $0x8] sm:$0xff] }
  0xba   :  { %1412 = vperm.xlu1 %2968, %v1277_v5   ;;  %1407 = vperm.xlu0 %2967, %v1276_v6   ;;  %v1581_v5 = vld [vmem:[%s4424_s26 + $0x8] sm:$0xff] }
  0xbe   :  { %1612 = vperm.xlu1 %2968, %v3547_v7   ;;  %1600 = vperm.xlu0 %2967, %v1580_v8  }
  0xc2   :  { %1644 = vperm.xlu1 %2968, %v1591_v9   ;;  %1639 = vperm.xlu0 %2967, %v1590_v10  }
  0xc6   :  { %1634 = vperm.xlu1 %2968, %v1589_v13   ;;  %1629 = vperm.xlu0 %2967, %v1588_v14  }
  0xca   :  { %1865 = vperm.xlu1 %2968, %v1835_v15   ;;  %1853 = vperm.xlu0 %2967, %v1833_v16   ;;  %v1834_v15 = vld [vmem:[%s4427_s2 + $0x8] sm:$0xff]  ;;  %s4481_s2 = sld [smem:[#allocation15_spill]] }
  0xcb   :  { %v1595_v16 = vld [vmem:[%s4429_s5 + $0x8] sm:$0xff] }
  0xce   :  { %1895 = vperm.xlu1 %2968, %v1844_v17   ;;  %1890 = vperm.xlu0 %2967, %v1843_v18  }
  0xd2   :  { %1885 = vperm.xlu1 %2968, %v1842_v21   ;;  %1880 = vperm.xlu0 %2967, %v1841_v23   ;;  %v1836_v21 = vld [vmem:[%s4426_s1 + $0x8] sm:$0xff] }
  0xd6   :  { %739 = vperm.xlu1 %2968, %v591_v24   ;;  %396 = vperm.xlu0 %2967, %v245_v25   ;;  %v2081_v24 = vld [vmem:[%s4431_s17] sm:$0xff] }
  0xd7   :  { %v2080_v25 = vld [vmem:[%s4432_s21] sm:$0xff] }
  0xda   :  { %293 = vperm.xlu1 %2968, %v3567_v26   ;;  %269 = vperm.xlu0 %2967, %v227_v27  }
  0xde   :  { %615 = vperm.xlu1 %2968, %v573_v28   ;;  %406 = vperm.xlu0 %2967, %v247_v29   ;;  %v2089_v28 = vld [vmem:[%s4433_s3 + $0x18] sm:$0xff]  ;;  %v2088_v29 = vld [vmem:[%s4433_s3 + $0x10] sm:$0xff] }
  0xe1   :  { %v279_v33 = vpop.permute.xlu1 %278  ;;  %v255_v34 = vpop.permute.xlu0 %254 }
  0xe2   :  { %v272_v35 = vadd.f32 %v255_v34, %v248_v30  ;;  %749 = vperm.xlu1 %2968, %v593_v31   ;;  %639 = vperm.xlu0 %2967, %v3576_v32   ;;  %v2087_v31 = vld [vmem:[%s4433_s3 + $0x8] sm:$0xff] }
  0xe4   :  { %v296_v40 = vmul.f32 %v279_v33, %v272_v35  ;;  %v2086_v33 = vld [vmem:[%s4433_s3] sm:$0xff] }
  0xe5   :  { %v284_v41 = vpop.permute.xlu1 %283  ;;  %v260_v44 = vpop.permute.xlu0 %259  ;;  %v2310_v35 = vld [vmem:[%s4434_s8] sm:$0xff] }
  0xe6   :  { %483 = vst.msk [vmem:[%s3437_s30] sm:$0xff] %vm219_vm0, %v296_v40  ;;  %v273_v45 = vadd.f32 %v260_v44, %v249_v37  ;;  %964 = vperm.xlu1 %2968, %v3581_v38   ;;  %946 = vperm.xlu0 %2967, %v913_v39   ;;  %v2091_v37 = vld [vmem:[%s4435_s14] sm:$0xff]  ;;  %v508_v44 = vand.u32 2147483647, %v3567_v26  ;;  %v2317_v26 = vld [vmem:[%s4437_s12 + $0x8] sm:$0xff]  ;;  %s4485_s14 = sld [smem:[#allocation21_spill]] }
  0xe8   :  { %v297_v48 = vmul.f32 %v284_v41, %v273_v45  ;;  %2975 = vlog2.f32 %v508_v44  ;;  %v243_v44 = vld [vmem:[%s4438_s20 + $0x18] sm:$0xff] }
  0xe9   :  { %v3589_v49 = vpop.permute.xlu1 %322  ;;  %v3591_v50 = vpop.permute.xlu0 %317 }
  0xea   :  { %484 = vst.msk [vmem:[%s3437_s30 + $0x8] sm:$0xff] %vm219_vm0, %v297_v48  ;;  %1715 = vperm.xlu1 %2968, %v1594_v46   ;;  %1093 = vperm.xlu0 %2967, %v930_v47   ;;  %v300_v53 = vpack.c.bf16 %v297_v48, %v296_v40  ;;  %v2311_v40 = vld [vmem:[%s4436_s6] sm:$0xff]  ;;  %v2318_v46 = vld [vmem:[%s4437_s12 + $0x10] sm:$0xff] }
  0xec   :  { %2717 = vmatprep.subr.bf16.mxu0 %v300_v53 }
  0xed   :  { %v3601_v59 = vpop.permute.xlu1 %312  ;;  %v3603_v60 = vpop.permute.xlu0 %307  ;;  %2718 = vmatpush3.bf16.msra.mxu0 %v300_v53  ;;  %v594_v3 = vld [vmem:[%s3437_s30] sm:$0xff] }
  0xee   :  { %1312 = vperm.xlu1 %2968, %v3598_v54   ;;  %1294 = vperm.xlu0 %2967, %v1261_v55   ;;  %v2316_v55 = vld [vmem:[%s4437_s12] sm:$0xff]  ;;  %s4487_s12 = sld [smem:[#allocation25_spill]] }
  0xf0   :  { %2720 = vmatmul.mubr.msk.bf16.vlgmr.msra.gmra.mxu0 %vm325_vm1, %v304_v56 }
  0xf1   :  { %v606_v63 = vpop.permute.xlu1 %605  ;;  %v595_v1 = vld [vmem:[%s3437_s30 + $0x8] sm:$0xff]  ;;  %v601_v2 = vpop.permute.xlu0 %600 }
  0xf2   :  { %1962 = vperm.xlu1 %2968, %v1847_v61   ;;  %1417 = vperm.xlu0 %2967, %v1278_v62   ;;  %v619_v6 = vadd.f32 %v606_v63, %v595_v1  ;;  %v618_v8 = vadd.f32 %v601_v2, %v594_v3 }
  0xf5   :  { %v630_v9 = vpop.permute.xlu1 %629  ;;  %v625_v10 = vpop.permute.xlu0 %624 }
  0xf6   :  { %v643_v13 = vmul.f32 %v630_v9, %v619_v6  ;;  %v642_v14 = vmul.f32 %v625_v10, %v618_v8  ;;  %1617 = vperm.xlu1 %2968, %v3612_v4   ;;  %1605 = vperm.xlu0 %2967, %v1581_v5   ;;  %v2976_v62 = vpop.eup %2975  ;;  %v240_v10 = vld [vmem:[%s4438_s20] sm:$0xff] }
  0xf7   :  { %v516_v2 = vmul.f32 0.6931472, %v2976_v62  ;;  %v850_v62 = vand.u32 2147483647, %v3576_v32 }
  0xf8   :  { %826 = vst.msk [vmem:[%s3437_s30 + $0x8] sm:$0xff] %vm219_vm0, %v643_v13  ;;  %v3620_v17 = vpack.c.bf16 %v643_v13, %v642_v14  ;;  %825 = vst.msk [vmem:[%s3437_s30] sm:$0xff] %vm219_vm0, %v642_v14  ;;  %v241_v13 = vld [vmem:[%s4438_s20 + $0x8] sm:$0xff]  ;;  %v2321_v14 = vld [vmem:[%s3432_s29] sm:$0xff]  ;;  %s4440_s29 = sld [smem:[#allocation7_spill]] }
  0xf9   :  { %v3624_v18 = vpop.permute.xlu1 %666  ;;  %v523_v8 = vsel %vm517_vm2, %v516_v2, 0.0 }
  0xfa   :  { %1858 = vperm.xlu1 %2968, %v1834_v15   ;;  %1720 = vperm.xlu0 %2967, %v1595_v16   ;;  %v524_v9 = vadd.f32 %v523_v8, %v3538_v0  ;;  %v385_v15 = vpack.c.bf16 %v241_v13, %v240_v10 }
  0xfc   :  { %2727 = vmatprep.mubr.msk.bf16.mxu1 %vm409_vm3, %v385_v15 }
  0xfd   :  { %v3628_v23 = vpop.permute.xlu1 %656 }
  0xfe   :  { %1967 = vperm.xlu1 %2968, %v1848_v20   ;;  %1870 = vperm.xlu0 %2967, %v1836_v21  }
  0xff   :  { %v931_v45 = vld [vmem:[%s3437_s30 + $0x8] sm:$0xff] }
 0x101   :  { %v3632_v27 = vpop.permute.xlu1 %734 }
 0x102   :  { %2101 = vperm.xlu1 %2968, %v2081_v24   ;;  %2095 = vperm.xlu0 %2967, %v2080_v25  }
 0x105   :  { %v3636_v30 = vpop.permute.xlu1 %288 }
 0x106   :  { %2128 = vperm.xlu1 %2968, %v2089_v28   ;;  %2123 = vperm.xlu0 %2967, %v2088_v29  }
 0x109   :  { %v3640_v34 = vpop.permute.xlu1 %610 }
 0x10a   :  { %2118 = vperm.xlu1 %2968, %v2087_v31   ;;  %2113 = vperm.xlu0 %2967, %v2086_v33  }
 0x10d   :  { %v3644_v39 = vpop.permute.xlu1 %744 }
 0x10e   :  { %2325 = vperm.xlu1 %2968, %v2310_v35   ;;  %2200 = vperm.xlu0 %2967, %v2091_v37  }
 0x111   :  { %v937_v41 = vpop.permute.xlu1 %936 }
 0x112   :  { %2331 = vperm.xlu0 %2967, %v2311_v40   ;;  %v949_v47 = vadd.f32 %v937_v41, %v931_v45  ;;  %v579_v45 = vld [vmem:[%s4439_s10 + $0x8] sm:$0xff] }
 0x115   :  { %v955_v48 = vpop.permute.xlu1 %954 }
 0x116   :  { %v3650_v51 = vmul.f32 %v955_v48, %v949_v47  ;;  %2351 = vperm.xlu0 %2967, %v2318_v46   ;;  %v581_v47 = vld [vmem:[%s4439_s10 + $0x18] sm:$0xff] }
 0x118   :  { %1175 = vst.msk [vmem:[%s3437_s30 + $0x8] sm:$0xff] %vm219_vm0, %v3650_v51 }
 0x119   :  { %v3656_v53 = vpop.permute.xlu1 %1010 }
 0x11a   :  { %2356 = vperm.xlu0 %2967, %v2319_v52   ;;  %v848_v52 = vand.u32 2147483647, %v3461_v11  ;;  %v1522_v11 = vand.u32 2147483647, %v3531_v58  ;;  %v3707_v58 = vpop.permute.xlu0 %661 }
 0x11c   :  { %2977 = vlog2.f32 %v848_v52 }
 0x11d   :  { %v3659_v56 = vpop.permute.xlu1 %1000 }
 0x11e   :  { %2341 = vperm.xlu0 %2967, %v2316_v55   ;;  %v847_v55 = vand.u32 2147483647, %v3464_v12  ;;  %v1523_v12 = vand.u32 2147483647, %v3598_v54 }
 0x11f   :  { %v1279_v1 = vld [vmem:[%s3437_s30 + $0x8] sm:$0xff] }
 0x120   :  { %2979 = vlog2.f32 %v847_v55 }
 0x121   :  { %v3662_v61 = vpop.permute.xlu1 %1088 }
 0x122   :  { %2346 = vperm.xlu0 %2967, %v2317_v26   ;;  %v1199_v26 = vand.u32 2147483647, %v3512_v42 }
 0x125   :  { %v1285_v63 = vpop.permute.xlu1 %1284 }
 0x126   :  { %v1297_v3 = vadd.f32 %v1285_v63, %v1279_v1  ;;  %v1521_v63 = vand.u32 2147483647, %v3528_v57 }
 0x129   :  { %v1303_v5 = vpop.permute.xlu1 %1302  ;;  %v2978_v42 = vpop.eup %2977 }
 0x12a   :  { %v3665_v6 = vmul.f32 %v1303_v5, %v1297_v3  ;;  %v854_v1 = vmul.f32 0.6931472, %v2978_v42 }
 0x12c   :  { %1499 = vst.msk [vmem:[%s3437_s30 + $0x8] sm:$0xff] %vm219_vm0, %v3665_v6 }
 0x12d   :  { %v2980_v32 = vpop.eup %2979 }
 0x12e   :  { %v852_v2 = vmul.f32 0.6931472, %v2980_v32 }
 0x130   :  { %v859_v8 = vsel %vm517_vm2, %v852_v2, 0.0 }
 0x132   :  { %525 = vadd.xlane.f32.xlu1 %v524_v9 }
 0x143   :  { %2423 = vperm.xlu1 %2968, %v2321_v14  }
 0x1b0   :  { %v2721_v16 = vpop.f32.mrf.mxu0 }
 0x1b1   :  { %v375_v21 = vadd.f32 %v2721_v16, %v3591_v50  ;;  %v242_v50 = vld [vmem:[%s4438_s20 + $0x10] sm:$0xff] }
 0x1b2   :  { %v366_v20 = vpop.f32.mrf.mxu0  ;;  %v386_v46 = vpack.c.bf16 %v243_v44, %v242_v50 }
 0x1b3   :  { %v367_v25 = vadd.f32 %v366_v20, %v3603_v60  ;;  %v383_v29 = vmax.f32 %v375_v21, 0.0  ;;  %v578_v60 = vld [vmem:[%s4439_s10] sm:$0xff]  ;;  %v3712_v21 = vpop.permute.xlu0 %651 }
 0x1b4   :  { %v2722_v24 = vpop.f32.mrf.mxu0 }
 0x1b5   :  { %v378_v0 = vadd.f32 %v2722_v24, %v3589_v49  ;;  %v381_v35 = vmax.f32 %v367_v25, 0.0  ;;  %v647_v49 = vpack.c.bf16 %v579_v45, %v578_v60 }
 0x1b6   :  { %v369_v28 = vpop.f32.mrf.mxu0 }
 0x1b7   :  { %v384_v31 = vmax.f32 %v378_v0, 0.0  ;;  %v370_v33 = vadd.f32 %v369_v28, %v3601_v59  ;;  %v580_v59 = vld [vmem:[%s4439_s10 + $0x10] sm:$0xff]  ;;  %v392_v45 = vpop.permute.xlu0 %391 }
 0x1b8   :  { %v648_v48 = vpack.c.bf16 %v581_v47, %v580_v59 }
 0x1b9   :  { %v382_v37 = vmax.f32 %v370_v33, 0.0  ;;  %v388_v40 = vpack.c.bf16 %v384_v31, %v383_v29 }
 0x1bb   :  { %v387_v41 = vpack.c.bf16 %v382_v37, %v381_v35  ;;  %2723 = vmatprep.subr.bf16.mxu1 %v388_v40 }
 0x1bc   :  { %2724 = vmatpush3.bf16.msra.mxu1 %v388_v40 }
 0x1bd   :  { %2725 = vmatprep.subr.bf16.mxu1 %v387_v41 }
 0x1c0   :  { %2726 = vmatpush3.bf16.msra.mxu1 %v387_v41 }
 0x1c1   :  { %2731 = vmatprep.subr.bf16.mxu1 %v3476_v19 }
 0x1c3   :  { %2728 = vmatmul.mubr.msk.bf16.vlgmr.msra.gmra.mxu1 %vm409_vm3, %v386_v46 }
 0x1c4   :  { %2732 = vmatpush3.bf16.msra.mxu1 %v3476_v19  ;;  %2737 = vmatprep.mubr.msk.bf16.mxu1 %vm325_vm1, %v647_v49  ;;  %v849_v19 = vand.u32 2147483647, %v3504_v36  ;;  %v1787_v36 = vand.u32 2147483647, %v3547_v7  ;;  %v860_v7 = vsel %vm517_vm2, %v854_v1, 0.0 }
 0x1c5   :  { %2733 = vmatprep.subr.bf16.mxu1 %v3482_v22  ;;  %v861_v13 = vadd.f32 %v860_v7, %v859_v8 }
 0x1c6   :  { %2981 = vlog2.f32 %v849_v19 }
 0x1c7   :  { %2983 = vlog2.f32 %v1199_v26  ;;  %v3721_v26 = vpop.permute.xlu0 %264 }
 0x1c8   :  { %2734 = vmatpush3.bf16.msra.mxu1 %v3482_v22  ;;  %v1200_v22 = vand.u32 2147483647, %v3515_v43  ;;  %v1788_v43 = vand.u32 2147483647, %v3612_v4 }
 0x1c9   :  { %2735 = vmatprep.subr.bf16.mxu1 %v3620_v17 }
 0x1ca   :  { %2985 = vlog2.f32 %v1200_v22 }
 0x1cb   :  { %2987 = vlog2.f32 %v850_v62 }
 0x1cc   :  { %2736 = vmatpush3.bf16.msra.mxu1 %v3620_v17  ;;  %v1201_v17 = vand.u32 2147483647, %v3581_v38 }
 0x1ce   :  { %2989 = vlog2.f32 %v1201_v17 }
 0x1cf   :  { %2738 = vmatmul.mubr.msk.bf16.vlgmr.msra.gmra.mxu1 %vm325_vm1, %v648_v48  ;;  %2991 = vlog2.f32 %v1521_v63  ;;  %v3725_v63 = vpop.permute.xlu0 %401 }
 0x1d0   :  { %2993 = vlog2.f32 %v1522_v11  ;;  %v586_v11 = vld [vmem:[%s4440_s29] sm:$0xff] }
 0x1d1   :  { %2995 = vlog2.f32 %v1523_v12  ;;  %v587_v12 = vld [vmem:[%s4440_s29 + $0x8] sm:$0xff] }
 0x1d2   :  { %2997 = vlog2.f32 %v1787_v36  ;;  %v728_v36 = vpack.c.bf16 %v587_v12, %v586_v11 }
 0x1d3   :  { %v2982_v38 = vpop.eup %2981  ;;  %2999 = vlog2.f32 %v1788_v43  ;;  %v3730_v42 = vpop.permute.xlu0 %634 }
 0x1d4   :  { %v2984_v57 = vpop.eup %2983  ;;  %v856_v54 = vmul.f32 0.6931472, %v2982_v38  ;;  %2745 = vmatprep.mubr.msk.bf16.mxu0 %vm409_vm3, %v728_v36 }
 0x1d5   :  { %v1203_v10 = vmul.f32 0.6931472, %v2984_v57 }
 0x1d6   :  { %v862_v16 = vsel %vm517_vm2, %v856_v54, 0.0 }
 0x1d7   :  { %v2986_v3 = vpop.eup %2985  ;;  %v863_v24 = vadd.f32 %v862_v16, %v861_v13  ;;  %v1208_v35 = vsel %vm517_vm2, %v1203_v10, 0.0  ;;  %v3732_v43 = vpop.permute.xlu0 %941 }
 0x1d8   :  { %v2988_v5 = vpop.eup %2987  ;;  %v1205_v14 = vmul.f32 0.6931472, %v2986_v3  ;;  %v3744_v3 = vpop.permute.xlu1 %1339 }
 0x1d9   :  { %v858_v15 = vmul.f32 0.6931472, %v2988_v5 }
 0x1da   :  { %v1209_v37 = vsel %vm517_vm2, %v1205_v14, 0.0 }
 0x1db   :  { %v2990_v9 = vpop.eup %2989  ;;  %v864_v0 = vsel %vm517_vm2, %v858_v15, 0.0  ;;  %v1210_v40 = vadd.f32 %v1209_v37, %v1208_v35  ;;  %v3734_v32 = vpop.permute.xlu0 %959 }
 0x1dc   :  { %v2992_v4 = vpop.eup %2991  ;;  %v1207_v25 = vmul.f32 0.6931472, %v2990_v9  ;;  %v865_v29 = vadd.f32 %v864_v0, %v863_v24  ;;  %v3748_v54 = vpop.permute.xlu1 %1329 }
 0x1dd   :  { %v2994_v20 = vpop.eup %2993  ;;  %v1525_v31 = vmul.f32 0.6931472, %v2992_v4 }
 0x1de   :  { %v2996_v28 = vpop.eup %2995  ;;  %v1527_v33 = vmul.f32 0.6931472, %v2994_v20  ;;  %866 = vadd.xlane.f32.xlu0 %v865_v29  ;;  %v1211_v44 = vsel %vm517_vm2, %v1207_v25, 0.0 }
 0x1df   :  { %v2998_v41 = vpop.eup %2997  ;;  %v1529_v50 = vmul.f32 0.6931472, %v2996_v28  ;;  %v1212_v46 = vadd.f32 %v1211_v44, %v1210_v40  ;;  %v1530_v49 = vsel %vm517_vm2, %v1525_v31, 0.0  ;;  %v3736_v38 = vpop.permute.xlu0 %1005 }
 0x1e0   :  { %v3000_v60 = vpop.eup %2999  ;;  %v1531_v59 = vsel %vm517_vm2, %v1527_v33, 0.0  ;;  %v1790_v48 = vmul.f32 0.6931472, %v2998_v41  ;;  %v3752_v7 = vpop.permute.xlu1 %1412 }
 0x1e1   :  { %v1532_v47 = vadd.f32 %v1531_v59, %v1530_v49  ;;  %v1792_v52 = vmul.f32 0.6931472, %v3000_v60  ;;  %v1533_v55 = vsel %vm517_vm2, %v1529_v50, 0.0 }
 0x1e2   :  { %1213 = vadd.xlane.f32.xlu0 %v1212_v46  ;;  %v1793_v22 = vsel %vm517_vm2, %v1790_v48, 0.0 }
 0x1e3   :  { %v1534_v19 = vadd.f32 %v1533_v55, %v1532_v47  ;;  %v1794_v62 = vsel %vm517_vm2, %v1792_v52, 0.0  ;;  %v3738_v1 = vpop.permute.xlu0 %995 }
 0x1e4   :  { %v1795_v17 = vadd.f32 %v1794_v62, %v1793_v22  ;;  %v3756_v10 = vpop.permute.xlu1 %1612 }
 0x1e6   :  { %1535 = vadd.xlane.f32.xlu0 %v1534_v19 }
 0x1e7   :  { %v3740_v2 = vpop.permute.xlu0 %1083 }
 0x1e8   :  { %v3760_v4 = vpop.permute.xlu1 %1644 }
 0x1e9   :  { %4441 = vst [vmem:[#allocation40_spill] sm:$0xff] %v3760_v4 }
 0x1ea   :  { %1796 = vadd.xlane.f32.xlu0 %v1795_v17 }
 0x1eb   :  { %v3742_v57 = vpop.permute.xlu0 %1289 }
 0x1ec   :  { %v3764_v15 = vpop.permute.xlu1 %1634 }
 0x1ed   :  { %4442 = vst [vmem:[#allocation41_spill] sm:$0xff] %v3764_v15 }
 0x1ef   :  { %v3746_v5 = vpop.permute.xlu0 %1307 }
 0x1f0   :  { %v3768_v20 = vpop.permute.xlu1 %1865 }
 0x1f1   :  { %4444 = vst [vmem:[#allocation43_spill] sm:$0xff] %v3768_v20 }
 0x1f3   :  { %v3750_v8 = vpop.permute.xlu0 %1334 }
 0x1f4   :  { %v3772_v25 = vpop.permute.xlu1 %1895 }
 0x1f5   :  { %4446 = vst [vmem:[#allocation45_spill] sm:$0xff] %v3772_v25 }
 0x1f7   :  { %v3754_v9 = vpop.permute.xlu0 %1324 }
 0x1f8   :  { %v3776_v28 = vpop.permute.xlu1 %1885 }
 0x1f9   :  { %4448 = vst [vmem:[#allocation47_spill] sm:$0xff] %v3776_v28 }
 0x1fb   :  { %v3758_v13 = vpop.permute.xlu0 %1407 }
 0x1fc   :  { %v3780_v31 = vpop.permute.xlu1 %739 }
 0x1ff   :  { %v3762_v14 = vpop.permute.xlu0 %1600 }
 0x200   :  { %v3786_v41 = vpop.permute.xlu1 %293 }
 0x203   :  { %v3766_v16 = vpop.permute.xlu0 %1639 }
 0x204   :  { %4443 = vst [vmem:[#allocation42_spill] sm:$0xff] %v3766_v16  ;;  %v3794_v52 = vpop.permute.xlu1 %615 }
 0x207   :  { %v3770_v24 = vpop.permute.xlu0 %1629 }
 0x208   :  { %4445 = vst [vmem:[#allocation44_spill] sm:$0xff] %v3770_v24  ;;  %v3801_v36 = vpop.permute.xlu1 %749 }
 0x20b   :  { %v3774_v0 = vpop.permute.xlu0 %1853 }
 0x20c   :  { %4447 = vst [vmem:[#allocation46_spill] sm:$0xff] %v3774_v0 }
 0x20f   :  { %v3778_v29 = vpop.permute.xlu0 %1890 }
 0x210   :  { %4449 = vst [vmem:[#allocation48_spill] sm:$0xff] %v3778_v29 }
 0x213   :  { %v3784_v35 = vpop.permute.xlu0 %1880 }
 0x214   :  { %4450 = vst [vmem:[#allocation49_spill] sm:$0xff] %v3784_v35 }
 0x217   :  { %v397_v46 = vpop.permute.xlu0 %396 }
 0x283   :  { %v3782_v33 = vpop.f32.mrf.mxu1 }
 0x285   :  { %v450_v37 = vpop.f32.mrf.mxu1 }
 0x286   :  { %v451_v40 = vadd.f32 %v450_v37, %v392_v45 }
 0x287   :  { %v3788_v50 = vpop.f32.mrf.mxu1 }
 0x288   :  { %v3790_v44 = vadd.f32 2.0, %v451_v40 }
 0x289   :  { %v453_v60 = vpop.f32.mrf.mxu1 }
 0x28a   :  { %v2609_v49 = vmul.f32 -1.442695, %v3790_v44  ;;  %v489_v59 = vand.u32 2147483647, %v3790_v44  ;;  %v454_v47 = vadd.f32 %v453_v60, %v397_v46 }
 0x28c   :  { %3001 = vpow2.f32 %v2609_v49  ;;  %v491_v48 = vsub.f32 0.0, %v489_v59  ;;  %v3796_v55 = vadd.f32 2.0, %v454_v47 }
 0x28e   :  { %v493_v45 = vmul.f32 1.442695, %v491_v48  ;;  %v2610_v19 = vmul.f32 -1.442695, %v3796_v55  ;;  %v490_v22 = vand.u32 2147483647, %v3796_v55 }
 0x28f   :  { %v2739_v62 = vpop.f32.mrf.mxu1 }
 0x290   :  { %3003 = vpow2.f32 %v493_v45  ;;  %v492_v17 = vsub.f32 0.0, %v490_v22  ;;  %v718_v12 = vadd.f32 %v2739_v62, %v3707_v58  ;;  %v3806_v62 = vpop.permute.xlu1 %964 }
 0x291   :  { %3005 = vpow2.f32 %v2610_v19  ;;  %v709_v11 = vpop.f32.mrf.mxu1 }
 0x292   :  { %v495_v37 = vmul.f32 1.442695, %v492_v17  ;;  %v710_v60 = vadd.f32 %v709_v11, %v3712_v21  ;;  %v726_v59 = vmax.f32 %v718_v12, 0.0  ;;  %v588_v21 = vld [vmem:[%s4440_s29 + $0x10] sm:$0xff] }
 0x293   :  { %v2740_v40 = vpop.f32.mrf.mxu1 }
 0x294   :  { %v721_v46 = vadd.f32 %v2740_v40, %v3624_v18  ;;  %3007 = vpow2.f32 %v495_v37  ;;  %v724_v45 = vmax.f32 %v710_v60, 0.0  ;;  %v589_v18 = vld [vmem:[%s4440_s29 + $0x18] sm:$0xff]  ;;  %v250_v40 = vld [vmem:[%s3437_s30 + $0x10] sm:$0xff]  ;;  %v3811_v60 = vpop.permute.xlu1 %1715 }
 0x295   :  { %v712_v49 = vpop.f32.mrf.mxu1  ;;  %v729_v37 = vpack.c.bf16 %v589_v18, %v588_v21  ;;  %4451 = vst [vmem:[#allocation50_spill] sm:$0xff] %v3811_v60 }
 0x296   :  { %v727_v47 = vmax.f32 %v721_v46, 0.0  ;;  %v713_v48 = vadd.f32 %v712_v49, %v3628_v23  ;;  %v270_v49 = vpop.permute.xlu0 %269 }
 0x298   :  { %v731_v19 = vpack.c.bf16 %v727_v47, %v726_v59  ;;  %v725_v58 = vmax.f32 %v713_v48, 0.0  ;;  %v274_v47 = vadd.f32 %v3721_v26, %v250_v40 }
 0x299   :  { %v3002_v22 = vpop.eup %3001 }
 0x29a   :  { %v473_v17 = vadd.f32 1.0, %v3002_v22  ;;  %v730_v28 = vpack.c.bf16 %v725_v58, %v724_v45  ;;  %2741 = vmatprep.subr.bf16.mxu0 %v731_v19  ;;  %v251_v45 = vld [vmem:[%s3437_s30 + $0x18] sm:$0xff]  ;;  %v3818_v58 = vpop.permute.xlu1 %1312  ;;  %v298_v22 = vmul.f32 %v3636_v30, %v274_v47  ;;  %v487_v30 = vmin.f32 %v3790_v44, 0.0 }
 0x29b   :  { %2742 = vmatpush3.bf16.msra.mxu0 %v731_v19  ;;  %v459_v19 = vadd.f32 %v3782_v33, %v3725_v63 }
 0x29c   :  { %3009 = vrcp.f32 %v473_v17  ;;  %2743 = vmatprep.subr.bf16.mxu0 %v730_v28  ;;  %v407_v17 = vpop.permute.xlu0 %406 }
 0x29d   :  { %v3004_v11 = vpop.eup %3003  ;;  %v479_v21 = vadd.f32 %v459_v19, %v298_v22  ;;  %v462_v26 = vadd.f32 %v3788_v50, %v407_v17 }
 0x29e   :  { %v3006_v12 = vpop.eup %3005  ;;  %v497_v23 = vadd.f32 1.0, %v3004_v11 }
 0x29f   :  { %v474_v46 = vadd.f32 1.0, %v3006_v12  ;;  %2744 = vmatpush3.bf16.msra.mxu0 %v730_v28  ;;  %v275_v28 = vadd.f32 %v270_v49, %v251_v45 }
 0x2a0   :  { %3011 = vlog2.f32 %v497_v23  ;;  %v3827_v33 = vpop.permute.xlu0 %639 }
 0x2a1   :  { %3013 = vrcp.f32 %v474_v46  ;;  %v3008_v59 = vpop.eup %3007  ;;  %v299_v12 = vmul.f32 %v3786_v41, %v275_v28 }
 0x2a2   :  { %2746 = vmatmul.mubr.msk.bf16.vlgmr.msra.gmra.mxu0 %vm409_vm3, %v729_v37  ;;  %v498_v48 = vadd.f32 1.0, %v3008_v59  ;;  %v3823_v37 = vpop.permute.xlu1 %1962 }
 0x2a3   :  { %4452 = vst [vmem:[#allocation51_spill] sm:$0xff] %v3823_v37  ;;  %v480_v23 = vadd.f32 %v462_v26, %v299_v12  ;;  %v917_v37 = vld [vmem:[%s4473_s15] sm:$0xff] }
 0x2a4   :  { %3015 = vlog2.f32 %v498_v48  ;;  %v3835_v41 = vpop.permute.xlu0 %946  ;;  %v488_v48 = vmin.f32 %v3796_v55, 0.0 }
 0x2a6   :  { %v3830_v47 = vpop.permute.xlu1 %1617 }
 0x2a7   :  { %4453 = vst [vmem:[#allocation52_spill] sm:$0xff] %v3830_v47 }
 0x2a8   :  { %v3841_v44 = vpop.permute.xlu0 %1093 }
 0x2a9   :  { %v3010_v18 = vpop.eup %3009 }
 0x2aa   :  { %v481_v11 = vmul.f32 %v3010_v18, %v479_v21  ;;  %v3838_v22 = vpop.permute.xlu1 %1858 }
 0x2ab   :  { %4454 = vst [vmem:[#allocation53_spill] sm:$0xff] %v3838_v22 }
 0x2ac   :  { %485 = vst.msk [vmem:[%s3437_s30 + $0x10] sm:$0xff] %vm219_vm0, %v481_v11  ;;  %v3845_v17 = vpop.permute.xlu0 %1294 }
 0x2ad   :  { %v3012_v63 = vpop.eup %3011 }
 0x2ae   :  { %v3014_v40 = vpop.eup %3013  ;;  %v500_v46 = vmul.f32 0.6931472, %v3012_v63  ;;  %v3843_v28 = vpop.permute.xlu1 %1967 }
 0x2af   :  { %v482_v49 = vmul.f32 %v3014_v40, %v480_v23  ;;  %4455 = vst [vmem:[#allocation54_spill] sm:$0xff] %v3843_v28 }
 0x2b0   :  { %v503_v59 = vsub.f32 %v487_v30, %v500_v46  ;;  %v3849_v18 = vpop.permute.xlu0 %1417 }
 0x2b1   :  { %486 = vst.msk [vmem:[%s3437_s30 + $0x18] sm:$0xff] %vm219_vm0, %v482_v49  ;;  %v3016_v50 = vpop.eup %3015 }
 0x2b2   :  { %551 = vrot.lane.b32.xlu1 %v503_v59, %s3175_s11  ;;  %v502_v45 = vmul.f32 0.6931472, %v3016_v50  ;;  %v3847_v21 = vpop.permute.xlu1 %2101  ;;  %v536_v23 = vsel %vm535_vm4, %v503_v59, 0.0 }
 0x2b3   :  { %4456 = vst [vmem:[#allocation55_spill] sm:$0xff] %v3847_v21 }
 0x2b4   :  { %v504_v19 = vsub.f32 %v488_v48, %v502_v45  ;;  %v3853_v11 = vpop.permute.xlu0 %1605 }
 0x2b5   :  { %4458 = vst [vmem:[#allocation57_spill] sm:$0xff] %v3853_v11 }
 0x2b6   :  { %553 = vrot.lane.b32.xlu0 %v504_v19, %s3175_s11  ;;  %v3851_v26 = vpop.permute.xlu1 %2128  ;;  %v537_v63 = vsel %vm535_vm4, %v504_v19, 0.0 }
 0x2b7   :  { %4457 = vst [vmem:[#allocation56_spill] sm:$0xff] %v3851_v26  ;;  %v538_v40 = vadd.f32 %v537_v63, %v536_v23 }
 0x2b8   :  { %v3857_v12 = vpop.permute.xlu0 %1720 }
 0x2b9   :  { %4460 = vst [vmem:[#allocation59_spill] sm:$0xff] %v3857_v12 }
 0x2ba   :  { %v3855_v55 = vpop.permute.xlu1 %2118 }
 0x2bb   :  { %4459 = vst [vmem:[#allocation58_spill] sm:$0xff] %v3855_v55 }
 0x2bc   :  { %v3863_v46 = vpop.permute.xlu0 %1870 }
 0x2bd   :  { %4462 = vst [vmem:[#allocation61_spill] sm:$0xff] %v3863_v46 }
 0x2be   :  { %v3861_v30 = vpop.permute.xlu1 %2325 }
 0x2bf   :  { %4461 = vst [vmem:[#allocation60_spill] sm:$0xff] %v3861_v30 }
 0x2c0   :  { %v3865_v48 = vpop.permute.xlu0 %2095 }
 0x2c1   :  { %4463 = vst [vmem:[#allocation62_spill] sm:$0xff] %v3865_v48 }
 0x2c2   :  { %v526_v49 = vpop.xlane.xlu1 %525 }
 0x2c3   :  { %v527_v50 = vrot.slane %v526_v49, 4 }
 0x2c4   :  { %v3867_v26 = vpop.permute.xlu0 %2123 }
 0x2c5   :  { %v528_v45 = vadd.f32 %v527_v50, %v526_v49  ;;  %4464 = vst [vmem:[#allocation63_spill] sm:$0xff] %v3867_v26  ;;  %v3882_v50 = vld [vmem:[%s3192_s9 + $0x10] sm:$0xff] }
 0x2c7   :  { %v529_v55 = vrot.slane %v528_v45, 2 }
 0x2c8   :  { %v3869_v59 = vpop.permute.xlu0 %2113 }
 0x2c9   :  { %v530_v21 = vadd.f32 %v529_v55, %v528_v45  ;;  %4465 = vst [vmem:[#allocation64_spill] sm:$0xff] %v3869_v59  ;;  %v978_v55 = vrot.slane %v3882_v50, 4  ;;  %v3888_v59 = vld [vmem:[%s3192_s9 + $0x18] sm:$0xff] }
 0x2cb   :  { %v531_v19 = vrot.slane %v530_v21, 1 }
 0x2cc   :  { %v3871_v23 = vpop.permute.xlu0 %2200 }
 0x2cd   :  { %v532_v63 = vadd.f32 %v531_v19, %v530_v21  ;;  %4466 = vst [vmem:[#allocation65_spill] sm:$0xff] %v3871_v23  ;;  %v3891_v21 = vrot.slane %v3888_v59, 4  ;;  %v3894_v19 = vld [vmem:[%s3192_s9] sm:$0xff] }
 0x2cf   :  { %2863 = vpush %v532_v63  ;;  %4472 = vst [vmem:[#allocation71_spill] sm:$0xff] %v3891_v21  ;;  %v3897_v63 = vrot.slane %v3894_v19, 4 }
 0x2d5   :  { %539 = vadd.xlane.f32.xlu0 %v538_v40  ;;  %v3873_v40 = vpop.permute.xlu0 %2331 }
 0x2d6   :  { %4467 = vst [vmem:[#allocation66_spill] sm:$0xff] %v3873_v40 }
 0x2d9   :  { %v3875_v30 = vpop.permute.xlu0 %2351 }
 0x2da   :  { %4468 = vst [vmem:[#allocation67_spill] sm:$0xff] %v3875_v30 }
 0x2dd   :  { %v3877_v48 = vpop.permute.xlu0 %2356 }
 0x2de   :  { %4469 = vst [vmem:[#allocation68_spill] sm:$0xff] %v3877_v48  ;;  %v3900_v48 = vld [vmem:[%s3192_s9 + $0x8] sm:$0xff]  ;;  %s4479_s9 = sld [smem:[#allocation9_spill]] }
 0x2e1   :  { %v3879_v49 = vpop.permute.xlu0 %2341 }
 0x2e2   :  { %4470 = vst [vmem:[#allocation69_spill] sm:$0xff] %v3879_v49  ;;  %v976_v49 = vrot.slane %v3900_v48, 4 }
 0x2e4   :  { %v3922_v26 = vsel %vm974_vm5, %v3897_v63, %v976_v49  ;;  %v3925_v46 = vsel %vm974_vm5, %v976_v49, %v978_v55  ;;  %v3940_v49 = vpop.permute.xlu1 %2423 }
 0x2e5   :  { %v3885_v45 = vpop.permute.xlu0 %2346  ;;  %4475 = vst [vmem:[#allocation73_spill] sm:$0xff] %v3922_v26  ;;  %4476 = vst [vmem:[#allocation74_spill] sm:$0xff] %v3925_v46  ;;  %v3929_v28 = vpack.c.bf16 %v3925_v46, %v3922_v26 }
 0x2e6   :  { %4471 = vst [vmem:[#allocation70_spill] sm:$0xff] %v3885_v45  ;;  %v3905_v45 = vsel %vm974_vm5, %v978_v55, %v3891_v21  ;;  %4477 = vst [vmem:[#allocation75_spill] sm:$0xff] %v3940_v49 }
 0x2e7   :  { %4474 = vst [vmem:[#allocation72_spill] sm:$0xff] %v3905_v45  ;;  %v3911_v40 = vpack.c.bf16 %v3891_v21, %v3905_v45  ;;  %v918_v45 = vld [vmem:[%s4473_s15 + $0x8] sm:$0xff] }
 0x2e8   :  { %v991_v21 = vpack.c.bf16 %v918_v45, %v917_v37 }
 0x2e9   :  { %v3907_v30 = vpop.xlane.xlu0 %866  ;;  %2857 = vmatprep.subr.msk.bf16.mxu0 %vm1020_vm6, %v3911_v40  ;;  %v3917_v23 = vsel %vm1020_vm6, %v3911_v40, 0 }
 0x2ea   :  { %2750 = vmatpush3.bf16.msra.mxu0 %v3917_v23  ;;  %2755 = vmatprep.mubr.msk.bf16.mxu0 %vm1013_vm7, %v991_v21 }
 0x2eb   :  { %2751 = vmatprep.subr.bf16.mxu0 %v3929_v28 }
 0x2ed   :  { %v3931_v22 = vpop.xlane.xlu0 %1213 }
 0x2ee   :  { %2752 = vmatpush3.bf16.msra.mxu0 %v3929_v28 }
 0x2f1   :  { %v3937_v47 = vpop.xlane.xlu0 %1535 }
 0x2f5   :  { %v3942_v55 = vpop.xlane.xlu0 %1796 }
 0x2f6   :  { %4478 = vst [vmem:[#allocation76_spill] sm:$0xff] %v3942_v55 }
 0x300   :  { %s3999_s18 = spop %2863 }
 0x324   :  { %v552_v26 = vpop.permute.xlu1 %551 }
 0x325   :  { %v557_v12 = vsel %vm535_vm4, %v552_v26, 0.0 }
 0x328   :  { %v554_v46 = vpop.permute.xlu0 %553 }
 0x329   :  { %v558_v11 = vsel %vm535_vm4, %v554_v46, 0.0 }
 0x32a   :  { %v559_v35 = vadd.f32 %v558_v11, %v557_v12 }
 0x32c   :  { %560 = vadd.xlane.f32.xlu1 %v559_v35 }
 0x35e   :  { %v540_v25 = vpop.xlane.xlu0 %539 }
 0x35f   :  { %v541_v29 = vrot.slane %v540_v25, 4 }
 0x361   :  { %v542_v37 = vadd.f32 %v541_v29, %v540_v25 }
 0x362   :  { %v2747_v45 = vpop.f32.mrf.mxu0 }
 0x363   :  { %v543_v60 = vrot.slane %v542_v37, 2 }
 0x364   :  { %v792_v15 = vpop.f32.mrf.mxu0 }
 0x365   :  { %v793_v21 = vadd.f32 %v792_v15, %v3632_v27  ;;  %v544_v49 = vadd.f32 %v543_v60, %v542_v37 }
 0x366   :  { %v2748_v24 = vpop.f32.mrf.mxu0 }
 0x367   :  { %v807_v4 = vadd.f32 2.0, %v793_v21  ;;  %v545_v16 = vrot.slane %v544_v49, 1 }
 0x368   :  { %v795_v55 = vpop.f32.mrf.mxu0 }
 0x369   :  { %v2615_v20 = vmul.f32 -1.442695, %v807_v4  ;;  %v831_v0 = vand.u32 2147483647, %v807_v4  ;;  %v796_v26 = vadd.f32 %v795_v55, %v3780_v31  ;;  %v546_v46 = vadd.f32 %v545_v16, %v544_v49 }
 0x36b   :  { %3017 = vpow2.f32 %v2615_v20  ;;  %v833_v35 = vsub.f32 0.0, %v831_v0  ;;  %v808_v11 = vadd.f32 2.0, %v796_v26  ;;  %2865 = vpush %v546_v46  ;;  %v596_v20 = vld [vmem:[%s3437_s30 + $0x10] sm:$0xff]  ;;  %v801_v46 = vadd.f32 %v2747_v45, %v3644_v39 }
 0x36c   :  { %v620_v55 = vadd.f32 %v3640_v34, %v596_v20  ;;  %v829_v45 = vmin.f32 %v807_v4, 0.0 }
 0x36d   :  { %v835_v25 = vmul.f32 1.442695, %v833_v35  ;;  %v2616_v29 = vmul.f32 -1.442695, %v808_v11  ;;  %v832_v12 = vand.u32 2147483647, %v808_v11 }
 0x36e   :  { %v597_v35 = vld [vmem:[%s3437_s30 + $0x18] sm:$0xff] }
 0x36f   :  { %3019 = vpow2.f32 %v835_v25  ;;  %v834_v27 = vsub.f32 0.0, %v832_v12  ;;  %v644_v25 = vmul.f32 %v3730_v42, %v620_v55  ;;  %v919_v55 = vld [vmem:[%s4473_s15 + $0x10] sm:$0xff] }
 0x370   :  { %3021 = vpow2.f32 %v2616_v29  ;;  %v621_v29 = vadd.f32 %v3794_v52, %v597_v35 }
 0x371   :  { %v837_v15 = vmul.f32 1.442695, %v834_v27  ;;  %v821_v12 = vadd.f32 %v801_v46, %v644_v25 }
 0x373   :  { %3023 = vpow2.f32 %v837_v15  ;;  %v804_v15 = vadd.f32 %v2748_v24, %v3801_v36  ;;  %v830_v24 = vmin.f32 %v808_v11, 0.0  ;;  %v920_v11 = vld [vmem:[%s4473_s15 + $0x18] sm:$0xff] }
 0x378   :  { %v3018_v60 = vpop.eup %3017 }
 0x379   :  { %v815_v37 = vadd.f32 1.0, %v3018_v60 }
 0x37b   :  { %3025 = vrcp.f32 %v815_v37  ;;  %v645_v37 = vmul.f32 %v3827_v33, %v621_v29 }
 0x37c   :  { %v3020_v21 = vpop.eup %3019 }
 0x37d   :  { %v3022_v31 = vpop.eup %3021  ;;  %v839_v16 = vadd.f32 1.0, %v3020_v21  ;;  %v822_v21 = vadd.f32 %v804_v15, %v645_v37 }
 0x37e   :  { %v816_v0 = vadd.f32 1.0, %v3022_v31 }
 0x37f   :  { %3027 = vlog2.f32 %v839_v16 }
 0x380   :  { %3029 = vrcp.f32 %v816_v0  ;;  %v3024_v49 = vpop.eup %3023 }
 0x381   :  { %v840_v26 = vadd.f32 1.0, %v3024_v49 }
 0x383   :  { %3031 = vlog2.f32 %v840_v26 }
 0x388   :  { %v3026_v27 = vpop.eup %3025 }
 0x389   :  { %v823_v60 = vmul.f32 %v3026_v27, %v821_v12 }
 0x38b   :  { %827 = vst.msk [vmem:[%s3437_s30 + $0x10] sm:$0xff] %vm219_vm0, %v823_v60 }
 0x38c   :  { %v3028_v34 = vpop.eup %3027 }
 0x38d   :  { %v3030_v39 = vpop.eup %3029  ;;  %v842_v31 = vmul.f32 0.6931472, %v3028_v34 }
 0x38e   :  { %v824_v42 = vmul.f32 %v3030_v39, %v822_v21 }
 0x38f   :  { %v845_v52 = vsub.f32 %v829_v45, %v842_v31 }
 0x390   :  { %828 = vst.msk [vmem:[%s3437_s30 + $0x18] sm:$0xff] %vm219_vm0, %v824_v42  ;;  %v3032_v16 = vpop.eup %3031  ;;  %v926_v42 = vld [vmem:[%s4479_s9 + $0x8] sm:$0xff] }
 0x391   :  { %892 = vrot.lane.b32.xlu1 %v845_v52, %s3175_s11  ;;  %v844_v36 = vmul.f32 0.6931472, %v3032_v16  ;;  %v876_v25 = vsel %vm535_vm4, %v845_v52, 0.0 }
 0x392   :  { %v932_v33 = vld [vmem:[%s3437_s30 + $0x10] sm:$0xff] }
 0x393   :  { %v950_v20 = vadd.f32 %v3732_v43, %v932_v33  ;;  %v846_v0 = vsub.f32 %v830_v24, %v844_v36  ;;  %v992_v43 = vpack.c.bf16 %v920_v11, %v919_v55 }
 0x395   :  { %v3964_v4 = vmul.f32 %v3734_v32, %v950_v20  ;;  %894 = vrot.lane.b32.xlu0 %v846_v0, %s3175_s11  ;;  %v868_v32 = vrot.slane %v3907_v30, 4  ;;  %v877_v35 = vsel %vm535_vm4, %v846_v0, 0.0 }
 0x396   :  { %v878_v29 = vadd.f32 %v877_v35, %v876_v25 }
 0x397   :  { %v987_v49 = vsel %vm974_vm5, %v3964_v4, %v3897_v63  ;;  %1177 = vst.msk [vmem:[%s3437_s30 + $0x10] sm:$0xf] %vm1176_vm8, %v3964_v4  ;;  %v869_v46 = vadd.f32 %v868_v32, %v3907_v30  ;;  %v925_v30 = vld [vmem:[%s4479_s9] sm:$0xff] }
 0x398   :  { %v988_v26 = vpack.c.bf16 %v987_v49, %v3650_v51  ;;  %v1077_v52 = vpack.c.bf16 %v926_v42, %v925_v30 }
 0x399   :  { %v870_v12 = vrot.slane %v869_v46, 2 }
 0x39a   :  { %2753 = vmatprep.subr.bf16.mxu0 %v988_v26  ;;  %2763 = vmatprep.mubr.msk.bf16.mxu1 %vm409_vm3, %v1077_v52 }
 0x39b   :  { %2754 = vmatpush3.bf16.msra.mxu0 %v988_v26  ;;  %v871_v15 = vadd.f32 %v870_v12, %v869_v46 }
 0x39c   :  { %s4001_s0 = spop %2865 }
 0x39d   :  { %v872_v34 = vrot.slane %v871_v15, 1 }
 0x39e   :  { %2756 = vmatmul.mubr.msk.bf16.vlgmr.msra.gmra.mxu0 %vm1013_vm7, %v992_v43 }
 0x39f   :  { %v873_v45 = vadd.f32 %v872_v34, %v871_v15 }
 0x3b5   :  { %879 = vadd.xlane.f32.xlu1 %v878_v29  ;;  %v561_v27 = vpop.xlane.xlu1 %560 }
 0x3b6   :  { %v562_v51 = vrot.slane %v561_v27, 4 }
 0x3b8   :  { %v563_v60 = vadd.f32 %v562_v51, %v561_v27 }
 0x3ba   :  { %v564_v37 = vrot.slane %v563_v60, 2 }
 0x3bc   :  { %v565_v21 = vadd.f32 %v564_v37, %v563_v60 }
 0x3be   :  { %v566_v39 = vrot.slane %v565_v21, 1 }
 0x3c0   :  { %v567_v31 = vadd.f32 %v566_v39, %v565_v21 }
 0x3c2   :  { %2867 = vpush %v567_v31  ;;  %v927_v31 = vld [vmem:[%s4479_s9 + $0x10] sm:$0xff]  ;;  %s4494_s9 = sld [smem:[#allocation27_spill]] }
 0x3c3   :  { %2869 = vpush %v873_v45  ;;  %v1078_v30 = vpack.c.bf16 %v927_v31, %v927_v31 }
 0x3f3   :  { %s2868_s25 = spop %2867 }
 0x3f4   :  { %s569_s24 = sadd.f32 %s2868_s25, %s3999_s18  ;;  %s4004_s22 = spop %2869 }
 0x3f6   :  { %s4007_s4 = sadd.f32 %s4004_s22, %s569_s24 }
 0x403   :  { %v893_v16 = vpop.permute.xlu1 %892 }
 0x404   :  { %v898_v36 = vsel %vm535_vm4, %v893_v16, 0.0 }
 0x407   :  { %v895_v24 = vpop.permute.xlu0 %894 }
 0x408   :  { %v899_v33 = vsel %vm535_vm4, %v895_v24, 0.0 }
 0x409   :  { %v900_v20 = vadd.f32 %v899_v33, %v898_v36 }
 0x40b   :  { %901 = vadd.xlane.f32.xlu1 %v900_v20 }
 0x43e   :  { %v880_v0 = vpop.xlane.xlu1 %879 }
 0x43f   :  { %v881_v49 = vrot.slane %v880_v0, 4 }
 0x441   :  { %v882_v55 = vadd.f32 %v881_v49, %v880_v0 }
 0x443   :  { %v883_v11 = vrot.slane %v882_v55, 2 }
 0x445   :  { %v884_v26 = vadd.f32 %v883_v11, %v882_v55 }
 0x447   :  { %v885_v43 = vrot.slane %v884_v26, 1 }
 0x449   :  { %v886_v32 = vadd.f32 %v885_v43, %v884_v26 }
 0x44b   :  { %2871 = vpush %v886_v32 }
 0x45e   :  { %v2757_v46 = vpop.f32.mrf.mxu0 }
 0x45f   :  { %v1067_v25 = vadd.f32 %v2757_v46, %v3736_v38 }
 0x460   :  { %v1058_v35 = vpop.f32.mrf.mxu0 }
 0x461   :  { %v1059_v12 = vadd.f32 %v1058_v35, %v3738_v1  ;;  %v1075_v15 = vmax.f32 %v1067_v25, 0.0 }
 0x462   :  { %v2758_v29 = vpop.f32.mrf.mxu0 }
 0x463   :  { %v1070_v27 = vadd.f32 %v2758_v29, %v3656_v53  ;;  %v1073_v34 = vmax.f32 %v1059_v12, 0.0  ;;  %v1215_v53 = vrot.slane %v3931_v22, 4 }
 0x464   :  { %v1061_v51 = vpop.f32.mrf.mxu0 }
 0x465   :  { %v1076_v60 = vmax.f32 %v1070_v27, 0.0  ;;  %v1062_v37 = vadd.f32 %v1061_v51, %v3659_v56  ;;  %v1216_v56 = vadd.f32 %v1215_v53, %v3931_v22  ;;  %v1265_v22 = vld [vmem:[%s4480_s16] sm:$0xff]  ;;  %v933_v53 = vld [vmem:[%s3437_s30 + $0x18] sm:$0xff] }
 0x467   :  { %v1080_v21 = vpack.c.bf16 %v1076_v60, %v1075_v15  ;;  %v1074_v39 = vmax.f32 %v1062_v37, 0.0  ;;  %v1217_v38 = vrot.slane %v1216_v56, 2 }
 0x469   :  { %v1079_v45 = vpack.c.bf16 %v1074_v39, %v1073_v34  ;;  %2759 = vmatprep.subr.bf16.mxu1 %v1080_v21  ;;  %v1218_v52 = vadd.f32 %v1217_v38, %v1216_v56  ;;  %v951_v38 = vadd.f32 %v3835_v41, %v933_v53 }
 0x46a   :  { %2760 = vmatpush3.bf16.msra.mxu1 %v1080_v21 }
 0x46b   :  { %2761 = vmatprep.subr.bf16.mxu1 %v1079_v45  ;;  %v1219_v36 = vrot.slane %v1218_v52, 1 }
 0x46e   :  { %2762 = vmatpush3.bf16.msra.mxu1 %v1079_v45 }
 0x46f   :  { %2858 = vmatprep.subr.msk.bf16.mxu1 %vm1020_vm6, %v3911_v40 }
 0x471   :  { %2764 = vmatmul.mubr.msk.bf16.vlgmr.msra.gmra.mxu1 %vm409_vm3, %v1078_v30 }
 0x472   :  { %2768 = vmatpush3.bf16.msra.mxu1 %v3917_v23  ;;  %v1220_v23 = vadd.f32 %v1219_v36, %v1218_v52 }
 0x473   :  { %2769 = vmatprep.subr.bf16.mxu1 %v3929_v28 }
 0x476   :  { %2770 = vmatpush3.bf16.msra.mxu1 %v3929_v28  ;;  %v1266_v28 = vld [vmem:[%s4480_s16 + $0x8] sm:$0xff] }
 0x477   :  { %v1320_v0 = vpack.c.bf16 %v1266_v28, %v1265_v22 }
 0x479   :  { %2773 = vmatprep.mubr.msk.bf16.mxu1 %vm1013_vm7, %v1320_v0 }
 0x47c   :  { %s4009_s23 = spop %2871 }
 0x494   :  { %v902_v1 = vpop.xlane.xlu1 %901 }
 0x495   :  { %v903_v42 = vrot.slane %v902_v1, 4 }
 0x497   :  { %v904_v16 = vadd.f32 %v903_v42, %v902_v1 }
 0x499   :  { %v905_v24 = vrot.slane %v904_v16, 2 }
 0x49b   :  { %v906_v40 = vadd.f32 %v905_v24, %v904_v16 }
 0x49d   :  { %v907_v33 = vrot.slane %v906_v40, 1 }
 0x49f   :  { %v908_v20 = vadd.f32 %v907_v33, %v906_v40  ;;  %v969_v40 = vmul.f32 %v3806_v62, %v951_v38 }
 0x4a1   :  { %2873 = vpush %v908_v20 }
 0x4a2   :  { %2875 = vpush %v1220_v23 }
 0x4d2   :  { %s4011_s26 = spop %2873 }
 0x4d3   :  { %s910_s28 = sadd.f32 %s4011_s26, %s4007_s4  ;;  %s4062_s5 = spop %2875 }
 0x4d5   :  { %s4068_s13 = sadd.f32 %s4062_s5, %s910_s28 }
 0x4d6   :  { %s4512_s28 = sld [smem:[#allocation33_spill]] }
 0x531   :  { %v2765_v49 = vpop.f32.mrf.mxu1 }
 0x532   :  { %v1145_v52 = vadd.f32 %v2765_v49, %v3841_v44 }
 0x533   :  { %v1136_v55 = vpop.f32.mrf.mxu1 }
 0x534   :  { %v1137_v11 = vadd.f32 %v1136_v55, %v3740_v2  ;;  %v1165_v41 = vadd.f32 %v1145_v52, %v969_v40 }
 0x535   :  { %v2766_v26 = vpop.f32.mrf.mxu1 }
 0x536   :  { %v1150_v43 = vadd.f32 2.0, %v1137_v11 }
 0x537   :  { %v1139_v32 = vpop.f32.mrf.mxu1 }
 0x538   :  { %v2621_v46 = vmul.f32 -1.442695, %v1150_v43  ;;  %v1183_v35 = vand.u32 2147483647, %v1150_v43  ;;  %v1140_v25 = vadd.f32 %v1139_v32, %v3662_v61  ;;  %v1181_v33 = vmin.f32 %v1150_v43, 0.0  ;;  %v1267_v32 = vld [vmem:[%s4480_s16 + $0x10] sm:$0xff] }
 0x53a   :  { %3033 = vpow2.f32 %v2621_v46  ;;  %v1185_v29 = vsub.f32 0.0, %v1183_v35  ;;  %v1151_v12 = vadd.f32 2.0, %v1140_v25  ;;  %v1164_v1 = vadd.f32 %v1140_v25, %v3964_v4  ;;  %v1268_v46 = vld [vmem:[%s4480_s16 + $0x18] sm:$0xff]  ;;  %s4501_s16 = sld [smem:[#allocation31_spill]] }
 0x53c   :  { %v1187_v27 = vmul.f32 1.442695, %v1185_v29  ;;  %v2622_v51 = vmul.f32 -1.442695, %v1151_v12  ;;  %v1184_v15 = vand.u32 2147483647, %v1151_v12 }
 0x53d   :  { %v1182_v0 = vmin.f32 %v1151_v12, 0.0  ;;  %v1273_v12 = vld [vmem:[%s4481_s2] sm:$0xff] }
 0x53e   :  { %3035 = vpow2.f32 %v1187_v27  ;;  %v1186_v60 = vsub.f32 0.0, %v1184_v15  ;;  %v1274_v27 = vld [vmem:[%s4481_s2 + $0x8] sm:$0xff] }
 0x53f   :  { %3037 = vpow2.f32 %v2622_v51  ;;  %v1401_v51 = vpack.c.bf16 %v1274_v27, %v1273_v12 }
 0x540   :  { %v1189_v37 = vmul.f32 1.442695, %v1186_v60 }
 0x541   :  { %2781 = vmatprep.mubr.msk.bf16.mxu0 %vm409_vm3, %v1401_v51 }
 0x542   :  { %3039 = vpow2.f32 %v1189_v37 }
 0x547   :  { %v3034_v2 = vpop.eup %3033 }
 0x548   :  { %v1158_v34 = vadd.f32 1.0, %v3034_v2 }
 0x54a   :  { %3041 = vrcp.f32 %v1158_v34 }
 0x54b   :  { %v3036_v21 = vpop.eup %3035 }
 0x54c   :  { %v3038_v39 = vpop.eup %3037  ;;  %v1191_v45 = vadd.f32 1.0, %v3036_v21 }
 0x54d   :  { %v1159_v31 = vadd.f32 1.0, %v3038_v39 }
 0x54e   :  { %3043 = vlog2.f32 %v1191_v45 }
 0x54f   :  { %3045 = vrcp.f32 %v1159_v31  ;;  %v3040_v61 = vpop.eup %3039 }
 0x550   :  { %v1192_v30 = vadd.f32 1.0, %v3040_v61 }
 0x552   :  { %3047 = vlog2.f32 %v1192_v30 }
 0x557   :  { %v3042_v56 = vpop.eup %3041 }
 0x558   :  { %v1168_v42 = vrot.slane %v3042_v56, 4 }
 0x55a   :  { %v1173_v16 = vmul.f32 %v1168_v42, %v1164_v1 }
 0x55b   :  { %v3044_v24 = vpop.eup %3043 }
 0x55c   :  { %v3046_v36 = vpop.eup %3045  ;;  %1179 = vst.msk [vmem:[%s3437_s30 + $0x10] sm:$0xf0] %vm1178_vm9, %v1173_v16  ;;  %v1194_v23 = vmul.f32 0.6931472, %v3044_v24 }
 0x55d   :  { %v1169_v20 = vrot.slane %v3046_v36, 4 }
 0x55e   :  { %v1197_v4 = vsub.f32 %v1181_v33, %v1194_v23 }
 0x55f   :  { %v1170_v22 = vsel %vm974_vm5, %v1168_v42, %v1169_v20  ;;  %v3048_v44 = vpop.eup %3047 }
 0x560   :  { %v1174_v28 = vmul.f32 %v1170_v22, %v1165_v41  ;;  %1240 = vrot.lane.b32.xlu1 %v1197_v4, %s3175_s11  ;;  %v1196_v49 = vmul.f32 0.6931472, %v3048_v44  ;;  %v1223_v25 = vsel %vm535_vm4, %v1197_v4, 0.0  ;;  %v1275_v4 = vld [vmem:[%s4481_s2 + $0x10] sm:$0xff]  ;;  %s4517_s2 = sld [smem:[#allocation37_spill]] }
 0x561   :  { %v1402_v22 = vpack.c.bf16 %v1275_v4, %v1275_v4 }
 0x562   :  { %1180 = vst.msk [vmem:[%s3437_s30 + $0x18] sm:$0xff] %vm219_vm0, %v1174_v28  ;;  %v1198_v62 = vsub.f32 %v1182_v0, %v1196_v49 }
 0x563   :  { %v1280_v55 = vld [vmem:[%s3437_s30 + $0x10] sm:$0xff] }
 0x564   :  { %v1298_v11 = vadd.f32 %v3742_v57, %v1280_v55  ;;  %1242 = vrot.lane.b32.xlu0 %v1198_v62, %s3175_s11  ;;  %v1321_v57 = vpack.c.bf16 %v1268_v46, %v1267_v32 }
 0x566   :  { %v4035_v26 = vmul.f32 %v3746_v5, %v1298_v11  ;;  %v1225_v5 = vsel %vm1224_vm10, %v1198_v62, 0.0 }
 0x567   :  { %v1226_v29 = vadd.f32 %v1225_v5, %v1223_v25 }
 0x568   :  { %v1318_v43 = vsel %vm974_vm5, %v4035_v26, %v3897_v63  ;;  %1500 = vst.msk [vmem:[%s3437_s30 + $0x10] sm:$0xf] %vm1176_vm8, %v4035_v26 }
 0x569   :  { %v1319_v35 = vpack.c.bf16 %v1318_v43, %v3665_v6 }
 0x56b   :  { %2771 = vmatprep.subr.bf16.mxu1 %v1319_v35 }
 0x56c   :  { %2772 = vmatpush3.bf16.msra.mxu1 %v1319_v35  ;;  %v4089_v35 = vpack.c.bf16 %v3882_v50, %v3900_v48 }
 0x56f   :  { %2774 = vmatmul.mubr.msk.bf16.vlgmr.msra.gmra.mxu1 %vm1013_vm7, %v1321_v57  ;;  %v1584_v57 = vld [vmem:[%s4482_s7] sm:$0xff] }
 0x584   :  { %1227 = vadd.xlane.f32.xlu1 %v1226_v29 }
 0x5d2   :  { %v1241_v15 = vpop.permute.xlu1 %1240 }
 0x5d3   :  { %v1246_v6 = vsel %vm535_vm4, %v1241_v15, 0.0 }
 0x5d6   :  { %v1243_v60 = vpop.permute.xlu0 %1242 }
 0x5d7   :  { %v1247_v37 = vsel %vm1224_vm10, %v1243_v60, 0.0 }
 0x5d8   :  { %v1248_v2 = vadd.f32 %v1247_v37, %v1246_v6 }
 0x5da   :  { %1249 = vadd.xlane.f32.xlu1 %v1248_v2 }
 0x60d   :  { %v1228_v34 = vpop.xlane.xlu1 %1227 }
 0x60e   :  { %v1229_v21 = vrot.slane %v1228_v34, 4 }
 0x610   :  { %v1230_v39 = vadd.f32 %v1229_v21, %v1228_v34 }
 0x612   :  { %v1231_v45 = vrot.slane %v1230_v39, 2 }
 0x614   :  { %v1232_v31 = vadd.f32 %v1231_v45, %v1230_v39 }
 0x616   :  { %v1233_v61 = vrot.slane %v1232_v31, 1 }
 0x618   :  { %v1234_v30 = vadd.f32 %v1233_v61, %v1232_v31 }
 0x61a   :  { %2877 = vpush %v1234_v30 }
 0x62f   :  { %v2775_v53 = vpop.f32.mrf.mxu1 }
 0x630   :  { %v1391_v38 = vadd.f32 %v2775_v53, %v3750_v8  ;;  %v1537_v8 = vrot.slane %v3937_v47, 4 }
 0x631   :  { %v1382_v56 = vpop.f32.mrf.mxu1 }
 0x632   :  { %v1383_v42 = vadd.f32 %v1382_v56, %v3754_v9  ;;  %v1399_v24 = vmax.f32 %v1391_v38, 0.0 }
 0x633   :  { %v2776_v1 = vpop.f32.mrf.mxu1 }
 0x634   :  { %v1394_v52 = vadd.f32 %v2776_v1, %v3744_v3  ;;  %v1397_v33 = vmax.f32 %v1383_v42, 0.0  ;;  %v1538_v3 = vadd.f32 %v1537_v8, %v3937_v47  ;;  %v4078_v47 = vpack.c.bf16 %v3888_v59, %v3888_v59  ;;  %v1585_v59 = vld [vmem:[%s4482_s7 + $0x8] sm:$0xff]  ;;  %v1281_v1 = vld [vmem:[%s3437_s30 + $0x18] sm:$0xff] }
 0x635   :  { %v1385_v16 = vpop.f32.mrf.mxu1  ;;  %v1625_v5 = vpack.c.bf16 %v1585_v59, %v1584_v57  ;;  %v4484_v59 = vld [vmem:[#allocation43_spill] sm:$0xff] }
 0x636   :  { %v1400_v36 = vmax.f32 %v1394_v52, 0.0  ;;  %v1386_v40 = vadd.f32 %v1385_v16, %v3748_v54  ;;  %v1539_v9 = vrot.slane %v1538_v3, 2  ;;  %v4084_v46 = vsel %vm974_vm5, %v4078_v47, 0 }
 0x637   :  { %v1299_v52 = vadd.f32 %v3845_v17, %v1281_v1 }
 0x638   :  { %v1404_v23 = vpack.c.bf16 %v1400_v36, %v1399_v24  ;;  %v1398_v20 = vmax.f32 %v1386_v40, 0.0  ;;  %v1540_v28 = vadd.f32 %v1539_v9, %v1538_v3 }
 0x63a   :  { %v1403_v41 = vpack.c.bf16 %v1398_v20, %v1397_v33  ;;  %2777 = vmatprep.subr.bf16.mxu0 %v1404_v23  ;;  %v1541_v62 = vrot.slane %v1540_v28, 1  ;;  %v1317_v20 = vmul.f32 %v3818_v58, %v1299_v52  ;;  %v4490_v52 = vld [vmem:[#allocation41_spill] sm:$0xff] }
 0x63b   :  { %2778 = vmatpush3.bf16.msra.mxu0 %v1404_v23 }
 0x63c   :  { %2779 = vmatprep.subr.bf16.mxu0 %v1403_v41  ;;  %v1542_v43 = vadd.f32 %v1541_v62, %v1540_v28  ;;  %v1587_v62 = vld [vmem:[%s4482_s7 + $0x18] sm:$0xff] }
 0x63f   :  { %2780 = vmatpush3.bf16.msra.mxu0 %v1403_v41 }
 0x640   :  { %2859 = vmatprep.subr.msk.bf16.mxu0 %vm974_vm5, %v4078_v47 }
 0x642   :  { %2782 = vmatmul.mubr.msk.bf16.vlgmr.msra.gmra.mxu0 %vm409_vm3, %v1402_v22 }
 0x643   :  { %2786 = vmatpush3.bf16.msra.mxu0 %v4084_v46  ;;  %2791 = vmatprep.mubr.msk.bf16.mxu0 %vm1647_vm11, %v1625_v5 }
 0x644   :  { %2787 = vmatprep.subr.bf16.mxu0 %v4089_v35 }
 0x647   :  { %2788 = vmatpush3.bf16.msra.mxu0 %v4089_v35 }
 0x64b   :  { %s4070_s21 = spop %2877 }
 0x663   :  { %v1250_v54 = vpop.xlane.xlu1 %1249 }
 0x664   :  { %v1251_v44 = vrot.slane %v1250_v54, 4 }
 0x666   :  { %v1252_v0 = vadd.f32 %v1251_v44, %v1250_v54 }
 0x668   :  { %v1253_v49 = vrot.slane %v1252_v0, 2 }
 0x66a   :  { %v1254_v55 = vadd.f32 %v1253_v49, %v1252_v0  ;;  %v1586_v49 = vld [vmem:[%s4482_s7 + $0x10] sm:$0xff] }
 0x66c   :  { %v1255_v11 = vrot.slane %v1254_v55, 1 }
 0x66e   :  { %v1256_v32 = vadd.f32 %v1255_v11, %v1254_v55  ;;  %v1626_v11 = vpack.c.bf16 %v1587_v62, %v1586_v49 }
 0x670   :  { %2879 = vpush %v1256_v32  ;;  %v4483_v32 = vld [vmem:[#allocation46_spill] sm:$0xff] }
 0x671   :  { %2881 = vpush %v1542_v43 }
 0x6a1   :  { %s4072_s3 = spop %2879 }
 0x6a2   :  { %s1258_s8 = sadd.f32 %s4072_s3, %s4068_s13  ;;  %s4163_s20 = spop %2881 }
 0x6a4   :  { %s4169_s10 = sadd.f32 %s4163_s20, %s1258_s8 }
 0x702   :  { %v2783_v25 = vpop.f32.mrf.mxu0 }
 0x703   :  { %v1469_v36 = vadd.f32 %v2783_v25, %v3849_v18 }
 0x704   :  { %v1460_v29 = vpop.f32.mrf.mxu0 }
 0x705   :  { %v1461_v12 = vadd.f32 %v1460_v29, %v3758_v13  ;;  %v1489_v17 = vadd.f32 %v1469_v36, %v1317_v20  ;;  %v3176_v29 = vmov 0.0   ;;  %v1837_v20 = vld [vmem:[%s4487_s12] sm:$0xff] }
 0x706   :  { %v2784_v27 = vpop.f32.mrf.mxu0  ;;  %2795 = vmatprep.subr.bf16.mxu1 %v3176_v29  ;;  %2799 = vmatprep.mubr.msk.bf16.mxu1 %vm3177_vm12, %v3176_v29 }
 0x707   :  { %v1474_v51 = vadd.f32 2.0, %v1461_v12 }
 0x708   :  { %v1463_v15 = vpop.f32.mrf.mxu0 }
 0x709   :  { %v2627_v60 = vmul.f32 -1.442695, %v1474_v51  ;;  %v1505_v48 = vand.u32 2147483647, %v1474_v51  ;;  %v1464_v50 = vadd.f32 %v1463_v15, %v3752_v7  ;;  %v1503_v41 = vmin.f32 %v1474_v51, 0.0 }
 0x70b   :  { %3049 = vpow2.f32 %v2627_v60  ;;  %v1507_v6 = vsub.f32 0.0, %v1505_v48  ;;  %v1475_v37 = vadd.f32 2.0, %v1464_v50  ;;  %v1488_v16 = vadd.f32 %v1464_v50, %v4035_v26 }
 0x70d   :  { %v1509_v2 = vmul.f32 1.442695, %v1507_v6  ;;  %v2628_v34 = vmul.f32 -1.442695, %v1475_v37  ;;  %v1506_v21 = vand.u32 2147483647, %v1475_v37 }
 0x70e   :  { %v1504_v9 = vmin.f32 %v1475_v37, 0.0 }
 0x70f   :  { %3051 = vpow2.f32 %v1509_v2  ;;  %v1508_v39 = vsub.f32 0.0, %v1506_v21 }
 0x710   :  { %3053 = vpow2.f32 %v2628_v34 }
 0x711   :  { %v1511_v45 = vmul.f32 1.442695, %v1508_v39 }
 0x713   :  { %3055 = vpow2.f32 %v1511_v45 }
 0x718   :  { %v3050_v13 = vpop.eup %3049 }
 0x719   :  { %v1482_v31 = vadd.f32 1.0, %v3050_v13  ;;  %v4486_v13 = vld [vmem:[#allocation42_spill] sm:$0xff] }
 0x71b   :  { %3057 = vrcp.f32 %v1482_v31 }
 0x71c   :  { %v3052_v61 = vpop.eup %3051 }
 0x71d   :  { %v3054_v30 = vpop.eup %3053  ;;  %v1513_v53 = vadd.f32 1.0, %v3052_v61 }
 0x71e   :  { %v1483_v56 = vadd.f32 1.0, %v3054_v30  ;;  %v4488_v30 = vld [vmem:[#allocation40_spill] sm:$0xff] }
 0x71f   :  { %3059 = vlog2.f32 %v1513_v53 }
 0x720   :  { %3061 = vrcp.f32 %v1483_v56  ;;  %v3056_v7 = vpop.eup %3055 }
 0x721   :  { %v1514_v38 = vadd.f32 1.0, %v3056_v7 }
 0x723   :  { %3063 = vlog2.f32 %v1514_v38  ;;  %v4489_v38 = vld [vmem:[#allocation44_spill] sm:$0xff] }
 0x728   :  { %v3058_v42 = vpop.eup %3057 }
 0x729   :  { %v1492_v24 = vrot.slane %v3058_v42, 4 }
 0x72b   :  { %v1497_v40 = vmul.f32 %v1492_v24, %v1488_v16 }
 0x72c   :  { %v3060_v33 = vpop.eup %3059 }
 0x72d   :  { %v3062_v23 = vpop.eup %3061  ;;  %1501 = vst.msk [vmem:[%s3437_s30 + $0x10] sm:$0xf0] %vm1178_vm9, %v1497_v40  ;;  %v1516_v4 = vmul.f32 0.6931472, %v3060_v33  ;;  %v1592_v33 = vld [vmem:[%s4485_s14] sm:$0xff] }
 0x72e   :  { %v1493_v22 = vrot.slane %v3062_v23, 4  ;;  %v1593_v23 = vld [vmem:[%s4485_s14 + $0x8] sm:$0xff] }
 0x72f   :  { %v1519_v8 = vsub.f32 %v1503_v41, %v1516_v4  ;;  %v1838_v41 = vld [vmem:[%s4487_s12 + $0x8] sm:$0xff] }
 0x730   :  { %v1494_v26 = vsel %vm974_vm5, %v1492_v24, %v1493_v22  ;;  %v3064_v18 = vpop.eup %3063  ;;  %v1710_v22 = vpack.c.bf16 %v1593_v23, %v1592_v33 }
 0x731   :  { %v1498_v3 = vmul.f32 %v1494_v26, %v1489_v17  ;;  %1561 = vrot.lane.b32.xlu1 %v1519_v8, %s3175_s11  ;;  %v1518_v54 = vmul.f32 0.6931472, %v3064_v18  ;;  %v1545_v5 = vsel %vm535_vm4, %v1519_v8, 0.0  ;;  %v1876_v17 = vpack.c.bf16 %v1838_v41, %v1837_v20  ;;  %v1839_v26 = vld [vmem:[%s4487_s12 + $0x10] sm:$0xff]  ;;  %v1840_v18 = vld [vmem:[%s4487_s12 + $0x18] sm:$0xff] }
 0x733   :  { %1502 = vst.msk [vmem:[%s3437_s30 + $0x18] sm:$0xff] %vm219_vm0, %v1498_v3  ;;  %v1520_v58 = vsub.f32 %v1504_v9, %v1518_v54  ;;  %v1877_v3 = vpack.c.bf16 %v1840_v18, %v1839_v26 }
 0x734   :  { %v1596_v44 = vld [vmem:[%s3437_s30 + $0x10] sm:$0xff] }
 0x735   :  { %v1608_v28 = vadd.f32 %v3762_v14, %v1596_v44  ;;  %1563 = vrot.lane.b32.xlu0 %v1520_v58, %s3175_s11 }
 0x737   :  { %v1620_v0 = vmul.f32 %v3756_v10, %v1608_v28  ;;  %v1546_v10 = vsel %vm1224_vm10, %v1520_v58, 0.0 }
 0x738   :  { %v1547_v25 = vadd.f32 %v1546_v10, %v1545_v5 }
 0x739   :  { %v1622_v55 = vpack.c.bf16 %v3894_v19, %v1620_v0  ;;  %1776 = vst.msk [vmem:[%s3437_s30 + $0x10] sm:$0xff] %vm219_vm0, %v1620_v0 }
 0x73a   :  { %v1597_v18 = vld [vmem:[%s3437_s30 + $0x18] sm:$0xff] }
 0x73b   :  { %2789 = vmatprep.subr.bf16.mxu0 %v1622_v55 }
 0x73c   :  { %2790 = vmatpush3.bf16.msra.mxu0 %v1622_v55 }
 0x73d   :  { %2813 = vmatprep.subr.bf16.mxu0 %v3176_v29 }
 0x73f   :  { %2792 = vmatmul.mubr.msk.bf16.vlgmr.msra.gmra.mxu0 %vm1647_vm11, %v1626_v11 }
 0x740   :  { %v1849_v43 = vld [vmem:[%s3437_s30 + $0x10] sm:$0xff]  ;;  %2817 = vmatprep.mubr.msk.bf16.mxu0 %vm3177_vm12, %v3176_v29 }
 0x741   :  { %v1861_v57 = vadd.f32 %v4483_v32, %v1849_v43  ;;  %v3109_v43 = vld [vmem:[%s4426_s1] sm:$0xff] }
 0x742   :  { %v2034_v32 = vand.u32 2147483647, %v3109_v43  ;;  %v3111_v43 = vld [vmem:[%s4431_s17] sm:$0xff] }
 0x743   :  { %v1873_v14 = vmul.f32 %v4484_v59, %v1861_v57  ;;  %v3110_v57 = vld [vmem:[%s4426_s1 + $0x8] sm:$0xff] }
 0x744   :  { %v2035_v59 = vand.u32 2147483647, %v3110_v57  ;;  %3065 = vlog2.f32 %v2034_v32  ;;  %v2269_v32 = vand.u32 2147483647, %v3111_v43  ;;  %v4502_v57 = vld [vmem:[#allocation71_spill] sm:$0xff]  ;;  %v4511_v43 = vld [vmem:[#allocation73_spill] sm:$0xff] }
 0x745   :  { %2023 = vst.msk [vmem:[%s3437_s30 + $0x10] sm:$0xff] %vm219_vm0, %v1873_v14  ;;  %v1875_v8 = vpack.c.bf16 %v3894_v19, %v1873_v14 }
 0x746   :  { %3067 = vlog2.f32 %v2035_v59  ;;  %v4197_v59 = vpack.c.bf16 %v4502_v57, %v4502_v57 }
 0x751   :  { %v3066_v14 = vpop.eup %3065 }
 0x752   :  { %v2037_v5 = vmul.f32 0.6931472, %v3066_v14  ;;  %v4503_v14 = vld [vmem:[#allocation74_spill] sm:$0xff] }
 0x753   :  { %v3068_v10 = vpop.eup %3067 }
 0x755   :  { %1548 = vadd.xlane.f32.xlu1 %v1547_v25  ;;  %v2039_v25 = vmul.f32 0.6931472, %v3068_v10  ;;  %v4504_v10 = vld [vmem:[#allocation72_spill] sm:$0xff] }
 0x7a3   :  { %v1562_v12 = vpop.permute.xlu1 %1561 }
 0x7a4   :  { %v1567_v51 = vsel %vm535_vm4, %v1562_v12, 0.0  ;;  %v2040_v12 = vsel %vm517_vm2, %v2037_v5, 0.0  ;;  %v4201_v5 = vpack.c.bf16 %v4504_v10, %v4503_v14 }
 0x7a7   :  { %v1564_v27 = vpop.permute.xlu0 %1563 }
 0x7a8   :  { %v1568_v15 = vsel %vm1224_vm10, %v1564_v27, 0.0  ;;  %v2041_v27 = vsel %vm517_vm2, %v2039_v25, 0.0  ;;  %v4207_v25 = vsel %vm2138_vm13, %v4197_v59, 0 }
 0x7a9   :  { %v1569_v60 = vadd.f32 %v1568_v15, %v1567_v51  ;;  %v2042_v51 = vadd.f32 %v2041_v27, %v2040_v12  ;;  %v2082_v12 = vld [vmem:[%s4501_s16] sm:$0xff]  ;;  %v2083_v27 = vld [vmem:[%s4501_s16 + $0x8] sm:$0xff] }
 0x7ab   :  { %1570 = vadd.xlane.f32.xlu1 %v1569_v60  ;;  %2043 = vadd.xlane.f32.xlu0 %v2042_v51  ;;  %v4492_v60 = vld [vmem:[#allocation50_spill] sm:$0xff]  ;;  %v2109_v51 = vpack.c.bf16 %v2083_v27, %v2082_v12 }
 0x7de   :  { %v1549_v48 = vpop.xlane.xlu1 %1548 }
 0x7df   :  { %v1550_v50 = vrot.slane %v1549_v48, 4 }
 0x7e1   :  { %v1551_v6 = vadd.f32 %v1550_v50, %v1549_v48 }
 0x7e3   :  { %v1552_v37 = vrot.slane %v1551_v6, 2 }
 0x7e5   :  { %v1553_v2 = vadd.f32 %v1552_v37, %v1551_v6 }
 0x7e7   :  { %v1554_v34 = vrot.slane %v1553_v2, 1 }
 0x7e9   :  { %v1555_v21 = vadd.f32 %v1554_v34, %v1553_v2 }
 0x7eb   :  { %2883 = vpush %v1555_v21 }
 0x7ff   :  { %v2793_v39 = vpop.f32.mrf.mxu0 }
 0x800   :  { %v1700_v31 = vadd.f32 %v2793_v39, %v4486_v13 }
 0x801   :  { %v1691_v45 = vpop.f32.mrf.mxu0 }
 0x802   :  { %v1708_v7 = vmax.f32 %v1700_v31, 0.0  ;;  %v1692_v1 = vadd.f32 %v1691_v45, %v4489_v38 }
 0x803   :  { %v2794_v61 = vpop.f32.mrf.mxu0 }
 0x804   :  { %v1703_v53 = vadd.f32 %v2794_v61, %v4488_v30  ;;  %v1706_v40 = vmax.f32 %v1692_v1, 0.0  ;;  %v4493_v61 = vld [vmem:[#allocation48_spill] sm:$0xff] }
 0x805   :  { %v1694_v56 = vpop.f32.mrf.mxu0 }
 0x806   :  { %v1709_v42 = vmax.f32 %v1703_v53, 0.0  ;;  %v1695_v16 = vadd.f32 %v1694_v56, %v4490_v52  ;;  %v4495_v56 = vld [vmem:[#allocation45_spill] sm:$0xff] }
 0x808   :  { %v1712_v24 = vpack.c.bf16 %v1709_v42, %v1708_v7  ;;  %v1707_v36 = vmax.f32 %v1695_v16, 0.0  ;;  %v4496_v42 = vld [vmem:[#allocation49_spill] sm:$0xff] }
 0x80a   :  { %2796 = vmatpush3.bf16.msra.mxu1 %v1712_v24  ;;  %v1711_v4 = vpack.c.bf16 %v1707_v36, %v1706_v40  ;;  %v4497_v24 = vld [vmem:[#allocation47_spill] sm:$0xff] }
 0x80b   :  { %2797 = vmatprep.subr.bf16.mxu1 %v3176_v29 }
 0x80e   :  { %2798 = vmatpush3.bf16.msra.mxu1 %v1711_v4  ;;  %v1845_v4 = vld [vmem:[%s4494_s9] sm:$0xff] }
 0x80f   :  { %2860 = vmatprep.subr.msk.bf16.mxu1 %vm974_vm5, %v4078_v47  ;;  %v4491_v47 = vld [vmem:[#allocation76_spill] sm:$0xff] }
 0x811   :  { %2800 = vmatmul.mubr.msk.bf16.vlgmr.msra.gmra.mxu1 %vm409_vm3, %v1710_v22  ;;  %v1846_v22 = vld [vmem:[%s4494_s9 + $0x8] sm:$0xff] }
 0x812   :  { %2804 = vmatpush3.bf16.msra.mxu1 %v4084_v46  ;;  %2809 = vmatprep.mubr.msk.bf16.mxu1 %vm1647_vm11, %v1876_v17  ;;  %v1798_v46 = vrot.slane %v4491_v47, 4 }
 0x813   :  { %2805 = vmatprep.subr.bf16.mxu1 %v4089_v35 }
 0x814   :  { %v1799_v9 = vadd.f32 %v1798_v46, %v4491_v47  ;;  %v4498_v47 = vld [vmem:[#allocation57_spill] sm:$0xff] }
 0x815   :  { %v1609_v46 = vadd.f32 %v4498_v47, %v1597_v18 }
 0x816   :  { %2806 = vmatpush3.bf16.msra.mxu1 %v4089_v35  ;;  %v1800_v19 = vrot.slane %v1799_v9, 2 }
 0x817   :  { %2807 = vmatprep.subr.bf16.mxu1 %v1875_v8 }
 0x818   :  { %v1801_v58 = vadd.f32 %v1800_v19, %v1799_v9  ;;  %v4499_v9 = vld [vmem:[#allocation59_spill] sm:$0xff] }
 0x81a   :  { %2808 = vmatpush3.bf16.msra.mxu1 %v1875_v8  ;;  %v1802_v0 = vrot.slane %v1801_v58, 1 }
 0x81b   :  { %2831 = vmatprep.subr.bf16.mxu1 %v3176_v29 }
 0x81c   :  { %v1803_v55 = vadd.f32 %v1802_v0, %v1801_v58  ;;  %s4171_s1 = spop %2883 }
 0x81d   :  { %2810 = vmatmul.mubr.msk.bf16.vlgmr.msra.gmra.mxu1 %vm1647_vm11, %v1877_v3  ;;  %v1957_v3 = vpack.c.bf16 %v1846_v22, %v1845_v4  ;;  %v4507_v22 = vld [vmem:[#allocation54_spill] sm:$0xff] }
 0x81e   :  { %2835 = vmatprep.mubr.msk.bf16.mxu1 %vm3177_vm12, %v3176_v29 }
 0x834   :  { %v1571_v35 = vpop.xlane.xlu1 %1570 }
 0x835   :  { %v1572_v54 = vrot.slane %v1571_v35, 4 }
 0x837   :  { %v1573_v44 = vadd.f32 %v1572_v54, %v1571_v35  ;;  %v4500_v35 = vld [vmem:[#allocation52_spill] sm:$0xff] }
 0x838   :  { %v1621_v54 = vmul.f32 %v4500_v35, %v1609_v46 }
 0x839   :  { %v1574_v28 = vrot.slane %v1573_v44, 2 }
 0x83b   :  { %v1575_v49 = vadd.f32 %v1574_v28, %v1573_v44 }
 0x83d   :  { %v1576_v62 = vrot.slane %v1575_v49, 1 }
 0x83f   :  { %v1577_v11 = vadd.f32 %v1576_v62, %v1575_v49 }
 0x841   :  { %2885 = vpush %v1577_v11 }
 0x842   :  { %2887 = vpush %v1803_v55 }
 0x872   :  { %s4173_s29 = spop %2885 }
 0x873   :  { %s1579_s15 = sadd.f32 %s4173_s29, %s4169_s10  ;;  %s4248_s17 = spop %2887 }
 0x875   :  { %s4254_s25 = sadd.f32 %s4248_s17, %s1579_s15 }
 0x8d1   :  { %v1760_v15 = vpop.f32.mrf.mxu1 }
 0x8d2   :  { %v1761_v48 = vadd.f32 %v1760_v15, %v4492_v60  ;;  %v4215_v15 = vpop.xlane.xlu0 %2043 }
 0x8d3   :  { %v2801_v50 = vpop.f32.mrf.mxu1  ;;  %v2045_v14 = vrot.slane %v4215_v15, 4 }
 0x8d4   :  { %v1767_v6 = vadd.f32 2.0, %v1761_v48 }
 0x8d5   :  { %v1763_v37 = vpop.f32.mrf.mxu1  ;;  %v2046_v10 = vadd.f32 %v2045_v14, %v4215_v15  ;;  %v4518_v14 = vld [vmem:[#allocation65_spill] sm:$0xff] }
 0x8d6   :  { %v2632_v2 = vmul.f32 -1.442695, %v1767_v6  ;;  %v1779_v34 = vand.u32 2147483647, %v1767_v6  ;;  %v1764_v19 = vadd.f32 %v1763_v37, %v4499_v9  ;;  %v1778_v49 = vmin.f32 %v1767_v6, 0.0 }
 0x8d7   :  { %v2802_v21 = vpop.f32.mrf.mxu1  ;;  %v2047_v12 = vrot.slane %v2046_v10, 2 }
 0x8d8   :  { %3069 = vpow2.f32 %v2632_v2  ;;  %v1780_v39 = vsub.f32 0.0, %v1779_v34  ;;  %v1774_v58 = vadd.f32 %v1764_v19, %v1621_v54 }
 0x8da   :  { %v1781_v45 = vmul.f32 1.442695, %v1780_v39 }
 0x8dc   :  { %3071 = vpow2.f32 %v1781_v45 }
 0x8dd   :  { %v2811_v13 = vpop.f32.mrf.mxu1 }
 0x8de   :  { %v1947_v30 = vadd.f32 %v2811_v13, %v4493_v61 }
 0x8df   :  { %v1938_v31 = vpop.f32.mrf.mxu1 }
 0x8e0   :  { %v1955_v1 = vmax.f32 %v1947_v30, 0.0  ;;  %v1939_v52 = vadd.f32 %v1938_v31, %v4496_v42  ;;  %v4505_v30 = vld [vmem:[#allocation51_spill] sm:$0xff] }
 0x8e1   :  { %v2812_v53 = vpop.f32.mrf.mxu1 }
 0x8e2   :  { %v1950_v7 = vadd.f32 %v2812_v53, %v4495_v56  ;;  %v1953_v41 = vmax.f32 %v1939_v52, 0.0 }
 0x8e3   :  { %v1941_v38 = vpop.f32.mrf.mxu1 }
 0x8e4   :  { %v1956_v16 = vmax.f32 %v1950_v7, 0.0  ;;  %v1942_v36 = vadd.f32 %v1941_v38, %v4497_v24 }
 0x8e5   :  { %v3070_v40 = vpop.eup %3069 }
 0x8e6   :  { %v1771_v33 = vadd.f32 1.0, %v3070_v40  ;;  %v1959_v23 = vpack.c.bf16 %v1956_v16, %v1955_v1  ;;  %v1954_v20 = vmax.f32 %v1942_v36, 0.0 }
 0x8e8   :  { %3073 = vrcp.f32 %v1771_v33  ;;  %2814 = vmatpush3.bf16.msra.mxu0 %v1959_v23  ;;  %v1958_v26 = vpack.c.bf16 %v1954_v20, %v1953_v41  ;;  %v4506_v41 = vld [vmem:[#allocation53_spill] sm:$0xff] }
 0x8e9   :  { %v3072_v17 = vpop.eup %3071  ;;  %2815 = vmatprep.subr.bf16.mxu0 %v3176_v29 }
 0x8ea   :  { %v1783_v8 = vadd.f32 1.0, %v3072_v17 }
 0x8ec   :  { %3075 = vlog2.f32 %v1783_v8  ;;  %2816 = vmatpush3.bf16.msra.mxu0 %v1958_v26  ;;  %v4508_v8 = vld [vmem:[#allocation61_spill] sm:$0xff] }
 0x8ed   :  { %2861 = vmatprep.subr.msk.bf16.mxu0 %vm2138_vm13, %v4197_v59  ;;  %3077 = vlog2.f32 %v2269_v32 }
 0x8ef   :  { %2818 = vmatmul.mubr.msk.bf16.vlgmr.msra.gmra.mxu0 %vm409_vm3, %v1957_v3 }
 0x8f0   :  { %2822 = vmatpush3.bf16.msra.mxu0 %v4207_v25  ;;  %2827 = vmatprep.mubr.msk.bf16.mxu0 %vm2131_vm14, %v2109_v51 }
 0x8f1   :  { %2823 = vmatprep.subr.bf16.mxu0 %v4201_v5 }
 0x8f4   :  { %2824 = vmatpush3.bf16.msra.mxu0 %v4201_v5 }
 0x8f5   :  { %v3074_v44 = vpop.eup %3073 }
 0x8f6   :  { %v1775_v28 = vmul.f32 %v3074_v44, %v1774_v58  ;;  %v4509_v44 = vld [vmem:[#allocation62_spill] sm:$0xff] }
 0x8f8   :  { %1777 = vst.msk [vmem:[%s3437_s30 + $0x18] sm:$0xff] %vm219_vm0, %v1775_v28 }
 0x8f9   :  { %v3076_v0 = vpop.eup %3075 }
 0x8fa   :  { %v1785_v62 = vmul.f32 0.6931472, %v3076_v0  ;;  %v3078_v60 = vpop.eup %3077  ;;  %v4510_v0 = vld [vmem:[#allocation55_spill] sm:$0xff] }
 0x8fb   :  { %v2271_v48 = vmul.f32 0.6931472, %v3078_v60  ;;  %v2048_v60 = vadd.f32 %v2047_v12, %v2046_v10 }
 0x8fc   :  { %v1786_v55 = vsub.f32 %v1778_v49, %v1785_v62 }
 0x8fd   :  { %v2272_v37 = vsel %vm517_vm2, %v2271_v48, 0.0 }
 0x8fe   :  { %1819 = vrot.lane.b32.xlu0 %v1786_v55, %s3175_s11  ;;  %v1806_v11 = vsel %vm535_vm4, %v1786_v55, 0.0  ;;  %v2084_v55 = vld [vmem:[%s4501_s16 + $0x10] sm:$0xff] }
 0x8ff   :  { %1807 = vadd.xlane.f32.xlu1 %v1806_v11  ;;  %v1850_v20 = vld [vmem:[%s3437_s30 + $0x18] sm:$0xff] }
 0x900   :  { %v1862_v4 = vadd.f32 %v4506_v41, %v1850_v20  ;;  %v2085_v11 = vld [vmem:[%s4501_s16 + $0x18] sm:$0xff] }
 0x901   :  { %v2110_v57 = vpack.c.bf16 %v2085_v11, %v2084_v55  ;;  %v2313_v11 = vld [vmem:[%s4517_s2 + $0x8] sm:$0xff] }
 0x902   :  { %v1874_v26 = vmul.f32 %v4508_v8, %v1862_v4  ;;  %v4516_v4 = vld [vmem:[#allocation58_spill] sm:$0xff] }
 0x970   :  { %v1820_v50 = vpop.permute.xlu0 %1819 }
 0x971   :  { %v1822_v6 = vsel %vm535_vm4, %v1820_v50, 0.0 }
 0x972   :  { %1823 = vadd.xlane.f32.xlu1 %v1822_v6  ;;  %v2049_v6 = vrot.slane %v2048_v60, 1 }
 0x976   :  { %2273 = vadd.xlane.f32.xlu1 %v2272_v37 }
 0x988   :  { %v1808_v2 = vpop.xlane.xlu1 %1807 }
 0x989   :  { %v1809_v34 = vrot.slane %v1808_v2, 4 }
 0x98b   :  { %v1810_v21 = vadd.f32 %v1809_v34, %v1808_v2  ;;  %v2050_v34 = vadd.f32 %v2049_v6, %v2048_v60 }
 0x98d   :  { %v1811_v39 = vrot.slane %v1810_v21, 2 }
 0x98f   :  { %v1812_v45 = vadd.f32 %v1811_v39, %v1810_v21 }
 0x991   :  { %v1813_v13 = vrot.slane %v1812_v45, 1 }
 0x993   :  { %v1814_v31 = vadd.f32 %v1813_v13, %v1812_v45 }
 0x995   :  { %2889 = vpush %v1814_v31 }
 0x9af   :  { %v2007_v61 = vpop.f32.mrf.mxu0 }
 0x9b0   :  { %v2008_v53 = vadd.f32 %v2007_v61, %v4505_v30 }
 0x9b1   :  { %v2819_v56 = vpop.f32.mrf.mxu0 }
 0x9b2   :  { %v2014_v7 = vadd.f32 2.0, %v2008_v53 }
 0x9b3   :  { %v2010_v38 = vpop.f32.mrf.mxu0 }
 0x9b4   :  { %v2636_v1 = vmul.f32 -1.442695, %v2014_v7  ;;  %v2026_v42 = vand.u32 2147483647, %v2014_v7  ;;  %v2011_v17 = vadd.f32 %v2010_v38, %v4507_v22  ;;  %v2025_v9 = vmin.f32 %v2014_v7, 0.0 }
 0x9b5   :  { %v2820_v52 = vpop.f32.mrf.mxu0 }
 0x9b6   :  { %3079 = vpow2.f32 %v2636_v1  ;;  %v2027_v16 = vsub.f32 0.0, %v2026_v42  ;;  %v2021_v18 = vadd.f32 %v2011_v17, %v1874_v26  ;;  %v4513_v42 = vld [vmem:[#allocation63_spill] sm:$0xff] }
 0x9b8   :  { %v2028_v24 = vmul.f32 1.442695, %v2027_v16 }
 0x9ba   :  { %3081 = vpow2.f32 %v2028_v24  ;;  %v4514_v24 = vld [vmem:[#allocation56_spill] sm:$0xff] }
 0x9c3   :  { %v3080_v36 = vpop.eup %3079 }
 0x9c4   :  { %v2018_v40 = vadd.f32 1.0, %v3080_v36 }
 0x9c6   :  { %3083 = vrcp.f32 %v2018_v40  ;;  %s4256_s24 = spop %2889 }
 0x9c7   :  { %v3082_v33 = vpop.eup %3081 }
 0x9c8   :  { %v2030_v23 = vadd.f32 1.0, %v3082_v33 }
 0x9ca   :  { %3085 = vlog2.f32 %v2030_v23  ;;  %v4515_v23 = vld [vmem:[#allocation64_spill] sm:$0xff] }
 0x9d3   :  { %v3084_v3 = vpop.eup %3083 }
 0x9d4   :  { %v2022_v47 = vmul.f32 %v3084_v3, %v2021_v18  ;;  %v2090_v18 = vld [vmem:[%s4512_s28] sm:$0xff] }
 0x9d6   :  { %2024 = vst.msk [vmem:[%s3437_s30 + $0x18] sm:$0xff] %vm219_vm0, %v2022_v47  ;;  %v2195_v47 = vpack.c.bf16 %v2090_v18, %v2090_v18 }
 0x9d7   :  { %v3086_v46 = vpop.eup %3085 }
 0x9d8   :  { %v2032_v19 = vmul.f32 0.6931472, %v3086_v46 }
 0x9da   :  { %v2033_v35 = vsub.f32 %v2025_v9, %v2032_v19 }
 0x9dc   :  { %2066 = vrot.lane.b32.xlu0 %v2033_v35, %s3175_s11  ;;  %v2053_v54 = vsel %vm535_vm4, %v2033_v35, 0.0 }
 0x9dd   :  { %2054 = vadd.xlane.f32.xlu1 %v2053_v54  ;;  %v2092_v58 = vld [vmem:[%s3437_s30 + $0x18] sm:$0xff] }
 0x9de   :  { %v2098_v28 = vadd.f32 %v4509_v44, %v2092_v58 }
 0x9e0   :  { %v4231_v49 = vmul.f32 %v4510_v0, %v2098_v28 }
 0x9e2   :  { %v2105_v62 = vsel %vm974_vm5, %v4231_v49, %v3897_v63  ;;  %2258 = vst.msk [vmem:[%s3437_s30 + $0x18] sm:$0xf] %vm1176_vm8, %v4231_v49 }
 0x9e3   :  { %v2106_v32 = vpack.c.bf16 %v4511_v43, %v2105_v62 }
 0x9e5   :  { %2825 = vmatprep.subr.bf16.mxu0 %v2106_v32 }
 0x9e6   :  { %2826 = vmatpush3.bf16.msra.mxu0 %v2106_v32 }
 0x9e7   :  { %2849 = vmatprep.subr.bf16.mxu0 %v3176_v29 }
 0x9e9   :  { %2828 = vmatmul.mubr.msk.bf16.vlgmr.msra.gmra.mxu0 %vm2131_vm14, %v2110_v57 }
 0x9ea   :  { %2853 = vmatprep.mubr.msk.bf16.mxu0 %vm3177_vm12, %v3176_v29 }
 0x9fb   :  { %v1824_v27 = vpop.xlane.xlu1 %1823 }
 0x9fc   :  { %v1825_v51 = vrot.slane %v1824_v27, 4 }
 0x9fe   :  { %v1826_v48 = vadd.f32 %v1825_v51, %v1824_v27 }
 0x9ff   :  { %v2274_v45 = vpop.xlane.xlu1 %2273 }
 0xa00   :  { %v1827_v50 = vrot.slane %v1826_v48, 2  ;;  %v2275_v46 = vrot.slane %v2274_v45, 4 }
 0xa02   :  { %v1828_v37 = vadd.f32 %v1827_v50, %v1826_v48  ;;  %v2276_v9 = vadd.f32 %v2275_v46, %v2274_v45 }
 0xa04   :  { %v1829_v2 = vrot.slane %v1828_v37, 1  ;;  %v2277_v19 = vrot.slane %v2276_v9, 2 }
 0xa06   :  { %v1830_v21 = vadd.f32 %v1829_v2, %v1828_v37  ;;  %v2278_v58 = vadd.f32 %v2277_v19, %v2276_v9  ;;  %v4522_v9 = vld [vmem:[#allocation68_spill] sm:$0xff] }
 0xa08   :  { %2891 = vpush %v1830_v21  ;;  %v2279_v28 = vrot.slane %v2278_v58, 1 }
 0xa09   :  { %2893 = vpush %v2050_v34 }
 0xa39   :  { %s4258_s4 = spop %2891 }
 0xa3a   :  { %s1832_s26 = sadd.f32 %s4258_s4, %s4254_s25  ;;  %s4275_s7 = spop %2893 }
 0xa3c   :  { %s4281_s13 = sadd.f32 %s4275_s7, %s1832_s26 }
 0xa4e   :  { %v2067_v15 = vpop.permute.xlu0 %2066 }
 0xa4f   :  { %v2069_v39 = vsel %vm535_vm4, %v2067_v15, 0.0 }
 0xa50   :  { %2070 = vadd.xlane.f32.xlu1 %v2069_v39 }
 0xa66   :  { %v2055_v13 = vpop.xlane.xlu1 %2054 }
 0xa67   :  { %v2056_v31 = vrot.slane %v2055_v13, 4 }
 0xa69   :  { %v2057_v61 = vadd.f32 %v2056_v31, %v2055_v13 }
 0xa6b   :  { %v2058_v30 = vrot.slane %v2057_v61, 2 }
 0xa6d   :  { %v2059_v53 = vadd.f32 %v2058_v30, %v2057_v61 }
 0xa6f   :  { %v2060_v56 = vrot.slane %v2059_v53, 1 }
 0xa71   :  { %v2061_v7 = vadd.f32 %v2060_v56, %v2059_v53 }
 0xa73   :  { %2895 = vpush %v2061_v7 }
 0xaa4   :  { %s4283_s3 = spop %2895 }
 0xaa9   :  { %v2829_v38 = vpop.f32.mrf.mxu0 }
 0xaaa   :  { %v2185_v52 = vadd.f32 %v2829_v38, %v4513_v42  ;;  %v4519_v38 = vld [vmem:[#allocation60_spill] sm:$0xff]  ;;  %v4520_v42 = vld [vmem:[#allocation66_spill] sm:$0xff] }
 0xaab   :  { %v2176_v1 = vpop.f32.mrf.mxu0 }
 0xaac   :  { %v2193_v33 = vmax.f32 %v2185_v52, 0.0  ;;  %v2177_v20 = vadd.f32 %v2176_v1, %v4515_v23 }
 0xaad   :  { %v2830_v16 = vpop.f32.mrf.mxu0 }
 0xaae   :  { %v2188_v36 = vadd.f32 %v2830_v16, %v4514_v24  ;;  %v2191_v26 = vmax.f32 %v2177_v20, 0.0  ;;  %v2314_v16 = vld [vmem:[%s4517_s2 + $0x10] sm:$0xff]  ;;  %v2315_v24 = vld [vmem:[%s4517_s2 + $0x18] sm:$0xff] }
 0xaaf   :  { %v2179_v40 = vpop.f32.mrf.mxu0 }
 0xab0   :  { %v2194_v41 = vmax.f32 %v2188_v36, 0.0  ;;  %v2180_v22 = vadd.f32 %v2179_v40, %v4516_v4  ;;  %v2338_v40 = vpack.c.bf16 %v2315_v24, %v2314_v16 }
 0xab2   :  { %v2197_v17 = vpack.c.bf16 %v2194_v41, %v2193_v33  ;;  %v2192_v8 = vmax.f32 %v2180_v22, 0.0 }
 0xab4   :  { %2832 = vmatpush3.bf16.msra.mxu1 %v2197_v17  ;;  %v2196_v3 = vpack.c.bf16 %v2192_v8, %v2191_v26 }
 0xab5   :  { %2833 = vmatprep.subr.bf16.mxu1 %v3176_v29 }
 0xab8   :  { %2834 = vmatpush3.bf16.msra.mxu1 %v2196_v3  ;;  %v4521_v3 = vld [vmem:[#allocation67_spill] sm:$0xff] }
 0xab9   :  { %2862 = vmatprep.subr.msk.bf16.mxu1 %vm2138_vm13, %v4197_v59 }
 0xabb   :  { %2836 = vmatmul.mubr.msk.bf16.vlgmr.msra.gmra.mxu1 %vm409_vm3, %v2195_v47 }
 0xabc   :  { %2840 = vmatpush3.bf16.msra.mxu1 %v4207_v25  ;;  %v2280_v25 = vadd.f32 %v2279_v28, %v2278_v58  ;;  %v4523_v58 = vld [vmem:[#allocation69_spill] sm:$0xff]  ;;  %v4524_v28 = vld [vmem:[#allocation70_spill] sm:$0xff] }
 0xabd   :  { %2841 = vmatprep.subr.bf16.mxu1 %v4201_v5 }
 0xac0   :  { %2842 = vmatpush3.bf16.msra.mxu1 %v4201_v5  ;;  %v2312_v5 = vld [vmem:[%s4517_s2] sm:$0xff] }
 0xac1   :  { %v2337_v32 = vpack.c.bf16 %v2313_v11, %v2312_v5  ;;  %v2320_v5 = vld [vmem:[%s3427_s27] sm:$0xff] }
 0xac3   :  { %2845 = vmatprep.mubr.msk.bf16.mxu1 %vm2131_vm14, %v2337_v32  ;;  %v2418_v32 = vpack.c.bf16 %v2320_v5, %v2320_v5 }
 0xad9   :  { %v2071_v35 = vpop.xlane.xlu1 %2070 }
 0xada   :  { %v2072_v54 = vrot.slane %v2071_v35, 4 }
 0xadc   :  { %v2073_v44 = vadd.f32 %v2072_v54, %v2071_v35 }
 0xade   :  { %v2074_v59 = vrot.slane %v2073_v44, 2 }
 0xae0   :  { %v2075_v0 = vadd.f32 %v2074_v59, %v2073_v44 }
 0xae2   :  { %v2076_v62 = vrot.slane %v2075_v0, 1 }
 0xae4   :  { %v2077_v55 = vadd.f32 %v2076_v62, %v2075_v0 }
 0xae6   :  { %2897 = vpush %v2077_v55 }
 0xae7   :  { %2899 = vpush %v2280_v25 }
 0xb17   :  { %s4285_s8 = spop %2897 }
 0xb18   :  { %s2079_s14 = sadd.f32 %s4285_s8, %s4281_s13  ;;  %s2900_s25 = spop %2899 }
 0xb1a   :  { %s2294_s19 = sadd.f32 %s2900_s25, %s2079_s14 }
 0xb7b   :  { %v2240_v57 = vpop.f32.mrf.mxu1 }
 0xb7c   :  { %v2241_v10 = vadd.f32 %v2240_v57, %v4518_v14 }
 0xb7d   :  { %v2837_v12 = vpop.f32.mrf.mxu1 }
 0xb7e   :  { %v2246_v27 = vadd.f32 2.0, %v2241_v10  ;;  %v2253_v45 = vadd.f32 %v2241_v10, %v4231_v49 }
 0xb7f   :  { %v2243_v51 = vpop.f32.mrf.mxu1 }
 0xb80   :  { %v2640_v60 = vmul.f32 -1.442695, %v2246_v27  ;;  %v2261_v48 = vand.u32 2147483647, %v2246_v27  ;;  %v2260_v30 = vmin.f32 %v2246_v27, 0.0 }
 0xb81   :  { %v2838_v50 = vpop.f32.mrf.mxu1 }
 0xb82   :  { %3087 = vpow2.f32 %v2640_v60  ;;  %v2262_v6 = vsub.f32 0.0, %v2261_v48  ;;  %v4525_v50 = vld [vmem:[#allocation75_spill] sm:$0xff] }
 0xb84   :  { %v2263_v37 = vmul.f32 1.442695, %v2262_v6 }
 0xb86   :  { %3089 = vpow2.f32 %v2263_v37 }
 0xb8f   :  { %v3088_v2 = vpop.eup %3087 }
 0xb90   :  { %v2250_v34 = vadd.f32 1.0, %v3088_v2 }
 0xb92   :  { %3091 = vrcp.f32 %v2250_v34 }
 0xb93   :  { %v3090_v21 = vpop.eup %3089 }
 0xb94   :  { %v2265_v15 = vadd.f32 1.0, %v3090_v21 }
 0xb96   :  { %3093 = vlog2.f32 %v2265_v15 }
 0xb9f   :  { %v3092_v39 = vpop.eup %3091 }
 0xba0   :  { %v2255_v13 = vrot.slane %v3092_v39, 4 }
 0xba2   :  { %v2257_v31 = vmul.f32 %v2255_v13, %v2253_v45 }
 0xba3   :  { %v3094_v61 = vpop.eup %3093 }
 0xba4   :  { %2259 = vst.msk [vmem:[%s3437_s30 + $0x18] sm:$0xf0] %vm1178_vm9, %v2257_v31  ;;  %v2267_v53 = vmul.f32 0.6931472, %v3094_v61 }
 0xba6   :  { %v2268_v56 = vsub.f32 %v2260_v30, %v2267_v53 }
 0xba8   :  { %2296 = vrot.lane.b32.xlu1 %v2268_v56, %s3175_s11  ;;  %v2283_v33 = vsel %vm1224_vm10, %v2268_v56, 0.0 }
 0xbab   :  { %v2322_v7 = vld [vmem:[%s3437_s30 + $0x18] sm:$0xff] }
 0xbac   :  { %v2328_v1 = vadd.f32 %v4519_v38, %v2322_v7 }
 0xbae   :  { %v4300_v52 = vmul.f32 %v4520_v42, %v2328_v1 }
 0xbb0   :  { %v2335_v49 = vsel %vm974_vm5, %v4300_v52, %v3897_v63  ;;  %2481 = vst.msk [vmem:[%s3437_s30 + $0x18] sm:$0xf] %vm1176_vm8, %v4300_v52 }
 0xbb1   :  { %v2336_v36 = vpack.c.bf16 %v4511_v43, %v2335_v49 }
 0xbb3   :  { %2843 = vmatprep.subr.bf16.mxu1 %v2336_v36 }
 0xbb4   :  { %2844 = vmatpush3.bf16.msra.mxu1 %v2336_v36  ;;  %v3112_v36 = vld [vmem:[%s4436_s6] sm:$0xff] }
 0xbb7   :  { %2846 = vmatmul.mubr.msk.bf16.vlgmr.msra.gmra.mxu1 %vm2131_vm14, %v2338_v40  ;;  %v2492_v40 = vand.u32 2147483647, %v3112_v36 }
 0xbcc   :  { %2284 = vadd.xlane.f32.xlu1 %v2283_v33 }
 0xc1a   :  { %v2297_v23 = vpop.permute.xlu1 %2296 }
 0xc1b   :  { %v2299_v20 = vsel %vm1224_vm10, %v2297_v23, 0.0 }
 0xc1c   :  { %2300 = vadd.xlane.f32.xlu0 %v2299_v20 }
 0xc55   :  { %v2285_v63 = vpop.xlane.xlu1 %2284 }
 0xc56   :  { %v2286_v41 = vrot.slane %v2285_v63, 4 }
 0xc58   :  { %v2287_v4 = vadd.f32 %v2286_v41, %v2285_v63 }
 0xc5a   :  { %v2288_v22 = vrot.slane %v2287_v4, 2 }
 0xc5c   :  { %v2289_v17 = vadd.f32 %v2288_v22, %v2287_v4 }
 0xc5e   :  { %v2290_v8 = vrot.slane %v2289_v17, 1 }
 0xc60   :  { %v2291_v26 = vadd.f32 %v2290_v8, %v2289_v17 }
 0xc62   :  { %2901 = vpush %v2291_v26 }
 0xc77   :  { %v2847_v43 = vpop.f32.mrf.mxu1 }
 0xc78   :  { %v2408_v47 = vadd.f32 %v2847_v43, %v4521_v3 }
 0xc79   :  { %v2399_v18 = vpop.f32.mrf.mxu1 }
 0xc7a   :  { %v2416_v54 = vmax.f32 %v2408_v47, 0.0  ;;  %v2400_v44 = vadd.f32 %v2399_v18, %v4523_v58 }
 0xc7b   :  { %v2848_v46 = vpop.f32.mrf.mxu1 }
 0xc7c   :  { %v2411_v19 = vadd.f32 %v2848_v46, %v4522_v9  ;;  %v2414_v55 = vmax.f32 %v2400_v44, 0.0 }
 0xc7d   :  { %v2402_v35 = vpop.f32.mrf.mxu1 }
 0xc7e   :  { %v2417_v59 = vmax.f32 %v2411_v19, 0.0  ;;  %v2403_v0 = vadd.f32 %v2402_v35, %v4524_v28 }
 0xc80   :  { %v2420_v62 = vpack.c.bf16 %v2417_v59, %v2416_v54  ;;  %v2415_v25 = vmax.f32 %v2403_v0, 0.0 }
 0xc82   :  { %2850 = vmatpush3.bf16.msra.mxu0 %v2420_v62  ;;  %v2419_v11 = vpack.c.bf16 %v2415_v25, %v2414_v55 }
 0xc83   :  { %2851 = vmatprep.subr.bf16.mxu0 %v3176_v29 }
 0xc86   :  { %2852 = vmatpush3.bf16.msra.mxu0 %v2419_v11 }
 0xc89   :  { %2854 = vmatmul.mubr.msk.bf16.vlgmr.msra.gmra.mxu0 %vm409_vm3, %v2418_v32 }
 0xc93   :  { %s2902_s26 = spop %2901 }
 0xca5   :  { %v2301_v57 = vpop.xlane.xlu0 %2300 }
 0xca6   :  { %v2302_v14 = vrot.slane %v2301_v57, 4 }
 0xca8   :  { %v2303_v10 = vadd.f32 %v2302_v14, %v2301_v57 }
 0xcaa   :  { %v2304_v12 = vrot.slane %v2303_v10, 2 }
 0xcac   :  { %v2305_v27 = vadd.f32 %v2304_v12, %v2303_v10 }
 0xcae   :  { %v2306_v51 = vrot.slane %v2305_v27, 1 }
 0xcb0   :  { %v2307_v60 = vadd.f32 %v2306_v51, %v2305_v27 }
 0xcb2   :  { %2903 = vpush %v2307_v60 }
 0xce3   :  { %s2904_s2 = spop %2903 }
 0xd49   :  { %v2463_v48 = vpop.f32.mrf.mxu0 }
 0xd4a   :  { %v2464_v6 = vadd.f32 %v2463_v48, %v4525_v50 }
 0xd4b   :  { %v2855_v37 = vpop.f32.mrf.mxu0 }
 0xd4c   :  { %v2469_v2 = vadd.f32 2.0, %v2464_v6  ;;  %v2476_v56 = vadd.f32 %v2464_v6, %v4300_v52 }
 0xd4d   :  { %v2466_v34 = vpop.f32.mrf.mxu0 }
 0xd4e   :  { %v2644_v29 = vmul.f32 -1.442695, %v2469_v2  ;;  %v2484_v21 = vand.u32 2147483647, %v2469_v2  ;;  %v2483_v42 = vmin.f32 %v2469_v2, 0.0 }
 0xd4f   :  { %v2856_v15 = vpop.f32.mrf.mxu0 }
 0xd50   :  { %3095 = vpow2.f32 %v2644_v29  ;;  %v2485_v39 = vsub.f32 0.0, %v2484_v21 }
 0xd52   :  { %v2486_v45 = vmul.f32 1.442695, %v2485_v39 }
 0xd54   :  { %3097 = vpow2.f32 %v2486_v45 }
 0xd5d   :  { %v3096_v13 = vpop.eup %3095 }
 0xd5e   :  { %v2473_v31 = vadd.f32 1.0, %v3096_v13 }
 0xd60   :  { %3099 = vrcp.f32 %v2473_v31 }
 0xd61   :  { %v3098_v61 = vpop.eup %3097 }
 0xd62   :  { %v2488_v30 = vadd.f32 1.0, %v3098_v61 }
 0xd64   :  { %3101 = vlog2.f32 %v2488_v30 }
 0xd65   :  { %3103 = vlog2.f32 %v2492_v40 }
 0xd6d   :  { %v3100_v53 = vpop.eup %3099 }
 0xd6e   :  { %v2478_v7 = vrot.slane %v3100_v53, 4 }
 0xd70   :  { %v2480_v38 = vmul.f32 %v2478_v7, %v2476_v56 }
 0xd71   :  { %v3102_v1 = vpop.eup %3101 }
 0xd72   :  { %2482 = vst.msk [vmem:[%s3437_s30 + $0x18] sm:$0xf0] %vm1178_vm9, %v2480_v38  ;;  %v2490_v49 = vmul.f32 0.6931472, %v3102_v1  ;;  %v3104_v33 = vpop.eup %3103  ;;  %s548_s30 = sadd.f32 %s4001_s0, %s3999_s18 }
 0xd73   :  { %v2494_v23 = vmul.f32 0.6931472, %v3104_v33  ;;  %s2309_s18 = sadd.f32 %s2904_s2, %s2294_s19 }
 0xd74   :  { %v2491_v16 = vsub.f32 %v2483_v42, %v2490_v49  ;;  %s875_s27 = sadd.f32 %s4004_s22, %s548_s30 }
 0xd75   :  { %v2495_v52 = vsel %vm517_vm2, %v2494_v23, 0.0 }
 0xd76   :  { %2519 = vrot.lane.b32.xlu1 %v2491_v16, %s3175_s11  ;;  %v2506_v24 = vsel %vm1224_vm10, %v2491_v16, 0.0  ;;  %s888_s6 = sadd.f32 %s4009_s23, %s875_s27 }
 0xd77   :  { %2507 = vadd.xlane.f32.xlu0 %v2506_v24  ;;  %s4526_s27 = sld [smem:[#allocation39_spill]] }
 0xd78   :  { %s1222_s11 = sadd.f32 %s4062_s5, %s888_s6 }
 0xd7a   :  { %s1236_s12 = sadd.f32 %s4070_s21, %s1222_s11 }
 0xd7c   :  { %s1544_s10 = sadd.f32 %s4163_s20, %s1236_s12 }
 0xd7e   :  { %s1557_s29 = sadd.f32 %s4171_s1, %s1544_s10 }
 0xd80   :  { %s1805_s15 = sadd.f32 %s4248_s17, %s1557_s29  ;;  %s3178_s17 = smov [#allocation2]  }
 0xd82   :  { %s1816_s9 = sadd.f32 %s4256_s24, %s1805_s15 }
 0xd84   :  { %s2052_s16 = sadd.f32 %s4275_s7, %s1816_s9 }
 0xd86   :  { %s2063_s4 = sadd.f32 %s4283_s3, %s2052_s16 }
 0xd88   :  { %s2282_s28 = sadd.f32 %s2900_s25, %s2063_s4 }
 0xd8a   :  { %s2293_s0 = sadd.f32 %s2902_s26, %s2282_s28 }
 0xd9a   :  { %2496 = vadd.xlane.f32.xlu1 %v2495_v52 }
 0xde8   :  { %v2520_v20 = vpop.permute.xlu1 %2519 }
 0xde9   :  { %v2522_v63 = vsel %vm1224_vm10, %v2520_v20, 0.0 }
 0xdea   :  { %2523 = vadd.xlane.f32.xlu0 %v2522_v63 }
 0xe00   :  { %v2508_v41 = vpop.xlane.xlu0 %2507 }
 0xe01   :  { %v2509_v4 = vrot.slane %v2508_v41, 4 }
 0xe03   :  { %v2510_v22 = vadd.f32 %v2509_v4, %v2508_v41 }
 0xe05   :  { %v2511_v17 = vrot.slane %v2510_v22, 2 }
 0xe07   :  { %v2512_v18 = vadd.f32 %v2511_v17, %v2510_v22 }
 0xe09   :  { %v2513_v46 = vrot.slane %v2512_v18, 1 }
 0xe0b   :  { %v2514_v35 = vadd.f32 %v2513_v46, %v2512_v18 }
 0xe23   :  { %v2497_v8 = vpop.xlane.xlu1 %2496 }
 0xe24   :  { %v2498_v26 = vrot.slane %v2497_v8, 4 }
 0xe26   :  { %v2499_v43 = vadd.f32 %v2498_v26, %v2497_v8 }
 0xe28   :  { %v2500_v3 = vrot.slane %v2499_v43, 2 }
 0xe2a   :  { %v2501_v47 = vadd.f32 %v2500_v3, %v2499_v43 }
 0xe2c   :  { %v2502_v9 = vrot.slane %v2501_v47, 1 }
 0xe2e   :  { %v2503_v19 = vadd.f32 %v2502_v9, %v2501_v47 }
 0xe30   :  { %2905 = vpush %v2503_v19 }
 0xe31   :  { %2907 = vpush %v2514_v35 }
 0xe61   :  { %s2906_s22 = spop %2905 }
 0xe62   :  { %s2505_s30 = sadd.f32 %s2906_s22, %s2293_s0  ;;  %s2908_s5 = spop %2907 }
 0xe63   :  { %s2517_s23 = sadd.f32 %s2906_s22, %s2309_s18 }
 0xe64   :  { %s2516_s21 = sadd.f32 %s2908_s5, %s2505_s30 }
 0xe66   :  { %2534 = sst [smem:[#allocation2]] %s2516_s21 }
 0xe73   :  { %v2524_v54 = vpop.xlane.xlu0 %2523 }
 0xe74   :  { %v2525_v58 = vrot.slane %v2524_v54, 4 }
 0xe76   :  { %v2526_v44 = vadd.f32 %v2525_v58, %v2524_v54 }
 0xe78   :  { %v2527_v59 = vrot.slane %v2526_v44, 2 }
 0xe7a   :  { %v2528_v28 = vadd.f32 %v2527_v59, %v2526_v44 }
 0xe7c   :  { %v2529_v0 = vrot.slane %v2528_v28, 1 }
 0xe7e   :  { %v2530_v62 = vadd.f32 %v2529_v0, %v2528_v28 }
 0xe80   :  { %2909 = vpush %v2530_v62 }
 0xeb1   :  { %s2910_s20 = spop %2909 }
 0xeb2   :  { %s2532_s1 = sadd.f32 %s2910_s20, %s2517_s23 }
 0xeb4   :  { %2536 = sst [smem:[#allocation2 + $0x1]] %s2532_s1 }
 0xeb5   :  { %2546 = dma.smem_to_hbm %s3178_s17, 16, %s4526_s27, [#allocation3]  }
 0xeb6   :  { %3121 = dma.done.wait [#allocation3], 16  }
 0xeb7   :  { %3122 = vsyncadd [#allocation3], 4294967280 }
 0xeb8   :  { %2552 = sfence }
 0xeb9   :  { %2553 = vsyncpa [#allocation3], 1 }

</bundles_post_ra>
